<compile_context>
chip_gen: v7x
topology: tpu7x:2x2x1
jax: 0.10.0
libtpu: 0.0.40
codegen_flags: <defaults>
</compile_context>

<pallas_src>
import functools

import jax
import jax.numpy as jnp
import numpy as np
from jax.experimental import pallas as pl
from jax.experimental.pallas import tpu as pltpu

CPAD = 128  # channel padding -> full 128-lane tiles everywhere


# ----------------------------- Pallas kernel -----------------------------

def _up_fused_kernel(x1_ref, x2_ref, up_ref, w1_ref, s1_ref, b1_ref,
                     w2_ref, s2_ref, b2_ref, o_ref, xpad_ref, col_ref):
    """Whole Up block for ONE batch element, fully VMEM-resident.

    x1_ref : (1, H1, W1, C1)  bf16   decoder features (pre-upsample)
    x2_ref : (1, H,  W,  C1)  bf16   encoder skip features
    up_ref : (H*W, H1*W1)     bf16   bilinear x2 (align_corners) + pad matrix
    w1_ref : (9*CPAD, CPAD)   bf16   conv1 weights, im2col-flattened, padded
    s1_ref, b1_ref : (1, CPAD) f32   conv1 folded BatchNorm scale / bias
    w2_ref, s2_ref, b2_ref           same for conv2
    o_ref  : (1, Cout, H*W)   f32    NCHW-flattened output (lane-dense H*W)
    xpad_ref : (H+2, W+2, CPAD) f32  zero-bordered feature map (reused x2)
    col_ref  : (H*W, 9*CPAD)  bf16   im2col buffer (reused by both convs)
    """
    _, H1, W1, C1 = x1_ref.shape
    _, H, W, _ = x2_ref.shape
    cout = o_ref.shape[1]

    # ---- upsample(x1) + pad + channel-concat with x2, all in VMEM ---------
    xpad_ref[...] = jnp.zeros_like(xpad_ref)

    # bilinear x2 upsample (align_corners) + spatial pad as one small matmul
    x1flat = x1_ref[0].reshape(H1 * W1, C1)                        # bf16
    x1up = jnp.dot(up_ref[...], x1flat,
                   preferred_element_type=jnp.float32)             # (H*W, C1) f32

    # channel placement matrices: x2 -> lanes [0,C1), up(x1) -> [C1, 2*C1)
    col_ids = jax.lax.broadcasted_iota(jnp.int32, (C1, CPAD), 1)
    row_ids = jax.lax.broadcasted_iota(jnp.int32, (C1, CPAD), 0)
    p_x2 = (col_ids == row_ids).astype(jnp.float32)
    p_x1 = (col_ids == row_ids + C1).astype(jnp.float32)

    x2flat = x2_ref[0].reshape(H * W, C1).astype(jnp.float32)
    interior = (jnp.dot(x2flat, p_x2, preferred_element_type=jnp.float32) +
                jnp.dot(x1up, p_x1, preferred_element_type=jnp.float32))
    xpad_ref[1:H + 1, 1:W + 1, :] = interior.reshape(H, W, CPAD)

    # ---- 3x3 conv + folded BN + ReLU: im2col once, ONE MXU matmul ---------
    def conv3x3_bn_relu(w_ref, s_ref, b_ref):
        for k in range(9):                       # nine lane-aligned tap copies
            dy, dx = k // 3, k % 3
            patch = xpad_ref[dy:dy + H, dx:dx + W, :]              # (H,W,CPAD)
            col_ref[:, k * CPAD:(k + 1) * CPAD] = (
                patch.reshape(H * W, CPAD).astype(col_ref.dtype))
        acc = jnp.dot(col_ref[...], w_ref[...],
                      preferred_element_type=jnp.float32)          # (H*W,CPAD)
        return jnp.maximum(acc * s_ref[...] + b_ref[...], 0.0)     # BN + ReLU

    y1 = conv3x3_bn_relu(w1_ref, s1_ref, b1_ref)
    # intermediate stays in VMEM: write it back into the zero-bordered buffer
    xpad_ref[1:H + 1, 1:W + 1, :] = y1.reshape(H, W, CPAD)
    y2 = conv3x3_bn_relu(w2_ref, s2_ref, b2_ref)

    # lane-dense store: (Cout, H*W) == flattened NCHW (folds the final
    # NHWC->NCHW transpose into the kernel's store layout)
    y2t = jnp.transpose(y2)                                        # (CPAD, H*W)
    o_ref[...] = y2t[:cout, :].reshape(1, cout, H * W)


def up_fused_pallas(x1_nhwc, x2_nhwc, up_mat, w1f, s1, b1, w2f, s2, b2,
                    out_channels):
    N, H1, W1, C1 = x1_nhwc.shape
    _, H, W, _ = x2_nhwc.shape
    return pl.pallas_call(
        _up_fused_kernel,
        out_shape=jax.ShapeDtypeStruct((N, out_channels, H * W), jnp.float32),
        grid=(N,),
        in_specs=[
            pl.BlockSpec((1, H1, W1, C1), lambda n: (n, 0, 0, 0)),
            pl.BlockSpec((1, H, W, C1), lambda n: (n, 0, 0, 0)),
            pl.BlockSpec((H * W, H1 * W1), lambda n: (0, 0)),
            pl.BlockSpec((9 * CPAD, CPAD), lambda n: (0, 0)),
            pl.BlockSpec((1, CPAD), lambda n: (0, 0)),
            pl.BlockSpec((1, CPAD), lambda n: (0, 0)),
            pl.BlockSpec((9 * CPAD, CPAD), lambda n: (0, 0)),
            pl.BlockSpec((1, CPAD), lambda n: (0, 0)),
            pl.BlockSpec((1, CPAD), lambda n: (0, 0)),
        ],
        out_specs=pl.BlockSpec((1, out_channels, H * W), lambda n: (n, 0, 0)),
        scratch_shapes=[
            pltpu.VMEM((H + 2, W + 2, CPAD), jnp.float32),   # padded features
            pltpu.VMEM((H * W, 9 * CPAD), jnp.bfloat16),     # im2col buffer
        ],
        compiler_params=pltpu.CompilerParams(
            dimension_semantics=("parallel",)),
    )(x1_nhwc, x2_nhwc, up_mat, w1f, s1, b1, w2f, s2, b2)


# --------------------------- wrapper-side prep ----------------------------

def _upsample_pad_matrix(h1, w1, h2, w2):
    """(h2*w2, h1*w1) matrix: bilinear x2 upsample (align_corners=True) of an
    (h1, w1) map followed by the Up-block symmetric zero pad to (h2, w2)."""
    def axis_mat(n_in, n_target):
        n_up = 2 * n_in
        src = np.arange(n_up, dtype=np.float32) * ((n_in - 1) / max(n_up - 1, 1))
        i0 = np.clip(np.floor(src).astype(np.int32), 0, n_in - 1)
        i1 = np.clip(i0 + 1, 0, n_in - 1)
        f = src - i0
        u = np.zeros((n_up, n_in), np.float32)
        np.add.at(u, (np.arange(n_up), i0), 1.0 - f)
        np.add.at(u, (np.arange(n_up), i1), f)
        pad_before = (n_target - n_up) // 2
        up = np.zeros((n_target, n_in), np.float32)
        up[pad_before:pad_before + n_up, :] = u
        return up
    return np.kron(axis_mat(h1, h2), axis_mat(w1, w2)).astype(np.float32)


def fold_bn(gamma, beta, mean, var, conv_bias, eps=1e-5):
    scale = gamma / jnp.sqrt(var + eps)
    bias = beta + scale * (conv_bias - mean)
    return scale, bias


def pad_conv_params(w_hwio, scale, bias):
    """Zero-pad channels to CPAD and im2col-flatten the weights (bf16)."""
    kh, kw, cin, cout = w_hwio.shape
    wp = jnp.zeros((kh, kw, CPAD, CPAD), jnp.float32)
    wp = wp.at[:, :, :cin, :cout].set(w_hwio)
    wflat = wp.reshape(kh * kw * CPAD, CPAD).astype(jnp.bfloat16)
    s = jnp.zeros((1, CPAD), jnp.float32).at[0, :cout].set(scale)
    b = jnp.zeros((1, CPAD), jnp.float32).at[0, :cout].set(bias)
    return wflat, s, b


def init_up_params(key, in_channels, out_channels):
    """Deterministic synthetic params for DoubleConv(in_channels, out_channels)."""
    ks = jax.random.split(key, 12)
    w1 = 0.1 * jax.random.normal(ks[0], (3, 3, in_channels, out_channels), jnp.float32)
    b1 = 0.01 * jax.random.normal(ks[1], (out_channels,), jnp.float32)
    g1 = 1.0 + 0.1 * jax.random.normal(ks[2], (out_channels,), jnp.float32)
    be1 = 0.01 * jax.random.normal(ks[3], (out_channels,), jnp.float32)
    m1 = 0.05 * jax.random.normal(ks[4], (out_channels,), jnp.float32)
    v1 = 1.0 + 0.1 * jnp.abs(jax.random.normal(ks[5], (out_channels,), jnp.float32))
    w2 = 0.1 * jax.random.normal(ks[6], (3, 3, out_channels, out_channels), jnp.float32)
    b2 = 0.01 * jax.random.normal(ks[7], (out_channels,), jnp.float32)
    g2 = 1.0 + 0.1 * jax.random.normal(ks[8], (out_channels,), jnp.float32)
    be2 = 0.01 * jax.random.normal(ks[9], (out_channels,), jnp.float32)
    m2 = 0.05 * jax.random.normal(ks[10], (out_channels,), jnp.float32)
    v2 = 1.0 + 0.1 * jnp.abs(jax.random.normal(ks[11], (out_channels,), jnp.float32))

    s1, bb1 = fold_bn(g1, be1, m1, v1, b1)
    s2, bb2 = fold_bn(g2, be2, m2, v2, b2)
    return {"w1": w1, "scale1": s1, "bias1": bb1,
            "w2": w2, "scale2": s2, "bias2": bb2}


def prepare_kernel_params(params):
    w1f, s1, b1 = pad_conv_params(params["w1"], params["scale1"], params["bias1"])
    w2f, s2, b2 = pad_conv_params(params["w2"], params["scale2"], params["bias2"])
    return {"w1f": w1f, "s1": s1, "b1": b1, "w2f": w2f, "s2": s2, "b2": b2}


@functools.partial(jax.jit, static_argnames=("out_channels",))
def up_forward(x1_nchw, x2_nchw, kparams, *, out_channels):
    """Equivalent of Up.forward(x1, x2) with bilinear=True (eval-mode BN)."""
    x1 = jnp.transpose(x1_nchw, (0, 2, 3, 1)).astype(jnp.bfloat16)
    x2 = jnp.transpose(x2_nchw, (0, 2, 3, 1)).astype(jnp.bfloat16)
    N, H1, W1, _ = x1.shape
    _, H, W, _ = x2.shape
    up_mat = jnp.asarray(_upsample_pad_matrix(H1, W1, H, W), jnp.bfloat16)
    y = up_fused_pallas(x1, x2, up_mat,
                        kparams["w1f"], kparams["s1"], kparams["b1"],
                        kparams["w2f"], kparams["s2"], kparams["b2"],
                        out_channels)
    # kernel already stores NCHW-flat (N, Cout, H*W); just split the spatial dim
    return y.reshape(N, out_channels, H, W)


# ----------------------- pure-JAX reference (check) -----------------------

def bilinear_upsample_x2_align_corners(x):
    N, H, W, C = x.shape
    Ho, Wo = 2 * H, 2 * W

    def coords(insize, outsize):
        src = jnp.arange(outsize, dtype=jnp.float32) * (
            (insize - 1) / max(outsize - 1, 1))
        i0 = jnp.clip(jnp.floor(src).astype(jnp.int32), 0, insize - 1)
        i1 = jnp.clip(i0 + 1, 0, insize - 1)
        return i0, i1, src - i0.astype(jnp.float32)

    y0, y1, fy = coords(H, Ho)
    x0, x1, fx = coords(W, Wo)
    top = jnp.take(x, y0, axis=1)
    bot = jnp.take(x, y1, axis=1)
    rows = top * (1.0 - fy)[None, :, None, None] + bot * fy[None, :, None, None]
    left = jnp.take(rows, x0, axis=2)
    right = jnp.take(rows, x1, axis=2)
    return left * (1.0 - fx)[None, None, :, None] + right * fx[None, None, :, None]


def up_forward_reference(x1_nchw, x2_nchw, params):
    x1 = jnp.transpose(x1_nchw, (0, 2, 3, 1))
    x2 = jnp.transpose(x2_nchw, (0, 2, 3, 1))
    x1 = bilinear_upsample_x2_align_corners(x1)
    diffY = x2.shape[1] - x1.shape[1]
    diffX = x2.shape[2] - x1.shape[2]
    x1 = jnp.pad(x1, ((0, 0),
                      (diffY // 2, diffY - diffY // 2),
                      (diffX // 2, diffX - diffX // 2),
                      (0, 0)))
    x = jnp.concatenate([x2, x1], axis=-1)

    def cbr(x, w, s, b):
        y = jax.lax.conv_general_dilated(
            x, w, window_strides=(1, 1), padding="SAME",
            dimension_numbers=("NHWC", "HWIO", "NHWC"))
        return jnp.maximum(y * s + b, 0.0)

    y = cbr(x, params["w1"], params["scale1"], params["bias1"])
    y = cbr(y, params["w2"], params["scale2"], params["bias2"])
    return jnp.transpose(y, (0, 3, 1, 2))


# --------------------------------- main ----------------------------------

if __name__ == "__main__":
    root = jax.random.PRNGKey(0)
    k_x1, k_x2, k_params = jax.random.split(root, 3)

    N = 2
    C_half = 4                  # channels of x1 (decoder) and x2 (skip)
    in_channels = 2 * C_half    # Up(in_channels=8, out_channels=4, bilinear=True)
    out_channels = 4
    H1 = W1 = 8                 # decoder feature map (gets upsampled x2)
    H2 = W2 = 16                # encoder skip feature map

    x1 = jax.random.normal(k_x1, (N, C_half, H1, W1), jnp.float32)
    x2 = jax.random.normal(k_x2, (N, C_half, H2, W2), jnp.float32)

    params = init_up_params(k_params, in_channels, out_channels)
    kparams = prepare_kernel_params(params)

    out = up_forward(x1, x2, kparams, out_channels=out_channels)
    out = jax.block_until_ready(out)

    assert out.shape == (N, out_channels, H2, W2), out.shape
    assert bool(jnp.all(jnp.isfinite(out)))
    assert bool(jnp.all(out >= 0.0))   # final ReLU

    # correctness check against an XLA reference (weights/inputs rounded to
    # bf16 so only the in-kernel bf16 intermediates / MXU rounding differ)
    def bf16_round(a):
        return a.astype(jnp.bfloat16).astype(jnp.float32)

    rparams = dict(params)
    rparams["w1"] = bf16_round(params["w1"])
    rparams["w2"] = bf16_round(params["w2"])
    ref = up_forward_reference(bf16_round(x1), bf16_round(x2), rparams)
    max_err = float(jnp.max(jnp.abs(out - ref)))
    assert max_err < 8e-2, max_err

    print("KERNEL_OK")
</pallas_src>

<mosaic_0001>
module attributes {stable_mosaic.version = 11 : i64} {
  func.func @_up_fused_kernel(%arg0: i32, %arg1: memref<1x8x8x4xbf16, #tpu.memory_space<vmem>>, %arg2: memref<1x16x16x4xbf16, #tpu.memory_space<vmem>>, %arg3: memref<256x64xbf16, #tpu.memory_space<vmem>>, %arg4: memref<1152x128xbf16, #tpu.memory_space<vmem>>, %arg5: memref<1x128xf32, #tpu.memory_space<vmem>>, %arg6: memref<1x128xf32, #tpu.memory_space<vmem>>, %arg7: memref<1152x128xbf16, #tpu.memory_space<vmem>>, %arg8: memref<1x128xf32, #tpu.memory_space<vmem>>, %arg9: memref<1x128xf32, #tpu.memory_space<vmem>>, %arg10: memref<1x4x256xf32, #tpu.memory_space<vmem>>, %arg11: memref<18x18x128xf32, #tpu.memory_space<vmem>>, %arg12: memref<256x1152xbf16, #tpu.memory_space<vmem>>) attributes {dimension_semantics = [#tpu.dimension_semantics<parallel>], iteration_bounds = array<i64: 2>, scalar_prefetch = 0 : i64, scratch_operands = 2 : i64, tpu.core_type = #tpu.core_type<tc>, window_params = [{transform_indices = @transform_0, window_bounds = array<i64: 1, 8, 8, 4>}, {transform_indices = @transform_1, window_bounds = array<i64: 1, 16, 16, 4>}, {pipeline_mode = #tpu.pipeline_mode<synchronous>, transform_indices = @transform_2, window_bounds = array<i64: 256, 64>}, {pipeline_mode = #tpu.pipeline_mode<synchronous>, transform_indices = @transform_3, window_bounds = array<i64: 1152, 128>}, {pipeline_mode = #tpu.pipeline_mode<synchronous>, transform_indices = @transform_4, window_bounds = array<i64: 1, 128>}, {pipeline_mode = #tpu.pipeline_mode<synchronous>, transform_indices = @transform_5, window_bounds = array<i64: 1, 128>}, {pipeline_mode = #tpu.pipeline_mode<synchronous>, transform_indices = @transform_6, window_bounds = array<i64: 1152, 128>}, {pipeline_mode = #tpu.pipeline_mode<synchronous>, transform_indices = @transform_7, window_bounds = array<i64: 1, 128>}, {pipeline_mode = #tpu.pipeline_mode<synchronous>, transform_indices = @transform_8, window_bounds = array<i64: 1, 128>}, {transform_indices = @transform_9, window_bounds = array<i64: 1, 4, 256>}]} {
    %cst = arith.constant 0.000000e+00 : f32
    %0 = vector.broadcast %cst : f32 to vector<18x18x128xf32>
    %c0 = arith.constant 0 : index
    %c0_0 = arith.constant 0 : index
    %c0_1 = arith.constant 0 : index
    %1 = vector.load %arg11[%c0, %c0_0, %c0_1] : memref<18x18x128xf32, #tpu.memory_space<vmem>>, vector<18x18x128xf32>
    tpu.vector_store %arg11[%c0, %c0_0, %c0_1], %0 {strides = array<i32>} : memref<18x18x128xf32, #tpu.memory_space<vmem>>, vector<18x18x128xf32>,
    %c0_2 = arith.constant 0 : index
    %c0_3 = arith.constant 0 : index
    %c0_4 = arith.constant 0 : index
    %c0_5 = arith.constant 0 : index
    %2 = vector.load %arg1[%c0_2, %c0_3, %c0_4, %c0_5] : memref<1x8x8x4xbf16, #tpu.memory_space<vmem>>, vector<1x8x8x4xbf16>
    %3 = vector.shape_cast %2 : vector<1x8x8x4xbf16> to vector<8x8x4xbf16>
    %4 = vector.shape_cast %3 : vector<8x8x4xbf16> to vector<64x4xbf16>
    %c0_6 = arith.constant 0 : index
    %c0_7 = arith.constant 0 : index
    %5 = vector.load %arg3[%c0_6, %c0_7] : memref<256x64xbf16, #tpu.memory_space<vmem>>, vector<256x64xbf16>
    %cst_8 = arith.constant dense<0.000000e+00> : vector<256x4xf32>
    %6 = tpu.matmul %5, %4, %cst_8 {dimension_numbers = #tpu.dot_dimension_numbers<[1], [0], [0], [1], [0, 0, 1, 1], [], []>} : vector<256x64xbf16>, vector<64x4xbf16>, vector<256x4xf32> -> vector<256x4xf32>
    %7 = tpu.iota {dimensions = array<i32: 1>} : vector<4x128xi32>
    %8 = tpu.iota {dimensions = array<i32: 0>} : vector<4x128xi32>
    %9 = arith.cmpi eq, %7, %8 : vector<4x128xi32>
    %10 = arith.extui %9 : vector<4x128xi1> to vector<4x128xi32>
    %11 = arith.sitofp %10 : vector<4x128xi32> to vector<4x128xf32>
    %c4_i32 = arith.constant 4 : i32
    %12 = vector.broadcast %c4_i32 : i32 to vector<4x128xi32>
    %13 = arith.addi %8, %12 : vector<4x128xi32>
    %14 = arith.cmpi eq, %7, %13 : vector<4x128xi32>
    %15 = arith.extui %14 : vector<4x128xi1> to vector<4x128xi32>
    %16 = arith.sitofp %15 : vector<4x128xi32> to vector<4x128xf32>
    %c0_9 = arith.constant 0 : index
    %c0_10 = arith.constant 0 : index
    %c0_11 = arith.constant 0 : index
    %c0_12 = arith.constant 0 : index
    %17 = vector.load %arg2[%c0_9, %c0_10, %c0_11, %c0_12] : memref<1x16x16x4xbf16, #tpu.memory_space<vmem>>, vector<1x16x16x4xbf16>
    %18 = vector.shape_cast %17 : vector<1x16x16x4xbf16> to vector<16x16x4xbf16>
    %19 = vector.shape_cast %18 : vector<16x16x4xbf16> to vector<256x4xbf16>
    %20 = arith.extf %19 : vector<256x4xbf16> to vector<256x4xf32>
    %cst_13 = arith.constant dense<0.000000e+00> : vector<256x128xf32>
    %21 = tpu.matmul %20, %11, %cst_13 {dimension_numbers = #tpu.dot_dimension_numbers<[1], [0], [0], [1], [0, 0, 1, 1], [], []>} : vector<256x4xf32>, vector<4x128xf32>, vector<256x128xf32> -> vector<256x128xf32>
    %cst_14 = arith.constant dense<0.000000e+00> : vector<256x128xf32>
    %22 = tpu.matmul %6, %16, %cst_14 {dimension_numbers = #tpu.dot_dimension_numbers<[1], [0], [0], [1], [0, 0, 1, 1], [], []>} : vector<256x4xf32>, vector<4x128xf32>, vector<256x128xf32> -> vector<256x128xf32>
    %23 = arith.addf %21, %22 : vector<256x128xf32>
    %24 = vector.shape_cast %23 : vector<256x128xf32> to vector<16x16x128xf32>
    %c1 = arith.constant 1 : index
    %c1_15 = arith.constant 1 : index
    %c0_16 = arith.constant 0 : index
    %25 = vector.load %arg11[%c1, %c1_15, %c0_16] : memref<18x18x128xf32, #tpu.memory_space<vmem>>, vector<16x16x128xf32>
    tpu.vector_store %arg11[%c1, %c1_15, %c0_16], %24 {strides = array<i32>} : memref<18x18x128xf32, #tpu.memory_space<vmem>>, vector<16x16x128xf32>,
    %c0_17 = arith.constant 0 : index
    %c0_18 = arith.constant 0 : index
    %c0_19 = arith.constant 0 : index
    %26 = vector.load %arg11[%c0_17, %c0_18, %c0_19] : memref<18x18x128xf32, #tpu.memory_space<vmem>>, vector<16x16x128xf32>
    %27 = vector.shape_cast %26 : vector<16x16x128xf32> to vector<256x128xf32>
    %28 = arith.truncf %27 : vector<256x128xf32> to vector<256x128xbf16>
    %c0_20 = arith.constant 0 : index
    %c0_21 = arith.constant 0 : index
    %29 = vector.load %arg12[%c0_20, %c0_21] : memref<256x1152xbf16, #tpu.memory_space<vmem>>, vector<256x128xbf16>
    tpu.vector_store %arg12[%c0_20, %c0_21], %28 {strides = array<i32>} : memref<256x1152xbf16, #tpu.memory_space<vmem>>, vector<256x128xbf16>,
    %c0_22 = arith.constant 0 : index
    %c1_23 = arith.constant 1 : index
    %c0_24 = arith.constant 0 : index
    %30 = vector.load %arg11[%c0_22, %c1_23, %c0_24] : memref<18x18x128xf32, #tpu.memory_space<vmem>>, vector<16x16x128xf32>
    %31 = vector.shape_cast %30 : vector<16x16x128xf32> to vector<256x128xf32>
    %32 = arith.truncf %31 : vector<256x128xf32> to vector<256x128xbf16>
    %c0_25 = arith.constant 0 : index
    %c128 = arith.constant 128 : index
    %33 = vector.load %arg12[%c0_25, %c128] : memref<256x1152xbf16, #tpu.memory_space<vmem>>, vector<256x128xbf16>
    tpu.vector_store %arg12[%c0_25, %c128], %32 {strides = array<i32>} : memref<256x1152xbf16, #tpu.memory_space<vmem>>, vector<256x128xbf16>,
    %c0_26 = arith.constant 0 : index
    %c2 = arith.constant 2 : index
    %c0_27 = arith.constant 0 : index
    %34 = vector.load %arg11[%c0_26, %c2, %c0_27] : memref<18x18x128xf32, #tpu.memory_space<vmem>>, vector<16x16x128xf32>
    %35 = vector.shape_cast %34 : vector<16x16x128xf32> to vector<256x128xf32>
    %36 = arith.truncf %35 : vector<256x128xf32> to vector<256x128xbf16>
    %c0_28 = arith.constant 0 : index
    %c256 = arith.constant 256 : index
    %37 = vector.load %arg12[%c0_28, %c256] : memref<256x1152xbf16, #tpu.memory_space<vmem>>, vector<256x128xbf16>
    tpu.vector_store %arg12[%c0_28, %c256], %36 {strides = array<i32>} : memref<256x1152xbf16, #tpu.memory_space<vmem>>, vector<256x128xbf16>,
    %c1_29 = arith.constant 1 : index
    %c0_30 = arith.constant 0 : index
    %c0_31 = arith.constant 0 : index
    %38 = vector.load %arg11[%c1_29, %c0_30, %c0_31] : memref<18x18x128xf32, #tpu.memory_space<vmem>>, vector<16x16x128xf32>
    %39 = vector.shape_cast %38 : vector<16x16x128xf32> to vector<256x128xf32>
    %40 = arith.truncf %39 : vector<256x128xf32> to vector<256x128xbf16>
    %c0_32 = arith.constant 0 : index
    %c384 = arith.constant 384 : index
    %41 = vector.load %arg12[%c0_32, %c384] : memref<256x1152xbf16, #tpu.memory_space<vmem>>, vector<256x128xbf16>
    tpu.vector_store %arg12[%c0_32, %c384], %40 {strides = array<i32>} : memref<256x1152xbf16, #tpu.memory_space<vmem>>, vector<256x128xbf16>,
    %c1_33 = arith.constant 1 : index
    %c1_34 = arith.constant 1 : index
    %c0_35 = arith.constant 0 : index
    %42 = vector.load %arg11[%c1_33, %c1_34, %c0_35] : memref<18x18x128xf32, #tpu.memory_space<vmem>>, vector<16x16x128xf32>
    %43 = vector.shape_cast %42 : vector<16x16x128xf32> to vector<256x128xf32>
    %44 = arith.truncf %43 : vector<256x128xf32> to vector<256x128xbf16>
    %c0_36 = arith.constant 0 : index
    %c512 = arith.constant 512 : index
    %45 = vector.load %arg12[%c0_36, %c512] : memref<256x1152xbf16, #tpu.memory_space<vmem>>, vector<256x128xbf16>
    tpu.vector_store %arg12[%c0_36, %c512], %44 {strides = array<i32>} : memref<256x1152xbf16, #tpu.memory_space<vmem>>, vector<256x128xbf16>,
    %c1_37 = arith.constant 1 : index
    %c2_38 = arith.constant 2 : index
    %c0_39 = arith.constant 0 : index
    %46 = vector.load %arg11[%c1_37, %c2_38, %c0_39] : memref<18x18x128xf32, #tpu.memory_space<vmem>>, vector<16x16x128xf32>
    %47 = vector.shape_cast %46 : vector<16x16x128xf32> to vector<256x128xf32>
    %48 = arith.truncf %47 : vector<256x128xf32> to vector<256x128xbf16>
    %c0_40 = arith.constant 0 : index
    %c640 = arith.constant 640 : index
    %49 = vector.load %arg12[%c0_40, %c640] : memref<256x1152xbf16, #tpu.memory_space<vmem>>, vector<256x128xbf16>
    tpu.vector_store %arg12[%c0_40, %c640], %48 {strides = array<i32>} : memref<256x1152xbf16, #tpu.memory_space<vmem>>, vector<256x128xbf16>,
    %c2_41 = arith.constant 2 : index
    %c0_42 = arith.constant 0 : index
    %c0_43 = arith.constant 0 : index
    %50 = vector.load %arg11[%c2_41, %c0_42, %c0_43] : memref<18x18x128xf32, #tpu.memory_space<vmem>>, vector<16x16x128xf32>
    %51 = vector.shape_cast %50 : vector<16x16x128xf32> to vector<256x128xf32>
    %52 = arith.truncf %51 : vector<256x128xf32> to vector<256x128xbf16>
    %c0_44 = arith.constant 0 : index
    %c768 = arith.constant 768 : index
    %53 = vector.load %arg12[%c0_44, %c768] : memref<256x1152xbf16, #tpu.memory_space<vmem>>, vector<256x128xbf16>
    tpu.vector_store %arg12[%c0_44, %c768], %52 {strides = array<i32>} : memref<256x1152xbf16, #tpu.memory_space<vmem>>, vector<256x128xbf16>,
    %c2_45 = arith.constant 2 : index
    %c1_46 = arith.constant 1 : index
    %c0_47 = arith.constant 0 : index
    %54 = vector.load %arg11[%c2_45, %c1_46, %c0_47] : memref<18x18x128xf32, #tpu.memory_space<vmem>>, vector<16x16x128xf32>
    %55 = vector.shape_cast %54 : vector<16x16x128xf32> to vector<256x128xf32>
    %56 = arith.truncf %55 : vector<256x128xf32> to vector<256x128xbf16>
    %c0_48 = arith.constant 0 : index
    %c896 = arith.constant 896 : index
    %57 = vector.load %arg12[%c0_48, %c896] : memref<256x1152xbf16, #tpu.memory_space<vmem>>, vector<256x128xbf16>
    tpu.vector_store %arg12[%c0_48, %c896], %56 {strides = array<i32>} : memref<256x1152xbf16, #tpu.memory_space<vmem>>, vector<256x128xbf16>,
    %c2_49 = arith.constant 2 : index
    %c2_50 = arith.constant 2 : index
    %c0_51 = arith.constant 0 : index
    %58 = vector.load %arg11[%c2_49, %c2_50, %c0_51] : memref<18x18x128xf32, #tpu.memory_space<vmem>>, vector<16x16x128xf32>
    %59 = vector.shape_cast %58 : vector<16x16x128xf32> to vector<256x128xf32>
    %60 = arith.truncf %59 : vector<256x128xf32> to vector<256x128xbf16>
    %c0_52 = arith.constant 0 : index
    %c1024 = arith.constant 1024 : index
    %61 = vector.load %arg12[%c0_52, %c1024] : memref<256x1152xbf16, #tpu.memory_space<vmem>>, vector<256x128xbf16>
    tpu.vector_store %arg12[%c0_52, %c1024], %60 {strides = array<i32>} : memref<256x1152xbf16, #tpu.memory_space<vmem>>, vector<256x128xbf16>,
    %c0_53 = arith.constant 0 : index
    %c0_54 = arith.constant 0 : index
    %62 = vector.load %arg12[%c0_53, %c0_54] : memref<256x1152xbf16, #tpu.memory_space<vmem>>, vector<256x1152xbf16>
    %c0_55 = arith.constant 0 : index
    %c0_56 = arith.constant 0 : index
    %63 = vector.load %arg4[%c0_55, %c0_56] : memref<1152x128xbf16, #tpu.memory_space<vmem>>, vector<1152x128xbf16>
    %cst_57 = arith.constant dense<0.000000e+00> : vector<256x128xf32>
    %64 = tpu.matmul %62, %63, %cst_57 {dimension_numbers = #tpu.dot_dimension_numbers<[1], [0], [0], [1], [0, 0, 1, 1], [], []>} : vector<256x1152xbf16>, vector<1152x128xbf16>, vector<256x128xf32> -> vector<256x128xf32>
    %c0_58 = arith.constant 0 : index
    %c0_59 = arith.constant 0 : index
    %65 = vector.load %arg5[%c0_58, %c0_59] : memref<1x128xf32, #tpu.memory_space<vmem>>, vector<1x128xf32>
    %66 = vector.broadcast %65 : vector<1x128xf32> to vector<256x128xf32>
    %67 = arith.mulf %64, %66 : vector<256x128xf32>
    %c0_60 = arith.constant 0 : index
    %c0_61 = arith.constant 0 : index
    %68 = vector.load %arg6[%c0_60, %c0_61] : memref<1x128xf32, #tpu.memory_space<vmem>>, vector<1x128xf32>
    %69 = vector.broadcast %68 : vector<1x128xf32> to vector<256x128xf32>
    %70 = arith.addf %67, %69 : vector<256x128xf32>
    %cst_62 = arith.constant 0.000000e+00 : f32
    %71 = vector.broadcast %cst_62 : f32 to vector<256x128xf32>
    %72 = arith.maximumf %70, %71 : vector<256x128xf32>
    %73 = vector.shape_cast %72 : vector<256x128xf32> to vector<16x16x128xf32>
    %c1_63 = arith.constant 1 : index
    %c1_64 = arith.constant 1 : index
    %c0_65 = arith.constant 0 : index
    %74 = vector.load %arg11[%c1_63, %c1_64, %c0_65] : memref<18x18x128xf32, #tpu.memory_space<vmem>>, vector<16x16x128xf32>
    tpu.vector_store %arg11[%c1_63, %c1_64, %c0_65], %73 {strides = array<i32>} : memref<18x18x128xf32, #tpu.memory_space<vmem>>, vector<16x16x128xf32>,
    %c0_66 = arith.constant 0 : index
    %c0_67 = arith.constant 0 : index
    %c0_68 = arith.constant 0 : index
    %75 = vector.load %arg11[%c0_66, %c0_67, %c0_68] : memref<18x18x128xf32, #tpu.memory_space<vmem>>, vector<16x16x128xf32>
    %76 = vector.shape_cast %75 : vector<16x16x128xf32> to vector<256x128xf32>
    %77 = arith.truncf %76 : vector<256x128xf32> to vector<256x128xbf16>
    %c0_69 = arith.constant 0 : index
    %c0_70 = arith.constant 0 : index
    %78 = vector.load %arg12[%c0_69, %c0_70] : memref<256x1152xbf16, #tpu.memory_space<vmem>>, vector<256x128xbf16>
    tpu.vector_store %arg12[%c0_69, %c0_70], %77 {strides = array<i32>} : memref<256x1152xbf16, #tpu.memory_space<vmem>>, vector<256x128xbf16>,
    %c0_71 = arith.constant 0 : index
    %c1_72 = arith.constant 1 : index
    %c0_73 = arith.constant 0 : index
    %79 = vector.load %arg11[%c0_71, %c1_72, %c0_73] : memref<18x18x128xf32, #tpu.memory_space<vmem>>, vector<16x16x128xf32>
    %80 = vector.shape_cast %79 : vector<16x16x128xf32> to vector<256x128xf32>
    %81 = arith.truncf %80 : vector<256x128xf32> to vector<256x128xbf16>
    %c0_74 = arith.constant 0 : index
    %c128_75 = arith.constant 128 : index
    %82 = vector.load %arg12[%c0_74, %c128_75] : memref<256x1152xbf16, #tpu.memory_space<vmem>>, vector<256x128xbf16>
    tpu.vector_store %arg12[%c0_74, %c128_75], %81 {strides = array<i32>} : memref<256x1152xbf16, #tpu.memory_space<vmem>>, vector<256x128xbf16>,
    %c0_76 = arith.constant 0 : index
    %c2_77 = arith.constant 2 : index
    %c0_78 = arith.constant 0 : index
    %83 = vector.load %arg11[%c0_76, %c2_77, %c0_78] : memref<18x18x128xf32, #tpu.memory_space<vmem>>, vector<16x16x128xf32>
    %84 = vector.shape_cast %83 : vector<16x16x128xf32> to vector<256x128xf32>
    %85 = arith.truncf %84 : vector<256x128xf32> to vector<256x128xbf16>
    %c0_79 = arith.constant 0 : index
    %c256_80 = arith.constant 256 : index
    %86 = vector.load %arg12[%c0_79, %c256_80] : memref<256x1152xbf16, #tpu.memory_space<vmem>>, vector<256x128xbf16>
    tpu.vector_store %arg12[%c0_79, %c256_80], %85 {strides = array<i32>} : memref<256x1152xbf16, #tpu.memory_space<vmem>>, vector<256x128xbf16>,
    %c1_81 = arith.constant 1 : index
    %c0_82 = arith.constant 0 : index
    %c0_83 = arith.constant 0 : index
    %87 = vector.load %arg11[%c1_81, %c0_82, %c0_83] : memref<18x18x128xf32, #tpu.memory_space<vmem>>, vector<16x16x128xf32>
    %88 = vector.shape_cast %87 : vector<16x16x128xf32> to vector<256x128xf32>
    %89 = arith.truncf %88 : vector<256x128xf32> to vector<256x128xbf16>
    %c0_84 = arith.constant 0 : index
    %c384_85 = arith.constant 384 : index
    %90 = vector.load %arg12[%c0_84, %c384_85] : memref<256x1152xbf16, #tpu.memory_space<vmem>>, vector<256x128xbf16>
    tpu.vector_store %arg12[%c0_84, %c384_85], %89 {strides = array<i32>} : memref<256x1152xbf16, #tpu.memory_space<vmem>>, vector<256x128xbf16>,
    %c1_86 = arith.constant 1 : index
    %c1_87 = arith.constant 1 : index
    %c0_88 = arith.constant 0 : index
    %91 = vector.load %arg11[%c1_86, %c1_87, %c0_88] : memref<18x18x128xf32, #tpu.memory_space<vmem>>, vector<16x16x128xf32>
    %92 = vector.shape_cast %91 : vector<16x16x128xf32> to vector<256x128xf32>
    %93 = arith.truncf %92 : vector<256x128xf32> to vector<256x128xbf16>
    %c0_89 = arith.constant 0 : index
    %c512_90 = arith.constant 512 : index
    %94 = vector.load %arg12[%c0_89, %c512_90] : memref<256x1152xbf16, #tpu.memory_space<vmem>>, vector<256x128xbf16>
    tpu.vector_store %arg12[%c0_89, %c512_90], %93 {strides = array<i32>} : memref<256x1152xbf16, #tpu.memory_space<vmem>>, vector<256x128xbf16>,
    %c1_91 = arith.constant 1 : index
    %c2_92 = arith.constant 2 : index
    %c0_93 = arith.constant 0 : index
    %95 = vector.load %arg11[%c1_91, %c2_92, %c0_93] : memref<18x18x128xf32, #tpu.memory_space<vmem>>, vector<16x16x128xf32>
    %96 = vector.shape_cast %95 : vector<16x16x128xf32> to vector<256x128xf32>
    %97 = arith.truncf %96 : vector<256x128xf32> to vector<256x128xbf16>
    %c0_94 = arith.constant 0 : index
    %c640_95 = arith.constant 640 : index
    %98 = vector.load %arg12[%c0_94, %c640_95] : memref<256x1152xbf16, #tpu.memory_space<vmem>>, vector<256x128xbf16>
    tpu.vector_store %arg12[%c0_94, %c640_95], %97 {strides = array<i32>} : memref<256x1152xbf16, #tpu.memory_space<vmem>>, vector<256x128xbf16>,
    %c2_96 = arith.constant 2 : index
    %c0_97 = arith.constant 0 : index
    %c0_98 = arith.constant 0 : index
    %99 = vector.load %arg11[%c2_96, %c0_97, %c0_98] : memref<18x18x128xf32, #tpu.memory_space<vmem>>, vector<16x16x128xf32>
    %100 = vector.shape_cast %99 : vector<16x16x128xf32> to vector<256x128xf32>
    %101 = arith.truncf %100 : vector<256x128xf32> to vector<256x128xbf16>
    %c0_99 = arith.constant 0 : index
    %c768_100 = arith.constant 768 : index
    %102 = vector.load %arg12[%c0_99, %c768_100] : memref<256x1152xbf16, #tpu.memory_space<vmem>>, vector<256x128xbf16>
    tpu.vector_store %arg12[%c0_99, %c768_100], %101 {strides = array<i32>} : memref<256x1152xbf16, #tpu.memory_space<vmem>>, vector<256x128xbf16>,
    %c2_101 = arith.constant 2 : index
    %c1_102 = arith.constant 1 : index
    %c0_103 = arith.constant 0 : index
    %103 = vector.load %arg11[%c2_101, %c1_102, %c0_103] : memref<18x18x128xf32, #tpu.memory_space<vmem>>, vector<16x16x128xf32>
    %104 = vector.shape_cast %103 : vector<16x16x128xf32> to vector<256x128xf32>
    %105 = arith.truncf %104 : vector<256x128xf32> to vector<256x128xbf16>
    %c0_104 = arith.constant 0 : index
    %c896_105 = arith.constant 896 : index
    %106 = vector.load %arg12[%c0_104, %c896_105] : memref<256x1152xbf16, #tpu.memory_space<vmem>>, vector<256x128xbf16>
    tpu.vector_store %arg12[%c0_104, %c896_105], %105 {strides = array<i32>} : memref<256x1152xbf16, #tpu.memory_space<vmem>>, vector<256x128xbf16>,
    %c2_106 = arith.constant 2 : index
    %c2_107 = arith.constant 2 : index
    %c0_108 = arith.constant 0 : index
    %107 = vector.load %arg11[%c2_106, %c2_107, %c0_108] : memref<18x18x128xf32, #tpu.memory_space<vmem>>, vector<16x16x128xf32>
    %108 = vector.shape_cast %107 : vector<16x16x128xf32> to vector<256x128xf32>
    %109 = arith.truncf %108 : vector<256x128xf32> to vector<256x128xbf16>
    %c0_109 = arith.constant 0 : index
    %c1024_110 = arith.constant 1024 : index
    %110 = vector.load %arg12[%c0_109, %c1024_110] : memref<256x1152xbf16, #tpu.memory_space<vmem>>, vector<256x128xbf16>
    tpu.vector_store %arg12[%c0_109, %c1024_110], %109 {strides = array<i32>} : memref<256x1152xbf16, #tpu.memory_space<vmem>>, vector<256x128xbf16>,
    %c0_111 = arith.constant 0 : index
    %c0_112 = arith.constant 0 : index
    %111 = vector.load %arg12[%c0_111, %c0_112] : memref<256x1152xbf16, #tpu.memory_space<vmem>>, vector<256x1152xbf16>
    %c0_113 = arith.constant 0 : index
    %c0_114 = arith.constant 0 : index
    %112 = vector.load %arg7[%c0_113, %c0_114] : memref<1152x128xbf16, #tpu.memory_space<vmem>>, vector<1152x128xbf16>
    %cst_115 = arith.constant dense<0.000000e+00> : vector<256x128xf32>
    %113 = tpu.matmul %111, %112, %cst_115 {dimension_numbers = #tpu.dot_dimension_numbers<[1], [0], [0], [1], [0, 0, 1, 1], [], []>} : vector<256x1152xbf16>, vector<1152x128xbf16>, vector<256x128xf32> -> vector<256x128xf32>
    %c0_116 = arith.constant 0 : index
    %c0_117 = arith.constant 0 : index
    %114 = vector.load %arg8[%c0_116, %c0_117] : memref<1x128xf32, #tpu.memory_space<vmem>>, vector<1x128xf32>
    %115 = vector.broadcast %114 : vector<1x128xf32> to vector<256x128xf32>
    %116 = arith.mulf %113, %115 : vector<256x128xf32>
    %c0_118 = arith.constant 0 : index
    %c0_119 = arith.constant 0 : index
    %117 = vector.load %arg9[%c0_118, %c0_119] : memref<1x128xf32, #tpu.memory_space<vmem>>, vector<1x128xf32>
    %118 = vector.broadcast %117 : vector<1x128xf32> to vector<256x128xf32>
    %119 = arith.addf %116, %118 : vector<256x128xf32>
    %cst_120 = arith.constant 0.000000e+00 : f32
    %120 = vector.broadcast %cst_120 : f32 to vector<256x128xf32>
    %121 = arith.maximumf %119, %120 : vector<256x128xf32>
    %122 = tpu.transpose %121, [1, 0] : vector<256x128xf32> -> vector<128x256xf32>
    %123 = vector.extract_strided_slice %122 {offsets = [0, 0], sizes = [4, 256], strides = [1, 1]} : vector<128x256xf32> to vector<4x256xf32>
    %124 = vector.shape_cast %123 : vector<4x256xf32> to vector<1x4x256xf32>
    %c0_121 = arith.constant 0 : index
    %c0_122 = arith.constant 0 : index
    %c0_123 = arith.constant 0 : index
    %125 = vector.load %arg10[%c0_121, %c0_122, %c0_123] : memref<1x4x256xf32, #tpu.memory_space<vmem>>, vector<1x4x256xf32>
    tpu.vector_store %arg10[%c0_121, %c0_122, %c0_123], %124 {strides = array<i32>} : memref<1x4x256xf32, #tpu.memory_space<vmem>>, vector<1x4x256xf32>,
    return
  }
  func.func @transform_0(%arg0: i32) -> (i32, i32, i32, i32) {
    %c0_i32 = arith.constant 0 : i32
    %c0_i32_0 = arith.constant 0 : i32
    %c0_i32_1 = arith.constant 0 : i32
    %c0_i32_2 = arith.constant 0 : i32
    return %arg0, %c0_i32, %c0_i32_0, %c0_i32_1 : i32, i32, i32, i32
  }
  func.func @transform_1(%arg0: i32) -> (i32, i32, i32, i32) {
    %c0_i32 = arith.constant 0 : i32
    %c0_i32_0 = arith.constant 0 : i32
    %c0_i32_1 = arith.constant 0 : i32
    %c0_i32_2 = arith.constant 0 : i32
    return %arg0, %c0_i32, %c0_i32_0, %c0_i32_1 : i32, i32, i32, i32
  }
  func.func @transform_2(%arg0: i32) -> (i32, i32) {
    %c0_i32 = arith.constant 0 : i32
    %c0_i32_0 = arith.constant 0 : i32
    %c0_i32_1 = arith.constant 0 : i32
    return %c0_i32, %c0_i32_0 : i32, i32
  }
  func.func @transform_3(%arg0: i32) -> (i32, i32) {
    %c0_i32 = arith.constant 0 : i32
    %c0_i32_0 = arith.constant 0 : i32
    %c0_i32_1 = arith.constant 0 : i32
    return %c0_i32, %c0_i32_0 : i32, i32
  }
  func.func @transform_4(%arg0: i32) -> (i32, i32) {
    %c0_i32 = arith.constant 0 : i32
    %c0_i32_0 = arith.constant 0 : i32
    %c0_i32_1 = arith.constant 0 : i32
    return %c0_i32, %c0_i32_0 : i32, i32
  }
  func.func @transform_5(%arg0: i32) -> (i32, i32) {
    %c0_i32 = arith.constant 0 : i32
    %c0_i32_0 = arith.constant 0 : i32
    %c0_i32_1 = arith.constant 0 : i32
    return %c0_i32, %c0_i32_0 : i32, i32
  }
  func.func @transform_6(%arg0: i32) -> (i32, i32) {
    %c0_i32 = arith.constant 0 : i32
    %c0_i32_0 = arith.constant 0 : i32
    %c0_i32_1 = arith.constant 0 : i32
    return %c0_i32, %c0_i32_0 : i32, i32
  }
  func.func @transform_7(%arg0: i32) -> (i32, i32) {
    %c0_i32 = arith.constant 0 : i32
    %c0_i32_0 = arith.constant 0 : i32
    %c0_i32_1 = arith.constant 0 : i32
    return %c0_i32, %c0_i32_0 : i32, i32
  }
  func.func @transform_8(%arg0: i32) -> (i32, i32) {
    %c0_i32 = arith.constant 0 : i32
    %c0_i32_0 = arith.constant 0 : i32
    %c0_i32_1 = arith.constant 0 : i32
    return %c0_i32, %c0_i32_0 : i32, i32
  }
  func.func @transform_9(%arg0: i32) -> (i32, i32, i32) {
    %c0_i32 = arith.constant 0 : i32
    %c0_i32_0 = arith.constant 0 : i32
    %c0_i32_1 = arith.constant 0 : i32
    return %arg0, %c0_i32, %c0_i32_0 : i32, i32, i32
  }
}

</mosaic_0001>

<bundles_post_ra>
// kernel: up_forward.1
= control target key start
LH: loop header
LB: loop body
LE: loop exit
PB: predicated region body
PF: predicated region fallthrough
CT: control target
= control target key end

     0   :  { %14 = vsyncpa [#allocation5], 0  ;;  %s8084_s30 = smov 0   ;;  %s9511_s0 = inlined_call_operand.vmem [shape: bf16[2,8,8,4], index: 0, kind: input, shape index: {}]   ;;  %s9512_s1 = inlined_call_operand.vmem [shape: bf16[2,16,16,4], index: 1, kind: input, shape index: {}]   ;;  %s9513_s2 = inlined_call_operand.vmem [shape: bf16[256,64], index: 2, kind: input, shape index: {}]   ;;  %s9514_s3 = inlined_call_operand.vmem [shape: bf16[1152,128], index: 3, kind: input, shape index: {}]   ;;  %s9515_s4 = inlined_call_operand.vmem [shape: f32[1,128], index: 4, kind: input, shape index: {}]   ;;  %s9516_s5 = inlined_call_operand.vmem [shape: f32[1,128], index: 5, kind: input, shape index: {}]   ;;  %s9517_s6 = inlined_call_operand.hbm [shape: bf16[1152,128], index: 6, kind: input, shape index: {}]   ;;  %s9518_s7 = inlined_call_operand.vmem [shape: f32[1,128], index: 7, kind: input, shape index: {}]   ;;  %s9519_s8 = inlined_call_operand.vmem [shape: f32[1,128], index: 8, kind: input, shape index: {}]   ;;  %s9520_s9 = inlined_call_operand.vmem [shape: f32[2,4,256], index: 9, kind: output, shape index: {}]  }
   0x1 LB: > { %s8090_s10 = sadd.s32 4294967295, %s8027_s30   ;;  %p6140_p0 = scmp.ge.s32.totalorder %s8027_s30, 1  ;;  %s8027_s30 = sphi %s8084_s30, %s20_s30  }
   0x2   : > { %p250_p1 = scmp.lt.s32.totalorder %s8027_s30, 3  ;;  %s8029_s11 = smov [#allocation4]  }
   0x3   : > { %s274_s12 = sshll.u32 %s8029_s11, 4  ;;  %p9521_p3 = scmp.eq.s32.totalorder %s8090_s10, 0  ;;  %s275_s12 = int_to_ptr.vmem [resolvable:$true] %s274_s12 }
   0x4   : > { %p8094_p2 = pnand %p6140_p0, %p250_p1  ;;  %s7989_s17 = scalar_lea.hbm %s9517_s6, 9216 }
   0x5   : > { %p7990_p6 = scmp.ne.s32.totalorder %s9517_s6, %s7989_s17  ;;  %p7996_p10 = scmp.lt.u32.totalorder %s7989_s17, %s9517_s6 }
   0x6   : > { %s9523_s13 = scalar_select %p8094_p2, 1, 0 }
   0x7   : > { %p7805_p4 = pneg %p8094_p2 }
   0x9   : > { %p8103_p5 = pnand %p9521_p3, %p7805_p4 }
   0xb   : > { %p7991_p7 = pneg %p8103_p5 }
   0xd   : > { %p7992_p8 = pnand %p7991_p7, %p7990_p6 }
   0xf   : > { %p7993_p9 = pneg %p7992_p8 }
  0x11   : > { %p7998_p11 = pnand %p7996_p10, %p7993_p9 }
  0x13   : > { %8001 = shalt.err (!%p7998_p11)
}
  0x14   : > { %s8002_s22 = scalar_lea.vmem %s275_s12, 9216  ;;  %p8010_p1 = scmp.lt.s32.totalorder %s275_s12, %s275_s12 }
  0x15   : > { %p8003_p12 = scmp.ne.s32.totalorder %s275_s12, %s8002_s22  ;;  %p8011_p4 = scmp.lt.s32.totalorder %s8002_s22, %s8002_s22 }
  0x17   : > { %p8005_p13 = pnand %p8003_p12, %p7991_p7  ;;  %p8012_p3 = por %p8011_p4, %p8010_p1 }
  0x19   : > { %p8006_p0 = pneg %p8005_p13 }
  0x1b   : > { %p8013_p2 = pnand %p8012_p3, %p8006_p0 }
  0x1d   : > { %8016 = shalt.err (!%p8013_p2)
}
  0x1e   : > { %s8030_s23 = smov 64   ;;  %s8031_s24 = smov 4  }
  0x1f   : > { %7808 = dma.hbm_to_vmem [thread:$0]  (!%p8103_p5), %s9517_s6, 9216, %s275_s12, [#allocation5], %s8030_s23, %s8030_s23, %s8031_s24  }
  0x20   : > { %p9525_p6 = scmp.ne.s32.totalorder %s9523_s13, 0 }
  0x21   : > { %p9526_p8 = scmp.eq.s32.totalorder (!%p9525_p6), %s8090_s10, 0 }
  0x22   : > { %312 = sbr.rel (%p9525_p6) target bundleno = 1657 (0x679), region = 56 }
  0x29   : > { %8022 = dma.done.wait (%p9526_p8), [#allocation5], 9216   ;;  %p9527_p7 = pmov %p9526_p8 }
  0x2a   : > { %p353_p2 = scmp.lt.s32.totalorder %s8090_s10, 1  ;;  %vm567_vm0 = vcmask 523264   ;;  %v7827_v3 = vld [vmem:[%s9513_s2] sm:$0xff]   ;;  %v7828_v5 = vld [vmem:[%s9513_s2 + $0x8] sm:$0xff]   ;;  %v7829_v6 = vld [vmem:[%s9513_s2 + $0x10] sm:$0xff]   ;;  %v777_v20 = vlaneseq  ;;  %v8032_v24 = vmov 0.0  }
  0x2b   : > { %8024 = vsyncadd (%p9527_p7), [#allocation5], 4294958080  ;;  %7525 = vmatprep.mubr.msk.bf16.mxu0 %vm567_vm0, %v7827_v3  ;;  %v7830_v7 = vld [vmem:[%s9513_s2 + $0x18] sm:$0xff]   ;;  %v7831_v8 = vld [vmem:[%s9513_s2 + $0x20] sm:$0xff]   ;;  %vm949_vm2 = vcmask 1043456   ;;  %369 = vst [vmem:[#allocation2] sm:$0xff] %v8032_v24 }
  0x2c   : > { %s9529_s10 = smov (!%p353_p2, %s8090_s10), 1  ;;  %v7832_v9 = vld [vmem:[%s9513_s2 + $0x28] sm:$0xff]   ;;  %v7833_v10 = vld [vmem:[%s9513_s2 + $0x30] sm:$0xff]   ;;  %v7834_v11 = vld [vmem:[%s9513_s2 + $0x38] sm:$0xff]   ;;  %v8201_v21 = vshrl.u32 %v777_v20, 7  ;;  %v8203_v22 = vand.u32 127, %v777_v20 }
  0x2d   : > { %s6405_s27 = sshll.u32 %s9529_s10, 5  ;;  %v7835_v12 = vld [vmem:[%s9513_s2 + $0x40] sm:$0xff]   ;;  %v7836_v13 = vld [vmem:[%s9513_s2 + $0x48] sm:$0xff]   ;;  %v7837_v14 = vld [vmem:[%s9513_s2 + $0x50] sm:$0xff]   ;;  %370 = vst [vmem:[#allocation2 + $0x8] sm:$0xff] %v8032_v24  ;;  %vm852_vm4 = vcmask 31744  }
  0x2e   : > { %s357_s11 = scalar_lea.vmem %s9511_s0, %s6405_s27  ;;  %v7838_v15 = vld [vmem:[%s9513_s2 + $0x58] sm:$0xff]   ;;  %v7839_v16 = vld [vmem:[%s9513_s2 + $0x60] sm:$0xff]   ;;  %v7840_v17 = vld [vmem:[%s9513_s2 + $0x68] sm:$0xff]   ;;  %v784_v23 = vadd.s32 4, %v8201_v21  ;;  %371 = vst [vmem:[#allocation2 + $0x10] sm:$0x3] %v8032_v24  ;;  %vm781_vm3 = vcmp.eq.s32.totalorder %v8203_v22, %v8201_v21 }
  0x2f   : > { %v7823_v0 = vld [vmem:[%s357_s11] sm:$0xff]   ;;  %v7824_v1 = vld [vmem:[%s357_s11 + $0x8] sm:$0xff]   ;;  %v7825_v2 = vld [vmem:[%s357_s11 + $0x10] sm:$0xff]   ;;  %372 = vst [vmem:[#allocation2 + $0x18] sm:$0xff] %v8032_v24  ;;  %v6187_v26 = vsel %vm781_vm3, 1.0, %v8032_v24  ;;  %s6406_s21 = sshll.u32 %s9529_s10, 7 }
  0x30   : > { %7517 = vmatprep.subr.bf16.mxu0 %v7823_v0  ;;  %v7826_v4 = vld [vmem:[%s357_s11 + $0x18] sm:$0xff]   ;;  %v7841_v18 = vld [vmem:[%s9513_s2 + $0x70] sm:$0xff]   ;;  %vm785_vm1 = vcmp.eq.s32.totalorder %v8203_v22, %v784_v23  ;;  %373 = vst [vmem:[#allocation2 + $0x20] sm:$0xff] %v8032_v24  ;;  %374 = vst [vmem:[#allocation2 + $0x28] sm:$0x3] %v8032_v24  ;;  %s8295_s24 = scalar_lea.vmem %s9512_s1, %s6406_s21  ;;  %s6407_s29 = sshll.u32 %s9529_s10, 3 }
  0x31   : > { %7518 = vmatpush3.bf16.msra.mxu0 %v7823_v0  ;;  %v7842_v19 = vld [vmem:[%s9513_s2 + $0x78] sm:$0xff]   ;;  %v6188_v25 = vsel %vm785_vm1, 1.0, %v8032_v24  ;;  %375 = vst [vmem:[#allocation2 + $0x30] sm:$0xff] %v8032_v24  ;;  %376 = vst [vmem:[#allocation2 + $0x38] sm:$0xff] %v8032_v24  ;;  %v7843_v28 = vld [vmem:[%s9514_s3 + $0x40] sm:$0xff]   ;;  %s367_s13 = scalar_lea.vmem %s9520_s9, %s6407_s29 }
  0x32   : > { %7519 = vmatprep.subr.bf16.mxu0 %v7824_v1  ;;  %377 = vst [vmem:[#allocation2 + $0x40] sm:$0x3] %v8032_v24  ;;  %378 = vst [vmem:[#allocation2 + $0x48] sm:$0xff] %v8032_v24  ;;  %7557 = vmatprep.subr.msk.mxu1 %vm949_vm2, %v6188_v25  ;;  %v7844_v29 = vld [vmem:[%s9514_s3] sm:$0xff]   ;;  %v7845_v30 = vld [vmem:[%s9514_s3 + $0x48] sm:$0xff]  }
  0x33   : > { %379 = vst [vmem:[#allocation2 + $0x50] sm:$0xff] %v8032_v24  ;;  %380 = vst [vmem:[#allocation2 + $0x58] sm:$0x3] %v8032_v24  ;;  %7558 = vmatpush3.msk.msra.mxu1 %vm949_vm2, %v6188_v25  ;;  %v7846_v34 = vld [vmem:[%s9514_s3 + $0x8] sm:$0xff]   ;;  %v7847_v35 = vld [vmem:[%s9514_s3 + $0x50] sm:$0xff]  }
  0x34   : > { %381 = vst [vmem:[#allocation2 + $0x60] sm:$0xff] %v8032_v24  ;;  %382 = vst [vmem:[#allocation2 + $0x68] sm:$0xff] %v8032_v24  ;;  %7607 = vmatprep.subr.msk.mxu1 %vm949_vm2, %v6187_v26  ;;  %v7855_v36 = vld [vmem:[%s9514_s3 + $0xc0] sm:$0xff]   ;;  %v7848_v37 = vld [vmem:[%s9514_s3 + $0x10] sm:$0xff]  }
  0x35   : > { %7520 = vmatpush3.bf16.msra.mxu0 %v7824_v1  ;;  %383 = vst [vmem:[#allocation2 + $0x70] sm:$0x3] %v8032_v24  ;;  %384 = vst [vmem:[#allocation2 + $0x78] sm:$0xff] %v8032_v24  ;;  %v7849_v39 = vld [vmem:[%s9514_s3 + $0x58] sm:$0xff]   ;;  %v7851_v44 = vld [vmem:[%s9514_s3 + $0x60] sm:$0xff]  }
  0x36   : > { %7521 = vmatprep.subr.bf16.mxu0 %v7825_v2  ;;  %385 = vst [vmem:[#allocation2 + $0x80] sm:$0xff] %v8032_v24  ;;  %386 = vst [vmem:[#allocation2 + $0x88] sm:$0x3] %v8032_v24  ;;  %v7850_v43 = vld [vmem:[%s9514_s3 + $0x18] sm:$0xff]   ;;  %v7852_v45 = vld [vmem:[%s9514_s3 + $0x20] sm:$0xff]  }
  0x37   : > { %387 = vst [vmem:[#allocation2 + $0x90] sm:$0xff] %v8032_v24  ;;  %388 = vst [vmem:[#allocation2 + $0x98] sm:$0xff] %v8032_v24  ;;  %v7853_v47 = vld [vmem:[%s9514_s3 + $0x68] sm:$0xff]   ;;  %v7859_v52 = vld [vmem:[%s9514_s3 + $0x70] sm:$0xff]  }
  0x38   : > { %389 = vst [vmem:[#allocation2 + $0xa0] sm:$0x3] %v8032_v24  ;;  %390 = vst [vmem:[#allocation2 + $0xa8] sm:$0xff] %v8032_v24  ;;  %v7854_v51 = vld [vmem:[%s9514_s3 + $0x28] sm:$0xff]   ;;  %v7860_v53 = vld [vmem:[%s9514_s3 + $0x30] sm:$0xff]  }
  0x39   : > { %7522 = vmatpush3.bf16.msra.mxu0 %v7825_v2  ;;  %391 = vst [vmem:[#allocation2 + $0xb0] sm:$0xff] %v8032_v24  ;;  %392 = vst [vmem:[#allocation2 + $0xb8] sm:$0x3] %v8032_v24  ;;  %v7865_v55 = vld [vmem:[%s9514_s3 + $0x78] sm:$0xff]   ;;  %v7858_v22 = vld [vmem:[%s9514_s3 + $0x88] sm:$0xff]  }
  0x3a   : > { %7523 = vmatprep.subr.bf16.mxu0 %v7826_v4  ;;  %393 = vst [vmem:[#allocation2 + $0xc0] sm:$0xff] %v8032_v24  ;;  %394 = vst [vmem:[#allocation2 + $0xc8] sm:$0xff] %v8032_v24  ;;  %v7866_v59 = vld [vmem:[%s9514_s3 + $0x38] sm:$0xff]  }
  0x3b   : > { %395 = vst [vmem:[#allocation2 + $0xd0] sm:$0x3] %v8032_v24  ;;  %396 = vst [vmem:[#allocation2 + $0xd8] sm:$0xff] %v8032_v24  ;;  %v6474_v23 = vld [vmem:[%s8295_s24 + $0x18] sm:$0xff]  }
  0x3c   : > { %397 = vst [vmem:[#allocation2 + $0xe0] sm:$0xff] %v8032_v24  ;;  %398 = vst [vmem:[#allocation2 + $0xe8] sm:$0x3] %v8032_v24 }
  0x3d   : > { %7524 = vmatpush3.bf16.msra.mxu0 %v7826_v4  ;;  %399 = vst [vmem:[#allocation2 + $0xf0] sm:$0xff] %v8032_v24  ;;  %400 = vst [vmem:[#allocation2 + $0xf8] sm:$0xff] %v8032_v24 }
  0x3e   : > { %401 = vst [vmem:[#allocation2 + $0x100] sm:$0x3] %v8032_v24  ;;  %402 = vst [vmem:[#allocation2 + $0x108] sm:$0xff] %v8032_v24  ;;  %6573 = vmatprep.subr.bf16.mxu0 %v7843_v28  ;;  %v6475_v28 = vld [vmem:[%s8295_s24 + $0x20] sm:$0xff]  }
  0x3f   : > { %403 = vst [vmem:[#allocation2 + $0x110] sm:$0xff] %v8032_v24  ;;  %404 = vst [vmem:[#allocation2 + $0x118] sm:$0x3] %v8032_v24 }
  0x40   : > { %7526 = vmatmul.mubr.msk.bf16.vlgmr.msra.gmra.mrb[0].mxu0 %vm567_vm0, %v7828_v5  ;;  %405 = vst [vmem:[#allocation2 + $0x120] sm:$0xff] %v8032_v24  ;;  %406 = vst [vmem:[#allocation2 + $0x128] sm:$0xff] %v8032_v24 }
  0x41   : > { %7529 = vmatprep.mubr.msk.bf16.mxu0 %vm567_vm0, %v7829_v6  ;;  %407 = vst [vmem:[#allocation2 + $0x130] sm:$0x3] %v8032_v24  ;;  %408 = vst [vmem:[#allocation2 + $0x138] sm:$0xff] %v8032_v24  ;;  %6574 = vmatpush3.bf16.msra.mxu0 %v7844_v29  ;;  %v7863_v29 = vld [vmem:[%s9514_s3 + $0xd8] sm:$0xff]  }
  0x42   : > { %409 = vst [vmem:[#allocation2 + $0x140] sm:$0xff] %v8032_v24  ;;  %410 = vst [vmem:[#allocation2 + $0x148] sm:$0x3] %v8032_v24  ;;  %6575 = vmatprep.subr.bf16.mxu0 %v7845_v30  ;;  %v6423_v30 = vunpack.c.h.bf16 %v6474_v23 }
  0x43   : > { %411 = vst [vmem:[#allocation2 + $0x150] sm:$0xff] %v8032_v24  ;;  %412 = vst [vmem:[#allocation2 + $0x158] sm:$0xff] %v8032_v24 }
  0x44   : > { %413 = vst [vmem:[#allocation2 + $0x160] sm:$0x3] %v8032_v24  ;;  %414 = vst [vmem:[#allocation2 + $0x168] sm:$0xff] %v8032_v24 }
  0x45   : > { %415 = vst [vmem:[#allocation2 + $0x170] sm:$0xff] %v8032_v24  ;;  %416 = vst [vmem:[#allocation2 + $0x178] sm:$0x3] %v8032_v24  ;;  %6576 = vmatpush3.bf16.msra.mxu0 %v7846_v34  ;;  %v7867_v34 = vld [vmem:[%s9514_s3 + $0xe0] sm:$0xff]  }
  0x46   : > { %417 = vst [vmem:[#allocation2 + $0x180] sm:$0xff] %v8032_v24  ;;  %418 = vst [vmem:[#allocation2 + $0x188] sm:$0xff] %v8032_v24  ;;  %6577 = vmatprep.subr.bf16.mxu0 %v7847_v35  ;;  %v6427_v35 = vunpack.c.h.bf16 %v6475_v28 }
  0x47   : > { %419 = vst [vmem:[#allocation2 + $0x190] sm:$0x3] %v8032_v24  ;;  %420 = vst [vmem:[#allocation2 + $0x198] sm:$0xff] %v8032_v24 }
  0x48   : > { %7530 = vmatmul.mubr.msk.bf16.gmra.mrb[4].mxu0 %vm567_vm0, %v7830_v7  ;;  %421 = vst [vmem:[#allocation2 + $0x1a0] sm:$0xff] %v8032_v24  ;;  %422 = vst [vmem:[#allocation2 + $0x1a8] sm:$0x3] %v8032_v24  ;;  %v7861_v24 = vld [vmem:[%s9514_s3 + $0xd0] sm:$0xff]  }
  0x49   : > { %7533 = vmatprep.mubr.msk.bf16.mxu0 %vm567_vm0, %v7831_v8  ;;  %6578 = vmatpush3.bf16.msra.mxu0 %v7848_v37  ;;  %v7868_v37 = vld [vmem:[%s9514_s3 + $0xa0] sm:$0xff]  }
  0x4a   : > { %6579 = vmatprep.subr.bf16.mxu0 %v7849_v39 }
  0x4d   : > { %6580 = vmatpush3.bf16.msra.mxu0 %v7850_v43 }
  0x4e   : > { %6581 = vmatprep.subr.bf16.mxu0 %v7851_v44  ;;  %v6479_v44 = vld [vmem:[%s8295_s24 + $0x40] sm:$0xff]  }
  0x50   : > { %7534 = vmatmul.mubr.msk.bf16.gmra.mrb[8].mxu0 %vm567_vm0, %v7832_v9 }
  0x51   : > { %7537 = vmatprep.mubr.msk.bf16.mxu0 %vm567_vm0, %v7833_v10  ;;  %6582 = vmatpush3.bf16.msra.mxu0 %v7852_v45 }
  0x52   : > { %6583 = vmatprep.subr.bf16.mxu0 %v7853_v47  ;;  %v6480_v47 = vld [vmem:[%s8295_s24 + $0x48] sm:$0xff]  }
  0x55   : > { %6584 = vmatpush3.bf16.msra.mxu0 %v7854_v51  ;;  %v6447_v51 = vunpack.c.h.bf16 %v6480_v47 }
  0x56   : > { %6585 = vmatprep.subr.bf16.mxu0 %v7859_v52 }
  0x58   : > { %7538 = vmatmul.mubr.msk.bf16.gmra.mrb[12].mxu0 %vm567_vm0, %v7834_v11  ;;  %v6409_v11 = vld [vmem:[%s8295_s24] sm:$0xff]  }
  0x59   : > { %7541 = vmatprep.mubr.msk.bf16.mxu0 %vm567_vm0, %v7835_v12  ;;  %6586 = vmatpush3.bf16.msra.mxu0 %v7860_v53  ;;  %v6482_v53 = vld [vmem:[%s8295_s24 + $0x58] sm:$0xff]  }
  0x5a   : > { %6587 = vmatprep.subr.bf16.mxu0 %v7865_v55  ;;  %v6454_v55 = vunpack.c.l.bf16 %v6482_v53 }
  0x5d   : > { %6588 = vmatpush3.bf16.msra.mxu0 %v7866_v59  ;;  %v6484_v59 = vld [vmem:[%s8295_s24 + $0x68] sm:$0xff]  }
  0x60   : > { %7542 = vmatmul.mubr.msk.bf16.gmra.mrb[16].mxu0 %vm567_vm0, %v7836_v13  ;;  %v6410_v13 = vunpack.c.l.bf16 %v6409_v11 }
  0x61   : > { %7545 = vmatprep.mubr.msk.bf16.mxu0 %vm567_vm0, %v7837_v14  ;;  %v6472_v14 = vld [vmem:[%s8295_s24 + $0x8] sm:$0xff]  }
  0x62   : > { %v6415_v20 = vunpack.c.h.bf16 %v6472_v14 }
  0x68   : > { %7546 = vmatmul.mubr.msk.bf16.gmra.mrb[20].mxu0 %vm567_vm0, %v7838_v15  ;;  %v6411_v15 = vunpack.c.h.bf16 %v6409_v11  ;;  %v7872_v11 = vld [vmem:[%s9514_s3 + $0xf0] sm:$0xff]  }
  0x69   : > { %7549 = vmatprep.mubr.msk.bf16.mxu0 %vm567_vm0, %v7839_v16  ;;  %v6414_v16 = vunpack.c.l.bf16 %v6472_v14  ;;  %v7873_v14 = vld [vmem:[%s9514_s3 + $0x100] sm:$0xff]  }
  0x70   : > { %7550 = vmatmul.mubr.msk.bf16.gmra.mrb[24].mxu0 %vm567_vm0, %v7840_v17  ;;  %v7856_v17 = vld [vmem:[%s9514_s3 + $0x80] sm:$0xff]  }
  0x71   : > { %7553 = vmatprep.mubr.msk.bf16.mxu0 %vm567_vm0, %v7841_v18  ;;  %v6473_v18 = vld [vmem:[%s8295_s24 + $0x10] sm:$0xff]  }
  0x72   : > { %v6418_v21 = vunpack.c.l.bf16 %v6473_v18  ;;  %v6419_v25 = vunpack.c.h.bf16 %v6473_v18  ;;  %v7878_v18 = vld [vmem:[%s9514_s3 + $0x108] sm:$0xff]  }
  0x78   : > { %7554 = vmatmul.mubr.msk.bf16.gmra.mrb[28].mxu0 %vm567_vm0, %v7842_v19  ;;  %v7857_v19 = vld [vmem:[%s9514_s3 + $0xc8] sm:$0xff]  }
 0x113   : > { %v7527_v27 = vpop.f32.mrb[0].mxu0 }
 0x114   : > { %v650_v31 = vpop.f32.mrb[1].mxu0 }
 0x115   : > { %v7528_v32 = vpop.f32.mrb[2].mxu0  ;;  %7559 = vmatprep.mubr.msk.f32.mxu1 %vm852_vm4, %v650_v31  ;;  %v6426_v31 = vunpack.c.l.bf16 %v6475_v28  ;;  %v7888_v28 = vld [vmem:[%s9514_s3 + $0x130] sm:$0xff]  }
 0x116   : > { %v653_v33 = vpop.f32.mrb[3].mxu0 }
 0x117   : > { %7560 = vmatmul.mubr.msk.f32.vlgmr.msra.gmra.mrb[0].mxu1 %vm852_vm4, %v653_v33  ;;  %v6476_v33 = vld [vmem:[%s8295_s24 + $0x28] sm:$0xff]  }
 0x118   : > { %7608 = vmatpush3.msk.msra.mxu1 %vm949_vm2, %v6187_v26  ;;  %7562 = vmatprep.mubr.msk.f32.mxu1 %vm852_vm4, %v7527_v27  ;;  %v6422_v26 = vunpack.c.l.bf16 %v6474_v23  ;;  %v7862_v27 = vld [vmem:[%s9514_s3 + $0x90] sm:$0xff]   ;;  %v6431_v39 = vunpack.c.h.bf16 %v6476_v33  ;;  %v7883_v23 = vld [vmem:[%s9514_s3 + $0x160] sm:$0xff]  }
 0x119   : > { %6685 = vmatprep.subr.bf16.mxu1 %v7855_v36  ;;  %v6430_v36 = vunpack.c.l.bf16 %v6476_v33 }
 0x11b   : > { %v7531_v38 = vpop.f32.mrb[4].mxu0  ;;  %7563 = vmatmul.mubr.msk.f32.gmra.mrb[2].mxu1 %vm852_vm4, %v7528_v32  ;;  %v7864_v32 = vld [vmem:[%s9514_s3 + $0x98] sm:$0xff]  }
 0x11c   : > { %v666_v40 = vpop.f32.mrb[5].mxu0 }
 0x11d   : > { %v7532_v41 = vpop.f32.mrb[6].mxu0  ;;  %7565 = vmatprep.mubr.msk.f32.mxu1 %vm852_vm4, %v666_v40 }
 0x11e   : > { %v669_v42 = vpop.f32.mrb[7].mxu0 }
 0x11f   : > { %7566 = vmatmul.mubr.msk.f32.gmra.mrb[4].mxu1 %vm852_vm4, %v669_v42 }
 0x120   : > { %7568 = vmatprep.mubr.msk.f32.mxu1 %vm852_vm4, %v7531_v38  ;;  %v6477_v38 = vld [vmem:[%s8295_s24 + $0x30] sm:$0xff]  }
 0x121   : > { %v6434_v40 = vunpack.c.l.bf16 %v6477_v38  ;;  %v6435_v42 = vunpack.c.h.bf16 %v6477_v38  ;;  %v1663_v38 = vld [vmem:[#allocation2 + $0x2] sm:$0xff] }
 0x123   : > { %v7535_v46 = vpop.f32.mrb[8].mxu0  ;;  %7569 = vmatmul.mubr.msk.f32.gmra.mrb[6].mxu1 %vm852_vm4, %v7532_v41  ;;  %v6478_v41 = vld [vmem:[%s8295_s24 + $0x38] sm:$0xff]  }
 0x124   : > { %v682_v48 = vpop.f32.mrb[9].mxu0  ;;  %v6438_v43 = vunpack.c.l.bf16 %v6478_v41  ;;  %v6439_v45 = vunpack.c.h.bf16 %v6478_v41 }
 0x125   : > { %v7536_v49 = vpop.f32.mrb[10].mxu0  ;;  %7571 = vmatprep.mubr.msk.f32.mxu1 %vm852_vm4, %v682_v48  ;;  %v6443_v48 = vunpack.c.h.bf16 %v6479_v44 }
 0x126   : > { %v685_v50 = vpop.f32.mrb[11].mxu0 }
 0x127   : > { %7572 = vmatmul.mubr.msk.f32.gmra.mrb[8].mxu1 %vm852_vm4, %v685_v50  ;;  %v6481_v50 = vld [vmem:[%s8295_s24 + $0x50] sm:$0xff]  }
 0x128   : > { %7574 = vmatprep.mubr.msk.f32.mxu1 %vm852_vm4, %v7535_v46  ;;  %v6442_v46 = vunpack.c.l.bf16 %v6479_v44  ;;  %v6450_v52 = vunpack.c.l.bf16 %v6481_v50 }
 0x12b   : > { %v7539_v54 = vpop.f32.mrb[12].mxu0  ;;  %7575 = vmatmul.mubr.msk.f32.gmra.mrb[10].mxu1 %vm852_vm4, %v7536_v49  ;;  %v6446_v49 = vunpack.c.l.bf16 %v6480_v47 }
 0x12c   : > { %v698_v56 = vpop.f32.mrb[13].mxu0 }
 0x12d   : > { %v7540_v57 = vpop.f32.mrb[14].mxu0  ;;  %7577 = vmatprep.mubr.msk.f32.mxu1 %vm852_vm4, %v698_v56  ;;  %v6483_v56 = vld [vmem:[%s8295_s24 + $0x60] sm:$0xff]  }
 0x12e   : > { %v701_v58 = vpop.f32.mrb[15].mxu0 }
 0x12f   : > { %7578 = vmatmul.mubr.msk.f32.gmra.mrb[12].mxu1 %vm852_vm4, %v701_v58  ;;  %v6458_v58 = vunpack.c.l.bf16 %v6483_v56 }
 0x130   : > { %7580 = vmatprep.mubr.msk.f32.mxu1 %vm852_vm4, %v7539_v54  ;;  %v6451_v54 = vunpack.c.h.bf16 %v6481_v50 }
 0x133   : > { %v7543_v60 = vpop.f32.mrb[16].mxu0  ;;  %7581 = vmatmul.mubr.msk.f32.gmra.mrb[14].mxu1 %vm852_vm4, %v7540_v57  ;;  %v6455_v57 = vunpack.c.h.bf16 %v6482_v53 }
 0x134   : > { %v714_v61 = vpop.f32.mrb[17].mxu0 }
 0x135   : > { %v7544_v62 = vpop.f32.mrb[18].mxu0  ;;  %7583 = vmatprep.mubr.msk.f32.mxu1 %vm852_vm4, %v714_v61  ;;  %v6462_v61 = vunpack.c.l.bf16 %v6484_v59 }
 0x136   : > { %v717_v63 = vpop.f32.mrb[19].mxu0 }
 0x137   : > { %7584 = vmatmul.mubr.msk.f32.gmra.mrb[16].mxu1 %vm852_vm4, %v717_v63  ;;  %v6463_v63 = vunpack.c.h.bf16 %v6484_v59 }
 0x138   : > { %7586 = vmatprep.mubr.msk.f32.mxu1 %vm852_vm4, %v7543_v60  ;;  %v6459_v60 = vunpack.c.h.bf16 %v6483_v56  ;;  %v7892_v56 = vld [vmem:[%s9514_s3 + $0x188] sm:$0xff]  }
 0x13b   : > { %v7547_v0 = vpop.f32.mrb[20].mxu0  ;;  %7587 = vmatmul.mubr.msk.f32.gmra.mrb[18].mxu1 %vm852_vm4, %v7544_v62  ;;  %v6485_v62 = vld [vmem:[%s8295_s24 + $0x70] sm:$0xff]  }
 0x13c   : > { %v730_v1 = vpop.f32.mrb[21].mxu0 }
 0x13d   : > { %v7548_v2 = vpop.f32.mrb[22].mxu0  ;;  %7589 = vmatprep.mubr.msk.f32.mxu1 %vm852_vm4, %v730_v1  ;;  %v6486_v1 = vld [vmem:[%s8295_s24 + $0x78] sm:$0xff]  }
 0x13e   : > { %v733_v3 = vpop.f32.mrb[23].mxu0 }
 0x13f   : > { %7590 = vmatmul.mubr.msk.f32.gmra.mrb[20].mxu1 %vm852_vm4, %v733_v3  ;;  %v6470_v3 = vunpack.c.l.bf16 %v6486_v1 }
 0x140   : > { %7592 = vmatprep.mubr.msk.f32.mxu1 %vm852_vm4, %v7547_v0  ;;  %v6466_v0 = vunpack.c.l.bf16 %v6485_v62 }
 0x143   : > { %v7551_v4 = vpop.f32.mrb[24].mxu0  ;;  %7593 = vmatmul.mubr.msk.f32.gmra.mrb[22].mxu1 %vm852_vm4, %v7548_v2  ;;  %v6467_v2 = vunpack.c.h.bf16 %v6485_v62 }
 0x144   : > { %v746_v5 = vpop.f32.mrb[25].mxu0 }
 0x145   : > { %v7552_v6 = vpop.f32.mrb[26].mxu0  ;;  %7595 = vmatprep.mubr.msk.f32.mxu1 %vm852_vm4, %v746_v5  ;;  %v1599_v5 = vld [vmem:[#allocation2 + $0x1] sm:$0xff] }
 0x146   : > { %v749_v7 = vpop.f32.mrb[27].mxu0 }
 0x147   : > { %7596 = vmatmul.mubr.msk.f32.gmra.mrb[24].mxu1 %vm852_vm4, %v749_v7 }
 0x148   : > { %7598 = vmatprep.mubr.msk.f32.mxu1 %vm852_vm4, %v7551_v4  ;;  %v6471_v4 = vunpack.c.h.bf16 %v6486_v1  ;;  %v7896_v1 = vld [vmem:[%s9514_s3 + $0x190] sm:$0xff]  }
 0x14b   : > { %v7555_v8 = vpop.f32.mrb[28].mxu0  ;;  %7599 = vmatmul.mubr.msk.f32.gmra.mrb[26].mxu1 %vm852_vm4, %v7552_v6  ;;  %v1600_v6 = vld [vmem:[#allocation2 + $0x9] sm:$0xff] }
 0x14c   : > { %v762_v9 = vpop.f32.mrb[29].mxu0  ;;  %v1631_v7 = vpack.c.bf16 %v1600_v6, %v1599_v5 }
 0x14d   : > { %v7556_v10 = vpop.f32.mrb[30].mxu0  ;;  %7601 = vmatprep.mubr.msk.f32.mxu1 %vm852_vm4, %v762_v9  ;;  %v7870_v9 = vld [vmem:[%s9514_s3 + $0xa8] sm:$0xff]  }
 0x14e   : > { %v765_v12 = vpop.f32.mrb[31].mxu0  ;;  %2864 = vmatprep.mubr.bf16.mxu0 %v1631_v7 }
 0x14f   : > { %7602 = vmatmul.mubr.msk.f32.gmra.mrb[28].mxu1 %vm852_vm4, %v765_v12  ;;  %v7874_v12 = vld [vmem:[%s9514_s3 + $0xb0] sm:$0xff]  }
 0x150   : > { %7604 = vmatprep.mubr.msk.f32.mxu1 %vm852_vm4, %v7555_v8  ;;  %v7869_v8 = vld [vmem:[%s9514_s3 + $0xe8] sm:$0xff]  }
 0x153   : > { %7605 = vmatmul.mubr.msk.f32.gmra.mrb[30].mxu1 %vm852_vm4, %v7556_v10  ;;  %v8033_v10 = vmov 0.0|0.0  }
 0x154   : > { %7609 = vmatprep.mubr.msk.f32.mxu1 %vm852_vm4, %v6410_v13  ;;  %2865 = vmatmul.mubr.bf16.vlgmr.msra.gmra.mrb[32].mxu0 %v8033_v10  ;;  %v7871_v13 = vld [vmem:[%s9514_s3 + $0x140] sm:$0xff]  }
 0x155   : > { %6797 = vmatprep.subr.bf16.mxu0 %v7871_v13 }
 0x156   : > { %6798 = vmatpush3.bf16.msra.mxu0 %v7873_v14 }
 0x157   : > { %7610 = vmatmul.mubr.msk.f32.vlgmr.msra.gmra.mrb[0].mxu1 %vm852_vm4, %v6411_v15  ;;  %v7875_v15 = vld [vmem:[%s9514_s3 + $0xf8] sm:$0xff]  }
 0x158   : > { %7612 = vmatprep.mubr.msk.f32.mxu1 %vm852_vm4, %v6414_v16  ;;  %6686 = vmatpush3.bf16.msra.mxu1 %v7856_v17  ;;  %v7876_v16 = vld [vmem:[%s9514_s3 + $0xb8] sm:$0xff]   ;;  %v7877_v17 = vld [vmem:[%s9514_s3 + $0x148] sm:$0xff]  }
 0x159   : > { %6687 = vmatprep.subr.bf16.mxu1 %v7857_v19  ;;  %6799 = vmatprep.subr.bf16.mxu0 %v7877_v17  ;;  %v7879_v19 = vld [vmem:[%s9514_s3 + $0x150] sm:$0xff]   ;;  %v7900_v17 = vld [vmem:[%s9514_s3 + $0x1a0] sm:$0xff]  }
 0x15a   : > { %6800 = vmatpush3.bf16.msra.mxu0 %v7878_v18 }
 0x15b   : > { %7613 = vmatmul.mubr.msk.f32.gmra.mrb[2].mxu1 %vm852_vm4, %v6415_v20  ;;  %v7880_v20 = vld [vmem:[%s9514_s3 + $0x110] sm:$0xff]   ;;  %6801 = vmatprep.subr.bf16.mxu0 %v7879_v19  ;;  %v7901_v19 = vld [vmem:[%s9514_s3 + $0x1e8] sm:$0xff]  }
 0x15c   : > { %7615 = vmatprep.mubr.msk.f32.mxu1 %vm852_vm4, %v6418_v21  ;;  %6688 = vmatpush3.bf16.msra.mxu1 %v7858_v22  ;;  %v7881_v21 = vld [vmem:[%s9514_s3 + $0x158] sm:$0xff]  }
 0x15d   : > { %6689 = vmatprep.subr.bf16.mxu1 %v7861_v24  ;;  %v7882_v22 = vld [vmem:[%s9514_s3 + $0x118] sm:$0xff]   ;;  %v7884_v24 = vld [vmem:[%s9514_s3 + $0x120] sm:$0xff]  }
 0x15e   : > { %6802 = vmatpush3.bf16.msra.mxu0 %v7880_v20 }
 0x15f   : > { %7616 = vmatmul.mubr.msk.f32.gmra.mrb[4].mxu1 %vm852_vm4, %v6419_v25  ;;  %6803 = vmatprep.subr.bf16.mxu0 %v7881_v21  ;;  %v7885_v25 = vld [vmem:[%s9514_s3 + $0x168] sm:$0xff]  }
 0x160   : > { %7618 = vmatprep.mubr.msk.f32.mxu1 %vm852_vm4, %v6422_v26  ;;  %6690 = vmatpush3.bf16.msra.mxu1 %v7862_v27  ;;  %v7886_v26 = vld [vmem:[%s9514_s3 + $0x128] sm:$0xff]   ;;  %v7887_v27 = vld [vmem:[%s9514_s3 + $0x170] sm:$0xff]  }
 0x161   : > { %6691 = vmatprep.subr.bf16.mxu1 %v7863_v29  ;;  %v7889_v29 = vld [vmem:[%s9514_s3 + $0x1c0] sm:$0xff]  }
 0x162   : > { %6804 = vmatpush3.bf16.msra.mxu0 %v7882_v22 }
 0x163   : > { %7619 = vmatmul.mubr.msk.f32.gmra.mrb[6].mxu1 %vm852_vm4, %v6423_v30  ;;  %6805 = vmatprep.subr.bf16.mxu0 %v7883_v23  ;;  %v7893_v30 = vld [vmem:[%s9514_s3 + $0x178] sm:$0xff]  }
 0x164   : > { %7621 = vmatprep.mubr.msk.f32.mxu1 %vm852_vm4, %v6426_v31  ;;  %6692 = vmatpush3.bf16.msra.mxu1 %v7864_v32  ;;  %v7894_v31 = vld [vmem:[%s9514_s3 + $0x138] sm:$0xff]   ;;  %v8449_v32 = vld [vmem:[%s9514_s3 + $0x200] sm:$0xff]  }
 0x165   : > { %6693 = vmatprep.subr.bf16.mxu1 %v7867_v34 }
 0x166   : > { %6806 = vmatpush3.bf16.msra.mxu0 %v7884_v24  ;;  %v7902_v24 = vld [vmem:[%s9514_s3 + $0x1a8] sm:$0xff]  }
 0x167   : > { %7622 = vmatmul.mubr.msk.f32.gmra.mrb[8].mxu1 %vm852_vm4, %v6427_v35  ;;  %6807 = vmatprep.subr.bf16.mxu0 %v7885_v25  ;;  %v7904_v25 = vld [vmem:[%s9514_s3 + $0x1f0] sm:$0xff]  }
 0x168   : > { %7624 = vmatprep.mubr.msk.f32.mxu1 %vm852_vm4, %v6430_v36  ;;  %6694 = vmatpush3.bf16.msra.mxu1 %v7868_v37 }
 0x169   : > { %6695 = vmatprep.subr.bf16.mxu1 %v7869_v8  ;;  %v7898_v8 = vld [vmem:[%s9514_s3 + $0x198] sm:$0xff]  }
 0x16a   : > { %6808 = vmatpush3.bf16.msra.mxu0 %v7886_v26 }
 0x16b   : > { %7625 = vmatmul.mubr.msk.f32.gmra.mrb[10].mxu1 %vm852_vm4, %v6431_v39  ;;  %6809 = vmatprep.subr.bf16.mxu0 %v7887_v27  ;;  %v1664_v39 = vld [vmem:[#allocation2 + $0xa] sm:$0xff] }
 0x16c   : > { %7627 = vmatprep.mubr.msk.f32.mxu1 %vm852_vm4, %v6434_v40  ;;  %6696 = vmatpush3.bf16.msra.mxu1 %v7870_v9  ;;  %v7899_v9 = vld [vmem:[%s9514_s3 + $0x1e0] sm:$0xff]  }
 0x16d   : > { %6697 = vmatprep.subr.bf16.mxu1 %v7872_v11 }
 0x16e   : > { %6810 = vmatpush3.bf16.msra.mxu0 %v7888_v28 }
 0x16f   : > { %7628 = vmatmul.mubr.msk.f32.gmra.mrb[12].mxu1 %vm852_vm4, %v6435_v42  ;;  %6811 = vmatprep.subr.bf16.mxu0 %v7893_v30 }
 0x170   : > { %7630 = vmatprep.mubr.msk.f32.mxu1 %vm852_vm4, %v6438_v43  ;;  %6698 = vmatpush3.bf16.msra.mxu1 %v7874_v12 }
 0x171   : > { %6699 = vmatprep.subr.bf16.mxu1 %v7875_v15 }
 0x172   : > { %6812 = vmatpush3.bf16.msra.mxu0 %v7894_v31 }
 0x173   : > { %7631 = vmatmul.mubr.msk.f32.gmra.mrb[14].mxu1 %vm852_vm4, %v6439_v45  ;;  %7657 = vmatprep.subr.bf16.mxu0 %v8449_v32  ;;  %v1695_v45 = vpack.c.bf16 %v1664_v39, %v1663_v38 }
 0x174   : > { %7633 = vmatprep.mubr.msk.f32.mxu1 %vm852_vm4, %v6442_v46  ;;  %6700 = vmatpush3.bf16.msra.mxu1 %v7876_v16 }
 0x175   : > { %6909 = vmatprep.subr.bf16.mxu1 %v7889_v29 }
 0x177   : > { %7634 = vmatmul.mubr.msk.f32.gmra.mrb[16].mxu1 %vm852_vm4, %v6443_v48  ;;  %v7890_v48 = vld [vmem:[%s9514_s3 + $0x180] sm:$0xff]  }
 0x178   : > { %7636 = vmatprep.mubr.msk.f32.mxu1 %vm852_vm4, %v6446_v49  ;;  %v7891_v49 = vld [vmem:[%s9514_s3 + $0x1c8] sm:$0xff]  }
 0x17b   : > { %7637 = vmatmul.mubr.msk.f32.gmra.mrb[18].mxu1 %vm852_vm4, %v6447_v51 }
 0x17c   : > { %7639 = vmatprep.mubr.msk.f32.mxu1 %vm852_vm4, %v6450_v52 }
 0x17f   : > { %7640 = vmatmul.mubr.msk.f32.gmra.mrb[20].mxu1 %vm852_vm4, %v6451_v54 }
 0x180   : > { %7642 = vmatprep.mubr.msk.f32.mxu1 %vm852_vm4, %v6454_v55 }
 0x183   : > { %7643 = vmatmul.mubr.msk.f32.gmra.mrb[22].mxu1 %vm852_vm4, %v6455_v57  ;;  %v7895_v57 = vld [vmem:[%s9514_s3 + $0x1d0] sm:$0xff]  }
 0x184   : > { %7645 = vmatprep.mubr.msk.f32.mxu1 %vm852_vm4, %v6458_v58 }
 0x187   : > { %7646 = vmatmul.mubr.msk.f32.gmra.mrb[24].mxu1 %vm852_vm4, %v6459_v60 }
 0x188   : > { %7648 = vmatprep.mubr.msk.f32.mxu1 %vm852_vm4, %v6462_v61 }
 0x18b   : > { %7649 = vmatmul.mubr.msk.f32.gmra.mrb[26].mxu1 %vm852_vm4, %v6463_v63 }
 0x18c   : > { %7651 = vmatprep.mubr.msk.f32.mxu1 %vm852_vm4, %v6466_v0 }
 0x18f   : > { %7652 = vmatmul.mubr.msk.f32.gmra.mrb[28].mxu1 %vm852_vm4, %v6467_v2 }
 0x190   : > { %7654 = vmatprep.mubr.msk.f32.mxu1 %vm852_vm4, %v6470_v3  ;;  %v7897_v3 = vld [vmem:[%s9514_s3 + $0x1d8] sm:$0xff]  }
 0x193   : > { %7655 = vmatmul.mubr.msk.f32.gmra.mrb[30].mxu1 %vm852_vm4, %v6471_v4 }
 0x22a   : > { %v7611_v33 = vpop.f32.mrb[0].mxu1 }
 0x22b   : > { %1504 = vst [vmem:[#allocation2 + $0x21] sm:$0xff] %v7611_v33  ;;  %v1343_v34 = vpop.f32.mrb[1].mxu1 }
 0x22c   : > { %1503 = vst [vmem:[#allocation2 + $0x19] sm:$0xff] %v1343_v34  ;;  %v8452_v35 = vpack.c.bf16 %v7611_v33, %v1343_v34  ;;  %v7905_v34 = vld [vmem:[%s9514_s3 + $0x1b0] sm:$0xff]  }
 0x22e   : > { %v7614_v36 = vpop.f32.mrb[2].mxu1  ;;  %2872 = vmatprep.mubr.bf16.mxu0 %v8452_v35 }
 0x22f   : > { %1506 = vst [vmem:[#allocation2 + $0x39] sm:$0xff] %v7614_v36  ;;  %v1353_v37 = vpop.f32.mrb[3].mxu1 }
 0x230   : > { %1505 = vst [vmem:[#allocation2 + $0x31] sm:$0xff] %v1353_v37  ;;  %v8455_v40 = vpack.c.bf16 %v7614_v36, %v1353_v37  ;;  %v7906_v37 = vld [vmem:[%s9514_s3 + $0x1f8] sm:$0xff]  }
 0x232   : > { %v7617_v41 = vpop.f32.mrb[4].mxu1  ;;  %v1666_v60 = vld [vmem:[#allocation2 + $0x22] sm:$0xff] }
 0x233   : > { %1508 = vst [vmem:[#allocation2 + $0x51] sm:$0xff] %v7617_v41  ;;  %v1363_v42 = vpop.f32.mrb[5].mxu1  ;;  %v1727_v43 = vld [vmem:[#allocation2 + $0x18] sm:$0xff]  ;;  %v1728_v44 = vld [vmem:[#allocation2 + $0x20] sm:$0xff] }
 0x234   : > { %1507 = vst [vmem:[#allocation2 + $0x49] sm:$0xff] %v1363_v42  ;;  %v1759_v46 = vpack.c.bf16 %v1728_v44, %v1727_v43  ;;  %v8457_v47 = vpack.c.bf16 %v7617_v41, %v1363_v42  ;;  %v1665_v59 = vld [vmem:[#allocation2 + $0x1a] sm:$0xff] }
 0x235   : > { %v8482_v2 = vpack.c.bf16 %v1666_v60, %v1665_v59  ;;  %v7907_v43 = vld [vmem:[%s9514_s3 + $0x1b8] sm:$0xff]  }
 0x236   : > { %v7620_v50 = vpop.f32.mrb[6].mxu1  ;;  %3025 = vmatprep.mubr.bf16.mxu1 %v1759_v46  ;;  %2873 = vmatmul.mubr.bf16.gmra.mrb[36].mxu0 %v1759_v46  ;;  %v1668_v12 = vld [vmem:[#allocation2 + $0x3a] sm:$0xff] }
 0x237   : > { %1510 = vst [vmem:[#allocation2 + $0x69] sm:$0xff] %v7620_v50  ;;  %v1373_v51 = vpop.f32.mrb[7].mxu1  ;;  %3026 = vmatmul.mubr.bf16.vlgmr.msra.gmra.mrb[32].mxu1 %v1695_v45  ;;  %2880 = vmatprep.mubr.bf16.mxu0 %v8455_v40  ;;  %v1729_v52 = vld [vmem:[#allocation2 + $0x30] sm:$0xff]  ;;  %v1730_v53 = vld [vmem:[#allocation2 + $0x38] sm:$0xff] }
 0x238   : > { %1509 = vst [vmem:[#allocation2 + $0x61] sm:$0xff] %v1373_v51  ;;  %v8466_v54 = vpack.c.bf16 %v1730_v53, %v1729_v52  ;;  %v8468_v55 = vpack.c.bf16 %v7620_v50, %v1373_v51  ;;  %6910 = vmatpush3.bf16.msra.mxu1 %v7890_v48  ;;  %v1667_v11 = vld [vmem:[#allocation2 + $0x32] sm:$0xff] }
 0x239   : > { %6911 = vmatprep.subr.bf16.mxu1 %v7891_v49  ;;  %v8506_v18 = vpack.c.bf16 %v1668_v12, %v1667_v11 }
 0x23a   : > { %v7623_v58 = vpop.f32.mrb[8].mxu1  ;;  %3033 = vmatprep.mubr.bf16.mxu1 %v8466_v54  ;;  %v1670_v28 = vld [vmem:[#allocation2 + $0x52] sm:$0xff] }
 0x23b   : > { %1512 = vst [vmem:[#allocation2 + $0x81] sm:$0xff] %v7623_v58  ;;  %v1383_v61 = vpop.f32.mrb[9].mxu1  ;;  %v1731_v62 = vld [vmem:[#allocation2 + $0x48] sm:$0xff]  ;;  %v1732_v63 = vld [vmem:[#allocation2 + $0x50] sm:$0xff] }
 0x23c   : > { %1511 = vst [vmem:[#allocation2 + $0x79] sm:$0xff] %v1383_v61  ;;  %v8477_v0 = vpack.c.bf16 %v7623_v58, %v1383_v61  ;;  %6912 = vmatpush3.bf16.msra.mxu1 %v7892_v56  ;;  %v8488_v5 = vpack.c.bf16 %v1732_v63, %v1731_v62  ;;  %v1669_v27 = vld [vmem:[#allocation2 + $0x4a] sm:$0xff] }
 0x23d   : > { %6913 = vmatprep.subr.bf16.mxu1 %v7895_v57  ;;  %v8530_v36 = vpack.c.bf16 %v1670_v28, %v1669_v27 }
 0x23e   : > { %v7626_v4 = vpop.f32.mrb[10].mxu1  ;;  %2881 = vmatmul.mubr.bf16.gmra.mrb[40].mxu0 %v8466_v54  ;;  %v1672_v46 = vld [vmem:[#allocation2 + $0x6a] sm:$0xff] }
 0x23f   : > { %1514 = vst [vmem:[#allocation2 + $0x99] sm:$0xff] %v7626_v4  ;;  %v1393_v6 = vpop.f32.mrb[11].mxu1  ;;  %3034 = vmatmul.mubr.bf16.gmra.mrb[36].mxu1 %v8482_v2  ;;  %2888 = vmatprep.mubr.bf16.mxu0 %v8457_v47  ;;  %v1733_v14 = vld [vmem:[#allocation2 + $0x60] sm:$0xff]  ;;  %v1734_v15 = vld [vmem:[#allocation2 + $0x68] sm:$0xff] }
 0x240   : > { %1513 = vst [vmem:[#allocation2 + $0x91] sm:$0xff] %v1393_v6  ;;  %3041 = vmatprep.mubr.bf16.mxu1 %v8488_v5  ;;  %v8493_v7 = vpack.c.bf16 %v7626_v4, %v1393_v6  ;;  %6914 = vmatpush3.bf16.msra.mxu1 %v7896_v1  ;;  %v8512_v21 = vpack.c.bf16 %v1734_v15, %v1733_v14  ;;  %v1671_v45 = vld [vmem:[#allocation2 + $0x62] sm:$0xff] }
 0x241   : > { %6915 = vmatprep.subr.bf16.mxu1 %v7897_v3  ;;  %v8548_v52 = vpack.c.bf16 %v1672_v46, %v1671_v45 }
 0x242   : > { %v7629_v10 = vpop.f32.mrb[12].mxu1  ;;  %v1674_v61 = vld [vmem:[#allocation2 + $0x82] sm:$0xff] }
 0x243   : > { %1516 = vst [vmem:[#allocation2 + $0xb1] sm:$0xff] %v7629_v10  ;;  %v1403_v13 = vpop.f32.mrb[13].mxu1  ;;  %v1735_v30 = vld [vmem:[#allocation2 + $0x78] sm:$0xff]  ;;  %v1736_v31 = vld [vmem:[#allocation2 + $0x80] sm:$0xff] }
 0x244   : > { %1515 = vst [vmem:[#allocation2 + $0xa9] sm:$0xff] %v1403_v13  ;;  %v8501_v16 = vpack.c.bf16 %v7629_v10, %v1403_v13  ;;  %6916 = vmatpush3.bf16.msra.mxu1 %v7898_v8  ;;  %v8536_v39 = vpack.c.bf16 %v1736_v31, %v1735_v30  ;;  %v1673_v60 = vld [vmem:[#allocation2 + $0x7a] sm:$0xff] }
 0x245   : > { %6917 = vmatprep.subr.bf16.mxu1 %v7899_v9  ;;  %v8560_v4 = vpack.c.bf16 %v1674_v61, %v1673_v60 }
 0x246   : > { %v7632_v20 = vpop.f32.mrb[14].mxu1  ;;  %2889 = vmatmul.mubr.bf16.gmra.mrb[44].mxu0 %v8488_v5  ;;  %v1676_v13 = vld [vmem:[#allocation2 + $0x9a] sm:$0xff] }
 0x247   : > { %1518 = vst [vmem:[#allocation2 + $0xc9] sm:$0xff] %v7632_v20  ;;  %v1413_v22 = vpop.f32.mrb[15].mxu1  ;;  %3042 = vmatmul.mubr.bf16.gmra.mrb[40].mxu1 %v8506_v18  ;;  %2896 = vmatprep.mubr.bf16.mxu0 %v8468_v55  ;;  %v1737_v49 = vld [vmem:[#allocation2 + $0x90] sm:$0xff]  ;;  %v1738_v50 = vld [vmem:[#allocation2 + $0x98] sm:$0xff] }
 0x248   : > { %1517 = vst [vmem:[#allocation2 + $0xc1] sm:$0xff] %v1413_v22  ;;  %3049 = vmatprep.mubr.bf16.mxu1 %v8512_v21  ;;  %v8517_v23 = vpack.c.bf16 %v7632_v20, %v1413_v22  ;;  %6918 = vmatpush3.bf16.msra.mxu1 %v7900_v17  ;;  %v8551_v56 = vpack.c.bf16 %v1738_v50, %v1737_v49  ;;  %v1675_v12 = vld [vmem:[#allocation2 + $0x92] sm:$0xff] }
 0x249   : > { %6919 = vmatprep.subr.bf16.mxu1 %v7901_v19  ;;  %v8584_v20 = vpack.c.bf16 %v1676_v13, %v1675_v12 }
 0x24a   : > { %v7635_v26 = vpop.f32.mrb[16].mxu1  ;;  %v1678_v27 = vld [vmem:[#allocation2 + $0xb2] sm:$0xff] }
 0x24b   : > { %1520 = vst [vmem:[#allocation2 + $0xe1] sm:$0xff] %v7635_v26  ;;  %v1423_v29 = vpop.f32.mrb[17].mxu1  ;;  %v1739_v63 = vld [vmem:[#allocation2 + $0xa8] sm:$0xff]  ;;  %v1740_v1 = vld [vmem:[#allocation2 + $0xb0] sm:$0xff] }
 0x24c   : > { %1519 = vst [vmem:[#allocation2 + $0xd9] sm:$0xff] %v1423_v29  ;;  %v8525_v33 = vpack.c.bf16 %v7635_v26, %v1423_v29  ;;  %6920 = vmatpush3.bf16.msra.mxu1 %v7902_v24  ;;  %v8565_v8 = vpack.c.bf16 %v1740_v1, %v1739_v63  ;;  %v1677_v26 = vld [vmem:[#allocation2 + $0xaa] sm:$0xff] }
 0x24d   : > { %6921 = vmatprep.subr.bf16.mxu1 %v7904_v25  ;;  %v8592_v30 = vpack.c.bf16 %v1678_v27, %v1677_v26 }
 0x24e   : > { %v7638_v38 = vpop.f32.mrb[18].mxu1  ;;  %2897 = vmatmul.mubr.bf16.gmra.mrb[48].mxu0 %v8512_v21 }
 0x24f   : > { %1522 = vst [vmem:[#allocation2 + $0xf9] sm:$0xff] %v7638_v38  ;;  %v1433_v41 = vpop.f32.mrb[19].mxu1  ;;  %3050 = vmatmul.mubr.bf16.gmra.mrb[44].mxu1 %v8530_v36  ;;  %2904 = vmatprep.mubr.bf16.mxu0 %v8477_v0  ;;  %v1741_v15 = vld [vmem:[#allocation2 + $0xc0] sm:$0xff]  ;;  %v1742_v17 = vld [vmem:[#allocation2 + $0xc8] sm:$0xff] }
 0x250   : > { %1521 = vst [vmem:[#allocation2 + $0xf1] sm:$0xff] %v1433_v41  ;;  %3057 = vmatprep.mubr.bf16.mxu1 %v8536_v39  ;;  %v8541_v42 = vpack.c.bf16 %v7638_v38, %v1433_v41  ;;  %6922 = vmatpush3.bf16.msra.mxu1 %v7905_v34  ;;  %v8587_v24 = vpack.c.bf16 %v1742_v17, %v1741_v15  ;;  %v1679_v34 = vld [vmem:[#allocation2 + $0xc2] sm:$0xff] }
 0x251   : > { %6923 = vmatprep.subr.bf16.mxu1 %v7906_v37  ;;  %v1680_v37 = vld [vmem:[#allocation2 + $0xca] sm:$0xff] }
 0x252   : > { %v7641_v44 = vpop.f32.mrb[20].mxu1  ;;  %v1682_v46 = vld [vmem:[#allocation2 + $0xe2] sm:$0xff] }
 0x253   : > { %1524 = vst [vmem:[#allocation2 + $0x111] sm:$0xff] %v7641_v44  ;;  %v1443_v48 = vpop.f32.mrb[21].mxu1  ;;  %v1743_v28 = vld [vmem:[#allocation2 + $0xd8] sm:$0xff]  ;;  %v1744_v29 = vld [vmem:[#allocation2 + $0xe0] sm:$0xff] }
 0x254   : > { %1523 = vst [vmem:[#allocation2 + $0x109] sm:$0xff] %v1443_v48  ;;  %v8546_v51 = vpack.c.bf16 %v7641_v44, %v1443_v48  ;;  %6924 = vmatpush3.bf16.msra.mxu1 %v7907_v43  ;;  %v8595_v31 = vpack.c.bf16 %v1744_v29, %v1743_v28  ;;  %v8600_v43 = vpack.c.bf16 %v1680_v37, %v1679_v34  ;;  %v1681_v45 = vld [vmem:[#allocation2 + $0xda] sm:$0xff] }
 0x255   : > { %v8608_v50 = vpack.c.bf16 %v1682_v46, %v1681_v45 }
 0x256   : > { %v7644_v53 = vpop.f32.mrb[22].mxu1  ;;  %2905 = vmatmul.mubr.bf16.gmra.mrb[52].mxu0 %v8536_v39  ;;  %v1684_v1 = vld [vmem:[#allocation2 + $0xfa] sm:$0xff] }
 0x257   : > { %1526 = vst [vmem:[#allocation2 + $0x129] sm:$0xff] %v7644_v53  ;;  %v1453_v57 = vpop.f32.mrb[23].mxu1  ;;  %3058 = vmatmul.mubr.bf16.gmra.mrb[48].mxu1 %v8548_v52  ;;  %2912 = vmatprep.mubr.bf16.mxu0 %v8493_v7  ;;  %v1745_v38 = vld [vmem:[#allocation2 + $0xf0] sm:$0xff]  ;;  %v1746_v41 = vld [vmem:[#allocation2 + $0xf8] sm:$0xff] }
 0x258   : > { %1525 = vst [vmem:[#allocation2 + $0x121] sm:$0xff] %v1453_v57  ;;  %3065 = vmatprep.mubr.bf16.mxu1 %v8551_v56  ;;  %v8556_v58 = vpack.c.bf16 %v7644_v53, %v1453_v57  ;;  %v8603_v44 = vpack.c.bf16 %v1746_v41, %v1745_v38  ;;  %v6589_v57 = vpop.f32.mrb[32].mxu0  ;;  %v1683_v63 = vld [vmem:[#allocation2 + $0xf2] sm:$0xff] }
 0x259   : > { %v8620_v17 = vpack.c.bf16 %v1684_v1, %v1683_v63 }
 0x25a   : > { %v7647_v59 = vpop.f32.mrb[24].mxu1  ;;  %v1686_v26 = vld [vmem:[#allocation2 + $0x112] sm:$0xff] }
 0x25b   : > { %1528 = vst [vmem:[#allocation2 + $0x141] sm:$0xff] %v7647_v59  ;;  %v1463_v62 = vpop.f32.mrb[25].mxu1  ;;  %v1747_v48 = vld [vmem:[#allocation2 + $0x108] sm:$0xff]  ;;  %v1748_v49 = vld [vmem:[#allocation2 + $0x110] sm:$0xff] }
 0x25c   : > { %1527 = vst [vmem:[#allocation2 + $0x139] sm:$0xff] %v1463_v62  ;;  %v8558_v3 = vpack.c.bf16 %v7647_v59, %v1463_v62  ;;  %v8611_v53 = vpack.c.bf16 %v1748_v49, %v1747_v48  ;;  %v6590_v59 = vpop.f32.mrb[33].mxu0 }
 0x25d   : > { %v8616_v60 = vadd.f32 %v6590_v59, %v6589_v57  ;;  %v6592_v61 = vpop.f32.mrb[34].mxu0 }
 0x25e   : > { %v8562_v6 = vpop.f32.mrb[26].mxu1  ;;  %2913 = vmatmul.mubr.bf16.gmra.mrb[56].mxu0 %v8551_v56  ;;  %v6593_v62 = vpop.f32.mrb[35].mxu0  ;;  %v1688_v38 = vld [vmem:[#allocation2 + $0x12a] sm:$0xff] }
 0x25f   : > { %1530 = vst [vmem:[#allocation2 + $0x159] sm:$0xff] %v8562_v6  ;;  %v8568_v9 = vpop.f32.mrb[27].mxu1  ;;  %3066 = vmatmul.mubr.bf16.gmra.mrb[52].mxu1 %v8560_v4  ;;  %2920 = vmatprep.mubr.bf16.mxu0 %v8501_v16  ;;  %v8618_v12 = vadd.f32 %v6593_v62, %v6592_v61  ;;  %v1749_v13 = vld [vmem:[#allocation2 + $0x120] sm:$0xff]  ;;  %v1750_v15 = vld [vmem:[#allocation2 + $0x128] sm:$0xff] }
 0x260   : > { %1529 = vst [vmem:[#allocation2 + $0x151] sm:$0xff] %v8568_v9  ;;  %3073 = vmatprep.mubr.bf16.mxu1 %v8565_v8  ;;  %v1645_v10 = vpack.c.bf16 %v8562_v6, %v8568_v9  ;;  %v1687_v37 = vld [vmem:[#allocation2 + $0x122] sm:$0xff] }
 0x261   : > { %v8636_v46 = vpack.c.bf16 %v1688_v38, %v1687_v37 }
 0x262   : > { %v8576_v11 = vpop.f32.mrb[28].mxu1  ;;  %v1690_v57 = vld [vmem:[#allocation2 + $0x142] sm:$0xff] }
 0x263   : > { %1532 = vst [vmem:[#allocation2 + $0x171] sm:$0xff] %v8576_v11  ;;  %v8579_v14 = vpop.f32.mrb[29].mxu1  ;;  %v1751_v27 = vld [vmem:[#allocation2 + $0x138] sm:$0xff]  ;;  %v1752_v28 = vld [vmem:[#allocation2 + $0x140] sm:$0xff] }
 0x264   : > { %1531 = vst [vmem:[#allocation2 + $0x169] sm:$0xff] %v8579_v14  ;;  %v1646_v19 = vpack.c.bf16 %v8576_v11, %v8579_v14  ;;  %v8631_v34 = vpack.c.bf16 %v1752_v28, %v1751_v27  ;;  %v1689_v49 = vld [vmem:[#allocation2 + $0x13a] sm:$0xff] }
 0x265   : > { %v8646_v62 = vpack.c.bf16 %v1690_v57, %v1689_v49 }
 0x266   : > { %v7656_v22 = vpop.f32.mrb[30].mxu1  ;;  %2921 = vmatmul.mubr.bf16.gmra.mrb[60].mxu0 %v8565_v8  ;;  %v1692_v9 = vld [vmem:[#allocation2 + $0x15a] sm:$0xff] }
 0x267   : > { %1534 = vst [vmem:[#allocation2 + $0x189] sm:$0xff] %v7656_v22  ;;  %v1493_v25 = vpop.f32.mrb[31].mxu1  ;;  %3074 = vmatmul.mubr.bf16.gmra.mrb[56].mxu1 %v8584_v20  ;;  %2928 = vmatprep.mubr.bf16.mxu0 %v8517_v23  ;;  %v8623_v22 = vpack.c.bf16 %v1750_v15, %v1749_v13  ;;  %v1753_v41 = vld [vmem:[#allocation2 + $0x150] sm:$0xff]  ;;  %v1754_v45 = vld [vmem:[#allocation2 + $0x158] sm:$0xff] }
 0x268   : > { %1533 = vst [vmem:[#allocation2 + $0x181] sm:$0xff] %v1493_v25  ;;  %3081 = vmatprep.mubr.bf16.mxu1 %v8587_v24  ;;  %v1685_v25 = vld [vmem:[#allocation2 + $0x10a] sm:$0xff]  ;;  %v8639_v48 = vpack.c.bf16 %v1754_v45, %v1753_v41  ;;  %v1691_v6 = vld [vmem:[#allocation2 + $0x152] sm:$0xff] }
 0x269   : > { %v8628_v29 = vpack.c.bf16 %v1686_v26, %v1685_v25  ;;  %v8656_v13 = vpack.c.bf16 %v1692_v9, %v1691_v6  ;;  %v7908_v25 = vld [vmem:[%s9514_s3 + $0x208] sm:$0xff]   ;;  %v7910_v26 = vld [vmem:[%s9514_s3 + $0x218] sm:$0xff]  }
 0x26a   : > { %v1694_v14 = vld [vmem:[#allocation2 + $0x172] sm:$0xff] }
 0x26b   : > { %v1755_v59 = vld [vmem:[#allocation2 + $0x168] sm:$0xff]  ;;  %v1756_v61 = vld [vmem:[#allocation2 + $0x170] sm:$0xff] }
 0x26c   : > { %v8649_v63 = vpack.c.bf16 %v1756_v61, %v1755_v59  ;;  %v1693_v11 = vld [vmem:[#allocation2 + $0x16a] sm:$0xff] }
 0x26e   : > { %2929 = vmatmul.mubr.bf16.gmra.mrb[64].mxu0 %v8587_v24  ;;  %v1886_v59 = vld [vmem:[#allocation2 + $0x18a] sm:$0xff] }
 0x26f   : > { %3082 = vmatmul.mubr.bf16.gmra.mrb[60].mxu1 %v8592_v30  ;;  %2936 = vmatprep.mubr.bf16.mxu0 %v8525_v33  ;;  %v1758_v1 = vld [vmem:[#allocation2 + $0x188] sm:$0xff] }
 0x270   : > { %3089 = vmatprep.mubr.bf16.mxu1 %v8595_v31  ;;  %v1885_v57 = vld [vmem:[#allocation2 + $0x182] sm:$0xff] }
 0x271   : > { %v2012_v9 = vld [vmem:[#allocation2 + $0x181] sm:$0xff] }
 0x276   : > { %2937 = vmatmul.mubr.bf16.gmra.mrb[68].mxu0 %v8595_v31 }
 0x277   : > { %3090 = vmatmul.mubr.bf16.gmra.mrb[64].mxu1 %v8600_v43  ;;  %2944 = vmatprep.mubr.bf16.mxu0 %v8541_v42 }
 0x278   : > { %3097 = vmatprep.mubr.bf16.mxu1 %v8603_v44 }
 0x27e   : > { %2945 = vmatmul.mubr.bf16.gmra.mrb[72].mxu0 %v8603_v44 }
 0x27f   : > { %3098 = vmatmul.mubr.bf16.gmra.mrb[68].mxu1 %v8608_v50  ;;  %2952 = vmatprep.mubr.bf16.mxu0 %v8546_v51 }
 0x280   : > { %3105 = vmatprep.mubr.bf16.mxu1 %v8611_v53 }
 0x286   : > { %2953 = vmatmul.mubr.bf16.gmra.mrb[76].mxu0 %v8611_v53 }
 0x287   : > { %3106 = vmatmul.mubr.bf16.gmra.mrb[72].mxu1 %v8620_v17  ;;  %2960 = vmatprep.mubr.bf16.mxu0 %v8556_v58 }
 0x288   : > { %3113 = vmatprep.mubr.bf16.mxu1 %v8623_v22 }
 0x28e   : > { %2961 = vmatmul.mubr.bf16.gmra.mrb[80].mxu0 %v8623_v22 }
 0x28f   : > { %3114 = vmatmul.mubr.bf16.gmra.mrb[76].mxu1 %v8628_v29  ;;  %2968 = vmatprep.mubr.bf16.mxu0 %v8558_v3 }
 0x290   : > { %3121 = vmatprep.mubr.bf16.mxu1 %v8631_v34 }
 0x296   : > { %2969 = vmatmul.mubr.bf16.gmra.mrb[84].mxu0 %v8631_v34 }
 0x297   : > { %3122 = vmatmul.mubr.bf16.gmra.mrb[80].mxu1 %v8636_v46  ;;  %2976 = vmatprep.mubr.bf16.mxu0 %v1645_v10  ;;  %v1757_v10 = vld [vmem:[#allocation2 + $0x180] sm:$0xff] }
 0x298   : > { %3129 = vmatprep.mubr.bf16.mxu1 %v8639_v48  ;;  %v8659_v15 = vpack.c.bf16 %v1758_v1, %v1757_v10  ;;  %v2013_v10 = vld [vmem:[#allocation2 + $0x189] sm:$0xff] }
 0x29e   : > { %2977 = vmatmul.mubr.bf16.gmra.mrb[88].mxu0 %v8639_v48 }
 0x29f   : > { %3130 = vmatmul.mubr.bf16.gmra.mrb[84].mxu1 %v8646_v62  ;;  %2984 = vmatprep.mubr.bf16.mxu0 %v1646_v19  ;;  %v8664_v19 = vpack.c.bf16 %v1694_v14, %v1693_v11 }
 0x2a0   : > { %3137 = vmatprep.mubr.bf16.mxu1 %v8649_v63 }
 0x2a6   : > { %2985 = vmatmul.mubr.bf16.gmra.mrb[92].mxu0 %v8649_v63 }
 0x2a7   : > { %3138 = vmatmul.mubr.bf16.gmra.mrb[88].mxu1 %v8656_v13  ;;  %3186 = vmatprep.mubr.bf16.mxu0 %v8482_v2  ;;  %v7909_v2 = vld [vmem:[%s9514_s3 + $0x210] sm:$0xff]  }
 0x2a8   : > { %3145 = vmatprep.mubr.bf16.mxu1 %v8659_v15 }
 0x2ae   : > { %3187 = vmatmul.mubr.bf16.vlgmr.msra.gmra.mrb[96].mxu0 %v8452_v35  ;;  %v7912_v35 = vld [vmem:[%s9514_s3 + $0x228] sm:$0xff]  }
 0x2af   : > { %3146 = vmatmul.mubr.bf16.gmra.mrb[92].mxu1 %v8664_v19  ;;  %7658 = vmatpush3.bf16.msra.mxu0 %v8449_v32  ;;  %v7911_v32 = vld [vmem:[%s9514_s3 + $0x220] sm:$0xff]  }
 0x2b0   : > { %3194 = vmatprep.mubr.bf16.mxu0 %v8506_v18  ;;  %3347 = vmatprep.mubr.bf16.mxu1 %v8455_v40 }
 0x2b1   : > { %7659 = vmatprep.subr.bf16.mxu0 %v7908_v25 }
 0x2b3   : > { %7660 = vmatpush3.bf16.msra.mxu0 %v7908_v25  ;;  %v8750_v25 = vpack.c.bf16 %v1886_v59, %v1885_v57  ;;  %v7919_v59 = vld [vmem:[#allocation4 + $0x50] sm:$0xff]  }
 0x2b4   : > { %7661 = vmatprep.subr.bf16.mxu0 %v7909_v2 }
 0x2b6   : > { %3195 = vmatmul.mubr.bf16.gmra.mrb[100].mxu0 %v8455_v40  ;;  %v7913_v40 = vld [vmem:[%s9514_s3 + $0x230] sm:$0xff]  }
 0x2b7   : > { %3348 = vmatmul.mubr.bf16.vlgmr.msra.gmra.mrb[96].mxu1 %v8466_v54  ;;  %3202 = vmatprep.mubr.bf16.mxu0 %v8530_v36  ;;  %v7914_v54 = vld [vmem:[%s9514_s3 + $0x238] sm:$0xff]  }
 0x2b8   : > { %3355 = vmatprep.mubr.bf16.mxu1 %v8457_v47  ;;  %7662 = vmatpush3.bf16.msra.mxu0 %v7909_v2 }
 0x2b9   : > { %7663 = vmatprep.subr.bf16.mxu0 %v7910_v26 }
 0x2bc   : > { %7664 = vmatpush3.bf16.msra.mxu0 %v7910_v26  ;;  %v2030_v26 = vpack.c.bf16 %v2013_v10, %v2012_v9  ;;  %v2054_v9 = vld [vmem:[#allocation2 + $0x7a] sm:$0xff]  ;;  %v2055_v10 = vld [vmem:[#allocation2 + $0x82] sm:$0xff] }
 0x2bd   : > { %7665 = vmatprep.subr.bf16.mxu0 %v7911_v32 }
 0x2be   : > { %3203 = vmatmul.mubr.bf16.gmra.mrb[104].mxu0 %v8457_v47 }
 0x2bf   : > { %3356 = vmatmul.mubr.bf16.gmra.mrb[100].mxu1 %v8488_v5  ;;  %3210 = vmatprep.mubr.bf16.mxu0 %v8548_v52 }
 0x2c0   : > { %3363 = vmatprep.mubr.bf16.mxu1 %v8468_v55  ;;  %7666 = vmatpush3.bf16.msra.mxu0 %v7911_v32 }
 0x2c1   : > { %7667 = vmatprep.subr.bf16.mxu0 %v7912_v35 }
 0x2c4   : > { %7668 = vmatpush3.bf16.msra.mxu0 %v7912_v35  ;;  %v7917_v35 = vld [vmem:[#allocation4 + $0x48] sm:$0xff]  }
 0x2c5   : > { %7669 = vmatprep.subr.bf16.mxu0 %v7913_v40 }
 0x2c6   : > { %3211 = vmatmul.mubr.bf16.gmra.mrb[108].mxu0 %v8468_v55  ;;  %v1815_v55 = vld [vmem:[#allocation2 + $0x139] sm:$0xff] }
 0x2c7   : > { %3364 = vmatmul.mubr.bf16.gmra.mrb[104].mxu1 %v8512_v21  ;;  %3218 = vmatprep.mubr.bf16.mxu0 %v8560_v4 }
 0x2c8   : > { %3371 = vmatprep.mubr.bf16.mxu1 %v8477_v0  ;;  %7670 = vmatpush3.bf16.msra.mxu0 %v7913_v40  ;;  %v7918_v40 = vld [vmem:[#allocation4 + $0x8] sm:$0xff]  }
 0x2c9   : > { %7671 = vmatprep.subr.bf16.mxu0 %v7914_v54 }
 0x2cc   : > { %7672 = vmatpush3.bf16.msra.mxu0 %v7914_v54 }
 0x2ce   : > { %3219 = vmatmul.mubr.bf16.gmra.mrb[112].mxu0 %v8477_v0  ;;  %v1816_v0 = vld [vmem:[#allocation2 + $0x141] sm:$0xff] }
 0x2cf   : > { %3372 = vmatmul.mubr.bf16.gmra.mrb[108].mxu1 %v8536_v39  ;;  %3226 = vmatprep.mubr.bf16.mxu0 %v8584_v20  ;;  %v7916_v20 = vld [vmem:[#allocation4] sm:$0xff]  }
 0x2d0   : > { %3379 = vmatprep.mubr.bf16.mxu1 %v8493_v7 }
 0x2d6   : > { %3227 = vmatmul.mubr.bf16.gmra.mrb[116].mxu0 %v8493_v7 }
 0x2d7   : > { %3380 = vmatmul.mubr.bf16.gmra.mrb[112].mxu1 %v8551_v56  ;;  %3234 = vmatprep.mubr.bf16.mxu0 %v8592_v30 }
 0x2d8   : > { %3387 = vmatprep.mubr.bf16.mxu1 %v8501_v16 }
 0x2de   : > { %3235 = vmatmul.mubr.bf16.gmra.mrb[120].mxu0 %v8501_v16 }
 0x2df   : > { %3388 = vmatmul.mubr.bf16.gmra.mrb[116].mxu1 %v8565_v8  ;;  %3242 = vmatprep.mubr.bf16.mxu0 %v8600_v43  ;;  %v7915_v8 = vld [vmem:[#allocation4 + $0x40] sm:$0xff]  }
 0x2e0   : > { %3395 = vmatprep.mubr.bf16.mxu1 %v8517_v23  ;;  %7045 = vmatprep.subr.bf16.mxu1 %v7915_v8 }
 0x2e1   : > { %7046 = vmatpush3.bf16.msra.mxu1 %v7916_v20 }
 0x2e2   : > { %7047 = vmatprep.subr.bf16.mxu1 %v7917_v35 }
 0x2e5   : > { %7048 = vmatpush3.bf16.msra.mxu1 %v7918_v40 }
 0x2e6   : > { %3243 = vmatmul.mubr.bf16.gmra.mrb[124].mxu0 %v8517_v23  ;;  %v2008_v23 = vld [vmem:[#allocation2 + $0x151] sm:$0xff]  ;;  %7049 = vmatprep.subr.bf16.mxu1 %v7919_v59 }
 0x2e7   : > { %3396 = vmatmul.mubr.bf16.gmra.mrb[120].mxu1 %v8587_v24  ;;  %3250 = vmatprep.mubr.bf16.mxu0 %v8608_v50 }
 0x2e8   : > { %3403 = vmatprep.mubr.bf16.mxu1 %v8525_v33 }
 0x2ee   : > { %3251 = vmatmul.mubr.bf16.gmra.mrb[128].mxu0 %v8525_v33  ;;  %v2009_v33 = vld [vmem:[#allocation2 + $0x159] sm:$0xff] }
 0x2ef   : > { %3404 = vmatmul.mubr.bf16.gmra.mrb[124].mxu1 %v8595_v31  ;;  %3258 = vmatprep.mubr.bf16.mxu0 %v8620_v17  ;;  %v2028_v4 = vpack.c.bf16 %v2009_v33, %v2008_v23  ;;  %v2011_v17 = vld [vmem:[#allocation2 + $0x171] sm:$0xff] }
 0x2f0   : > { %3411 = vmatprep.mubr.bf16.mxu1 %v8541_v42 }
 0x2f6   : > { %3259 = vmatmul.mubr.bf16.gmra.mrb[132].mxu0 %v8541_v42 }
 0x2f7   : > { %3412 = vmatmul.mubr.bf16.gmra.mrb[128].mxu1 %v8603_v44  ;;  %3266 = vmatprep.mubr.bf16.mxu0 %v8628_v29 }
 0x2f8   : > { %3419 = vmatprep.mubr.bf16.mxu1 %v8546_v51 }
 0x2fe   : > { %3267 = vmatmul.mubr.bf16.gmra.mrb[136].mxu0 %v8546_v51  ;;  %v1835_v51 = vpack.c.bf16 %v1816_v0, %v1815_v55  ;;  %v2014_v55 = vld [vmem:[#allocation2 + $0x199] sm:$0xff]  ;;  %v2015_v0 = vld [vmem:[#allocation2 + $0x1a1] sm:$0xff] }
 0x2ff   : > { %3420 = vmatmul.mubr.bf16.gmra.mrb[132].mxu1 %v8611_v53  ;;  %3274 = vmatprep.mubr.bf16.mxu0 %v8636_v46 }
 0x300   : > { %3427 = vmatprep.mubr.bf16.mxu1 %v8556_v58 }
 0x306   : > { %3275 = vmatmul.mubr.bf16.gmra.mrb[140].mxu0 %v8556_v58 }
 0x307   : > { %3428 = vmatmul.mubr.bf16.gmra.mrb[136].mxu1 %v8623_v22  ;;  %3282 = vmatprep.mubr.bf16.mxu0 %v8646_v62 }
 0x308   : > { %3435 = vmatprep.mubr.bf16.mxu1 %v8558_v3 }
 0x309   : > { %v6595_v47 = vpop.f32.mrb[36].mxu0 }
 0x30a   : > { %v6701_v5 = vpop.f32.mrb[32].mxu1  ;;  %v6596_v7 = vpop.f32.mrb[37].mxu0 }
 0x30b   : > { %v6597_v16 = vadd.f32 %v6596_v7, %v6595_v47  ;;  %v6702_v18 = vpop.f32.mrb[33].mxu1  ;;  %v6598_v21 = vpop.f32.mrb[38].mxu0 }
 0x30c   : > { %v6703_v36 = vadd.f32 %v6702_v18, %v6701_v5  ;;  %v6704_v39 = vpop.f32.mrb[34].mxu1  ;;  %v6599_v42 = vpop.f32.mrb[39].mxu0  ;;  %v2049_v18 = vld [vmem:[#allocation2 + $0x3a] sm:$0xff] }
 0x30d   : > { %v6600_v52 = vadd.f32 %v6599_v42, %v6598_v21  ;;  %v6705_v56 = vpop.f32.mrb[35].mxu1  ;;  %v2031_v42 = vpack.c.bf16 %v2015_v0, %v2014_v55  ;;  %v2083_v55 = vpack.c.bf16 %v2055_v10, %v2054_v9 }
 0x30e   : > { %v6706_v58 = vadd.f32 %v6705_v56, %v6704_v39  ;;  %3283 = vmatmul.mubr.bf16.gmra.mrb[144].mxu0 %v1835_v51  ;;  %v8737_v3 = vadd.f32 %v6703_v36, %v8616_v60  ;;  %v2010_v60 = vld [vmem:[#allocation2 + $0x169] sm:$0xff] }
 0x30f   : > { %3436 = vmatmul.mubr.bf16.gmra.mrb[140].mxu1 %v8631_v34  ;;  %3290 = vmatprep.mubr.bf16.mxu0 %v8656_v13  ;;  %v2029_v38 = vpack.c.bf16 %v2011_v17, %v2010_v60 }
 0x310   : > { %3443 = vmatprep.mubr.bf16.mxu1 %v2028_v4  ;;  %v8742_v24 = vadd.f32 %v6706_v58, %v8618_v12 }
 0x311   : > { %v6601_v30 = vpop.f32.mrb[40].mxu0 }
 0x312   : > { %v6707_v31 = vpop.f32.mrb[36].mxu1  ;;  %v6602_v43 = vpop.f32.mrb[41].mxu0 }
 0x313   : > { %v6603_v44 = vadd.f32 %v6602_v43, %v6601_v30  ;;  %v6708_v50 = vpop.f32.mrb[37].mxu1  ;;  %v6604_v53 = vpop.f32.mrb[42].mxu0  ;;  %v2050_v30 = vld [vmem:[#allocation2 + $0x4a] sm:$0xff] }
 0x314   : > { %v6709_v22 = vadd.f32 %v6708_v50, %v6707_v31  ;;  %v6710_v27 = vpop.f32.mrb[38].mxu1  ;;  %v6605_v28 = vpop.f32.mrb[43].mxu0  ;;  %v2051_v31 = vld [vmem:[#allocation2 + $0x52] sm:$0xff]  ;;  %v2052_v50 = vld [vmem:[#allocation2 + $0x62] sm:$0xff] }
 0x315   : > { %v6606_v29 = vadd.f32 %v6605_v28, %v6604_v53  ;;  %v6711_v34 = vpop.f32.mrb[39].mxu1  ;;  %v2053_v53 = vld [vmem:[#allocation2 + $0x6a] sm:$0xff] }
 0x316   : > { %v6712_v37 = vadd.f32 %v6711_v34, %v6710_v27  ;;  %3291 = vmatmul.mubr.bf16.gmra.mrb[148].mxu0 %v2028_v4  ;;  %v8744_v12 = vadd.f32 %v6709_v22, %v6597_v16  ;;  %v2048_v16 = vld [vmem:[#allocation2 + $0x32] sm:$0xff]  ;;  %v7987_v27 = vld [vmem:[#allocation2] sm:$0xff] }
 0x317   : > { %3444 = vmatmul.mubr.bf16.gmra.mrb[144].mxu1 %v8639_v48  ;;  %3298 = vmatprep.mubr.bf16.mxu0 %v8664_v19  ;;  %v2080_v56 = vpack.c.bf16 %v2049_v18, %v2048_v16  ;;  %v8763_v28 = vpack.c.bf16 %v7987_v27, %v7987_v27  ;;  %v7922_v27 = vld [vmem:[#allocation4 + $0x18] sm:$0xff]  }
 0x318   : > { %3451 = vmatprep.mubr.bf16.mxu1 %v2029_v38  ;;  %v8748_v41 = vadd.f32 %v6712_v37, %v6600_v52  ;;  %v2081_v37 = vpack.c.bf16 %v2051_v31, %v2050_v30 }
 0x319   : > { %v6607_v45 = vpop.f32.mrb[44].mxu0 }
 0x31a   : > { %v6713_v46 = vpop.f32.mrb[40].mxu1  ;;  %v6608_v49 = vpop.f32.mrb[45].mxu0 }
 0x31b   : > { %v6609_v61 = vadd.f32 %v6608_v49, %v6607_v45  ;;  %v6714_v62 = vpop.f32.mrb[41].mxu1  ;;  %v6610_v6 = vpop.f32.mrb[46].mxu0 }
 0x31c   : > { %v6715_v1 = vadd.f32 %v6714_v62, %v6713_v46  ;;  %v6716_v13 = vpop.f32.mrb[42].mxu1  ;;  %v6611_v11 = vpop.f32.mrb[47].mxu0  ;;  %v2082_v46 = vpack.c.bf16 %v2053_v53, %v2052_v50 }
 0x31d   : > { %v6612_v14 = vadd.f32 %v6611_v11, %v6610_v6  ;;  %v6717_v48 = vpop.f32.mrb[43].mxu1  ;;  %v2056_v11 = vld [vmem:[#allocation2 + $0x92] sm:$0xff] }
 0x31e   : > { %v6718_v2 = vadd.f32 %v6717_v48, %v6716_v13  ;;  %3299 = vmatmul.mubr.bf16.gmra.mrb[152].mxu0 %v2029_v38  ;;  %v8752_v32 = vadd.f32 %v6715_v1, %v6603_v44 }
 0x31f   : > { %3452 = vmatmul.mubr.bf16.gmra.mrb[148].mxu1 %v8649_v63  ;;  %3306 = vmatprep.mubr.bf16.mxu0 %v8750_v25 }
 0x320   : > { %3459 = vmatprep.mubr.bf16.mxu1 %v2030_v26  ;;  %v8756_v54 = vadd.f32 %v6718_v2, %v6606_v29 }
 0x321   : > { %v6613_v47 = vpop.f32.mrb[48].mxu0 }
 0x322   : > { %v6719_v5 = vpop.f32.mrb[44].mxu1  ;;  %v6614_v7 = vpop.f32.mrb[49].mxu0 }
 0x323   : > { %v6615_v21 = vadd.f32 %v6614_v7, %v6613_v47  ;;  %v6720_v23 = vpop.f32.mrb[45].mxu1  ;;  %v6616_v33 = vpop.f32.mrb[50].mxu0 }
 0x324   : > { %v6721_v63 = vadd.f32 %v6720_v23, %v6719_v5  ;;  %v6722_v36 = vpop.f32.mrb[46].mxu1  ;;  %v6617_v39 = vpop.f32.mrb[51].mxu0 }
 0x325   : > { %v6618_v51 = vadd.f32 %v6617_v39, %v6616_v33  ;;  %v6723_v52 = vpop.f32.mrb[47].mxu1  ;;  %v2058_v33 = vld [vmem:[#allocation2 + $0xaa] sm:$0xff] }
 0x326   : > { %v6724_v58 = vadd.f32 %v6723_v52, %v6722_v36  ;;  %3307 = vmatmul.mubr.bf16.gmra.mrb[156].mxu0 %v2030_v26  ;;  %v8758_v4 = vadd.f32 %v6721_v63, %v6609_v61  ;;  %v7920_v61 = vld [vmem:[#allocation4 + $0x10] sm:$0xff]   ;;  %v2059_v63 = vld [vmem:[#allocation2 + $0xb2] sm:$0xff] }
 0x327   : > { %3460 = vmatmul.mubr.bf16.gmra.mrb[152].mxu1 %v8659_v15  ;;  %7673 = vmatprep.mubr.bf16.mxu0 %v2080_v56 }
 0x328   : > { %3467 = vmatprep.mubr.bf16.mxu1 %v2031_v42  ;;  %v8761_v8 = vadd.f32 %v6724_v58, %v6612_v14  ;;  %v2057_v14 = vld [vmem:[#allocation2 + $0x9a] sm:$0xff]  ;;  %7050 = vmatpush3.bf16.msra.mxu1 %v7920_v61  ;;  %v2060_v42 = vld [vmem:[#allocation2 + $0xc2] sm:$0xff] }
 0x329   : > { %v6619_v20 = vpop.f32.mrb[52].mxu0  ;;  %v2084_v7 = vpack.c.bf16 %v2057_v14, %v2056_v11 }
 0x32a   : > { %v6725_v43 = vpop.f32.mrb[48].mxu1  ;;  %v6620_v44 = vpop.f32.mrb[53].mxu0 }
 0x32b   : > { %v6621_v60 = vadd.f32 %v6620_v44, %v6619_v20  ;;  %v6726_v17 = vpop.f32.mrb[49].mxu1  ;;  %v6622_v22 = vpop.f32.mrb[54].mxu0 }
 0x32c   : > { %v6727_v29 = vadd.f32 %v6726_v17, %v6725_v43  ;;  %v6728_v34 = vpop.f32.mrb[50].mxu1  ;;  %v6623_v15 = vpop.f32.mrb[55].mxu0  ;;  %v2085_v43 = vpack.c.bf16 %v2059_v63, %v2058_v33 }
 0x32d   : > { %v6624_v38 = vadd.f32 %v6623_v15, %v6622_v22  ;;  %v6729_v45 = vpop.f32.mrb[51].mxu1  ;;  %v7921_v22 = vld [vmem:[#allocation4 + $0x58] sm:$0xff]   ;;  %v2062_v15 = vld [vmem:[#allocation2 + $0xda] sm:$0xff] }
 0x32e   : > { %v6730_v49 = vadd.f32 %v6729_v45, %v6728_v34  ;;  %7674 = vmatmul.mubr.bf16.vlgmr.msra.gmra.mrb[160].mxu0 %v2081_v37  ;;  %v8765_v57 = vadd.f32 %v6727_v29, %v6615_v21  ;;  %v2063_v37 = vld [vmem:[#allocation2 + $0xe2] sm:$0xff]  ;;  %7051 = vmatprep.subr.bf16.mxu1 %v7921_v22 }
 0x32f   : > { %3468 = vmatmul.mubr.bf16.gmra.mrb[156].mxu1 %v8763_v28  ;;  %7677 = vmatprep.mubr.bf16.mxu0 %v2082_v46  ;;  %v2064_v46 = vld [vmem:[#allocation2 + $0xf2] sm:$0xff] }
 0x330   : > { %v8768_v62 = vadd.f32 %v6730_v49, %v6618_v51  ;;  %v2061_v51 = vld [vmem:[#allocation2 + $0xca] sm:$0xff]  ;;  %v2065_v49 = vld [vmem:[#allocation2 + $0xfa] sm:$0xff]  ;;  %7052 = vmatpush3.bf16.msra.mxu1 %v7922_v27 }
 0x331   : > { %v6625_v6 = vpop.f32.mrb[56].mxu0  ;;  %v2086_v53 = vpack.c.bf16 %v2061_v51, %v2060_v42 }
 0x332   : > { %v6731_v1 = vpop.f32.mrb[52].mxu1  ;;  %v6626_v13 = vpop.f32.mrb[57].mxu0 }
 0x333   : > { %v6627_v48 = vadd.f32 %v6626_v13, %v6625_v6  ;;  %v6732_v2 = vpop.f32.mrb[53].mxu1  ;;  %v6628_v26 = vpop.f32.mrb[58].mxu0  ;;  %v2087_v13 = vpack.c.bf16 %v2063_v37, %v2062_v15  ;;  %v2073_v15 = vld [vmem:[#allocation2 + $0x15a] sm:$0xff] }
 0x334   : > { %v6733_v35 = vadd.f32 %v6732_v2, %v6731_v1  ;;  %v6734_v40 = vpop.f32.mrb[54].mxu1  ;;  %v6629_v47 = vpop.f32.mrb[59].mxu0 }
 0x335   : > { %v6630_v0 = vadd.f32 %v6629_v47, %v6628_v26  ;;  %v6735_v5 = vpop.f32.mrb[55].mxu1  ;;  %v2066_v47 = vld [vmem:[#allocation2 + $0x10a] sm:$0xff] }
 0x336   : > { %v8770_v16 = vadd.f32 %v6733_v35, %v6621_v60  ;;  %v6736_v18 = vadd.f32 %v6735_v5, %v6734_v40  ;;  %7678 = vmatmul.mubr.bf16.gmra.mrb[164].mxu0 %v2083_v55  ;;  %v2067_v55 = vld [vmem:[#allocation2 + $0x112] sm:$0xff] }
 0x337   : > { %7681 = vmatprep.mubr.bf16.mxu0 %v2084_v7  ;;  %v2068_v7 = vld [vmem:[#allocation2 + $0x122] sm:$0xff]  ;;  %v2089_v51 = vpack.c.bf16 %v2067_v55, %v2066_v47 }
 0x338   : > { %v8772_v21 = vadd.f32 %v6736_v18, %v6624_v38  ;;  %v2069_v18 = vld [vmem:[#allocation2 + $0x12a] sm:$0xff] }
 0x339   : > { %v6631_v23 = vpop.f32.mrb[60].mxu0 }
 0x33a   : > { %v6737_v36 = vpop.f32.mrb[56].mxu1  ;;  %v6632_v39 = vpop.f32.mrb[61].mxu0 }
 0x33b   : > { %v6633_v52 = vadd.f32 %v6632_v39, %v6631_v23  ;;  %v6738_v56 = vpop.f32.mrb[57].mxu1  ;;  %v6634_v58 = vpop.f32.mrb[62].mxu0 }
 0x33c   : > { %v6739_v20 = vadd.f32 %v6738_v56, %v6737_v36  ;;  %v6740_v30 = vpop.f32.mrb[58].mxu1  ;;  %v6635_v31 = vpop.f32.mrb[63].mxu0 }
 0x33d   : > { %v6636_v44 = vadd.f32 %v6635_v31, %v6634_v58  ;;  %v6741_v50 = vpop.f32.mrb[59].mxu1  ;;  %v2090_v58 = vpack.c.bf16 %v2069_v18, %v2068_v7  ;;  %v7923_v31 = vld [vmem:[#allocation4 + $0x60] sm:$0xff]  }
 0x33e   : > { %v8774_v60 = vadd.f32 %v6739_v20, %v6627_v48  ;;  %v6742_v17 = vadd.f32 %v6741_v50, %v6740_v30  ;;  %7682 = vmatmul.mubr.bf16.gmra.mrb[168].mxu0 %v2085_v43  ;;  %v2088_v48 = vpack.c.bf16 %v2065_v49, %v2064_v46  ;;  %v7924_v43 = vld [vmem:[#allocation4 + $0x20] sm:$0xff]   ;;  %7053 = vmatprep.subr.bf16.mxu1 %v7923_v31  ;;  %v7930_v31 = vld [vmem:[#allocation4 + $0x88] sm:$0xff]  }
 0x33f   : > { %7685 = vmatprep.mubr.bf16.mxu0 %v2086_v53  ;;  %v2070_v53 = vld [vmem:[#allocation2 + $0x13a] sm:$0xff]  ;;  %7054 = vmatpush3.bf16.msra.mxu1 %v7924_v43 }
 0x340   : > { %v8776_v29 = vadd.f32 %v6742_v17, %v6630_v0  ;;  %v2071_v17 = vld [vmem:[#allocation2 + $0x142] sm:$0xff] }
 0x341   : > { %v6637_v34 = vpop.f32.mrb[64].mxu0 }
 0x342   : > { %v6743_v38 = vpop.f32.mrb[60].mxu1  ;;  %v6638_v45 = vpop.f32.mrb[65].mxu0 }
 0x343   : > { %v6639_v59 = vadd.f32 %v6638_v45, %v6637_v34  ;;  %v6744_v61 = vpop.f32.mrb[61].mxu1  ;;  %v6640_v6 = vpop.f32.mrb[66].mxu0  ;;  %v2072_v34 = vld [vmem:[#allocation2 + $0x152] sm:$0xff] }
 0x344   : > { %v6745_v9 = vadd.f32 %v6744_v61, %v6743_v38  ;;  %v6746_v10 = vpop.f32.mrb[62].mxu1  ;;  %v6641_v1 = vpop.f32.mrb[67].mxu0  ;;  %v2091_v61 = vpack.c.bf16 %v2071_v17, %v2070_v53 }
 0x345   : > { %v6642_v11 = vadd.f32 %v6641_v1, %v6640_v6  ;;  %v6747_v14 = vpop.f32.mrb[63].mxu1 }
 0x346   : > { %v8778_v2 = vadd.f32 %v6745_v9, %v6633_v52  ;;  %v6748_v26 = vadd.f32 %v6747_v14, %v6746_v10  ;;  %7686 = vmatmul.mubr.bf16.gmra.mrb[172].mxu0 %v2087_v13  ;;  %v2092_v10 = vpack.c.bf16 %v2073_v15, %v2072_v34  ;;  %v7926_v14 = vld [vmem:[#allocation4 + $0x80] sm:$0xff]  }
 0x347   : > { %7689 = vmatprep.mubr.bf16.mxu0 %v2088_v48 }
 0x348   : > { %v8780_v35 = vadd.f32 %v6748_v26, %v6636_v44 }
 0x349   : > { %v6643_v40 = vpop.f32.mrb[68].mxu0 }
 0x34a   : > { %v6749_v0 = vpop.f32.mrb[64].mxu1  ;;  %v6644_v5 = vpop.f32.mrb[69].mxu0 }
 0x34b   : > { %v6645_v23 = vadd.f32 %v6644_v5, %v6643_v40  ;;  %v6750_v33 = vpop.f32.mrb[65].mxu1  ;;  %v6646_v63 = vpop.f32.mrb[70].mxu0 }
 0x34c   : > { %v6751_v36 = vadd.f32 %v6750_v33, %v6749_v0  ;;  %v6752_v39 = vpop.f32.mrb[66].mxu1  ;;  %v6647_v42 = vpop.f32.mrb[71].mxu0 }
 0x34d   : > { %v6648_v52 = vadd.f32 %v6647_v42, %v6646_v63  ;;  %v6753_v56 = vpop.f32.mrb[67].mxu1  ;;  %v2078_v42 = vld [vmem:[#allocation2 + $0x19a] sm:$0xff] }
 0x34e   : > { %v8782_v20 = vadd.f32 %v6751_v36, %v6639_v59  ;;  %v6754_v30 = vadd.f32 %v6753_v56, %v6752_v39  ;;  %7690 = vmatmul.mubr.bf16.gmra.mrb[176].mxu0 %v2089_v51  ;;  %v2079_v51 = vld [vmem:[#allocation2 + $0x1a2] sm:$0xff]  ;;  %v7928_v56 = vld [vmem:[#allocation4 + $0xc8] sm:$0xff]  }
 0x34f   : > { %7693 = vmatprep.mubr.bf16.mxu0 %v2090_v58  ;;  %v7929_v58 = vld [vmem:[#allocation4 + $0x28] sm:$0xff]   ;;  %v2095_v17 = vpack.c.bf16 %v2079_v51, %v2078_v42 }
 0x350   : > { %v8784_v44 = vadd.f32 %v6754_v30, %v6642_v11  ;;  %v7925_v11 = vld [vmem:[#allocation4 + $0xc0] sm:$0xff]  }
 0x351   : > { %v6649_v50 = vpop.f32.mrb[72].mxu0  ;;  %7157 = vmatprep.subr.bf16.mxu0 %v7925_v11 }
 0x352   : > { %v6755_v22 = vpop.f32.mrb[68].mxu1  ;;  %v6650_v27 = vpop.f32.mrb[73].mxu0  ;;  %7158 = vmatpush3.bf16.msra.mxu0 %v7926_v14 }
 0x353   : > { %v6651_v37 = vadd.f32 %v6650_v27, %v6649_v50  ;;  %v6756_v38 = vpop.f32.mrb[69].mxu1  ;;  %v6652_v45 = vpop.f32.mrb[74].mxu0  ;;  %7159 = vmatprep.subr.bf16.mxu0 %v7928_v56 }
 0x354   : > { %v6757_v46 = vadd.f32 %v6756_v38, %v6755_v22  ;;  %v6758_v49 = vpop.f32.mrb[70].mxu1  ;;  %v6653_v59 = vpop.f32.mrb[75].mxu0 }
 0x355   : > { %v6654_v6 = vadd.f32 %v6653_v59, %v6652_v45  ;;  %v6759_v9 = vpop.f32.mrb[71].mxu1  ;;  %v7932_v59 = vld [vmem:[#allocation4 + $0x90] sm:$0xff]  }
 0x356   : > { %v8786_v1 = vadd.f32 %v6757_v46, %v6645_v23  ;;  %v6760_v13 = vadd.f32 %v6759_v9, %v6758_v49  ;;  %7694 = vmatmul.mubr.bf16.gmra.mrb[180].mxu0 %v2091_v61  ;;  %v7931_v49 = vld [vmem:[#allocation4 + $0xd0] sm:$0xff]  }
 0x357   : > { %7697 = vmatprep.mubr.bf16.mxu0 %v2092_v10  ;;  %7160 = vmatpush3.bf16.msra.mxu0 %v7930_v31 }
 0x358   : > { %v8788_v48 = vadd.f32 %v6760_v13, %v6648_v52  ;;  %v7927_v52 = vld [vmem:[#allocation4 + $0x68] sm:$0xff]   ;;  %7161 = vmatprep.subr.bf16.mxu0 %v7931_v49 }
 0x359   : > { %v6655_v26 = vpop.f32.mrb[76].mxu0  ;;  %7055 = vmatprep.subr.bf16.mxu1 %v7927_v52 }
 0x35a   : > { %v6761_v40 = vpop.f32.mrb[72].mxu1  ;;  %v6656_v47 = vpop.f32.mrb[77].mxu0  ;;  %7056 = vmatpush3.bf16.msra.mxu1 %v7929_v58 }
 0x35b   : > { %v6657_v55 = vadd.f32 %v6656_v47, %v6655_v26  ;;  %v6762_v0 = vpop.f32.mrb[73].mxu1  ;;  %v6658_v5 = vpop.f32.mrb[78].mxu0  ;;  %7162 = vmatpush3.bf16.msra.mxu0 %v7932_v59 }
 0x35c   : > { %v6763_v7 = vadd.f32 %v6762_v0, %v6761_v40  ;;  %v6764_v18 = vpop.f32.mrb[74].mxu1  ;;  %v6659_v33 = vpop.f32.mrb[79].mxu0 }
 0x35d   : > { %v6660_v23 = vadd.f32 %v6659_v33, %v6658_v5  ;;  %v6765_v63 = vpop.f32.mrb[75].mxu1  ;;  %v7934_v33 = vld [vmem:[#allocation4 + $0xd8] sm:$0xff]  }
 0x35e   : > { %v8790_v36 = vadd.f32 %v6763_v7, %v6651_v37  ;;  %v6766_v39 = vadd.f32 %v6765_v63, %v6764_v18  ;;  %7698 = vmatmul.mubr.bf16.gmra.mrb[184].mxu0 %v8664_v19  ;;  %v7933_v18 = vld [vmem:[#allocation4 + $0x70] sm:$0xff]   ;;  %7163 = vmatprep.subr.bf16.mxu0 %v7934_v33 }
 0x35f   : > { %7701 = vmatprep.mubr.bf16.mxu0 %v8750_v25  ;;  %7057 = vmatprep.subr.bf16.mxu1 %v7933_v18  ;;  %v7942_v18 = vld [vmem:[#allocation4 + $0xa8] sm:$0xff]  }
 0x360   : > { %v8794_v30 = vadd.f32 %v6766_v39, %v6654_v6  ;;  %v7936_v39 = vld [vmem:[#allocation4 + $0x98] sm:$0xff]  }
 0x361   : > { %v6661_v43 = vpop.f32.mrb[80].mxu0  ;;  %7164 = vmatpush3.bf16.msra.mxu0 %v7936_v39 }
 0x362   : > { %v6767_v50 = vpop.f32.mrb[76].mxu1  ;;  %v6662_v53 = vpop.f32.mrb[81].mxu0 }
 0x363   : > { %v6663_v22 = vadd.f32 %v6662_v53, %v6661_v43  ;;  %v6768_v19 = vpop.f32.mrb[77].mxu1  ;;  %v6664_v27 = vpop.f32.mrb[82].mxu0 }
 0x364   : > { %v6769_v34 = vadd.f32 %v6768_v19, %v6767_v50  ;;  %v6770_v15 = vpop.f32.mrb[78].mxu1  ;;  %v6665_v25 = vpop.f32.mrb[83].mxu0 }
 0x365   : > { %v6666_v37 = vadd.f32 %v6665_v25, %v6664_v27  ;;  %v6771_v38 = vpop.f32.mrb[79].mxu1 }
 0x366   : > { %v8796_v45 = vadd.f32 %v6769_v34, %v6657_v55  ;;  %v6772_v46 = vadd.f32 %v6771_v38, %v6770_v15  ;;  %7702 = vmatmul.mubr.bf16.gmra.mrb[188].mxu0 %v2095_v17  ;;  %v7937_v34 = vld [vmem:[#allocation4 + $0xe0] sm:$0xff]  }
 0x367   : > { %v7938_v15 = vld [vmem:[#allocation4 + $0xa0] sm:$0xff]   ;;  %7165 = vmatprep.subr.bf16.mxu0 %v7937_v34 }
 0x368   : > { %v8798_v61 = vadd.f32 %v6772_v46, %v6660_v23  ;;  %v7935_v23 = vld [vmem:[#allocation4 + $0x30] sm:$0xff]   ;;  %7166 = vmatpush3.bf16.msra.mxu0 %v7938_v15 }
 0x369   : > { %v6667_v6 = vpop.f32.mrb[84].mxu0  ;;  %7058 = vmatpush3.bf16.msra.mxu1 %v7935_v23 }
 0x36a   : > { %v6773_v9 = vpop.f32.mrb[80].mxu1  ;;  %v6668_v10 = vpop.f32.mrb[85].mxu0 }
 0x36b   : > { %v6669_v13 = vadd.f32 %v6668_v10, %v6667_v6  ;;  %v6774_v11 = vpop.f32.mrb[81].mxu1  ;;  %v6670_v14 = vpop.f32.mrb[86].mxu0 }
 0x36c   : > { %v6775_v26 = vadd.f32 %v6774_v11, %v6773_v9  ;;  %v6776_v40 = vpop.f32.mrb[82].mxu1  ;;  %v6671_v47 = vpop.f32.mrb[87].mxu0 }
 0x36d   : > { %v6672_v0 = vadd.f32 %v6671_v47, %v6670_v14  ;;  %v6777_v55 = vpop.f32.mrb[83].mxu1  ;;  %v7939_v47 = vld [vmem:[#allocation4 + $0x78] sm:$0xff]  }
 0x36e   : > { %v8800_v5 = vadd.f32 %v6775_v26, %v6663_v22  ;;  %v6778_v7 = vadd.f32 %v6777_v55, %v6776_v40  ;;  %v7940_v55 = vld [vmem:[#allocation4 + $0xe8] sm:$0xff]   ;;  %7059 = vmatprep.subr.bf16.mxu1 %v7939_v47 }
 0x36f   : > { %7167 = vmatprep.subr.bf16.mxu0 %v7940_v55 }
 0x370   : > { %v8802_v63 = vadd.f32 %v6778_v7, %v6666_v37  ;;  %7168 = vmatpush3.bf16.msra.mxu0 %v7942_v18 }
 0x371   : > { %v6673_v42 = vpop.f32.mrb[88].mxu0 }
 0x372   : > { %v6779_v51 = vpop.f32.mrb[84].mxu1  ;;  %v6674_v52 = vpop.f32.mrb[89].mxu0 }
 0x373   : > { %v6675_v56 = vadd.f32 %v6674_v52, %v6673_v42  ;;  %v6780_v58 = vpop.f32.mrb[85].mxu1  ;;  %v6676_v31 = vpop.f32.mrb[90].mxu0 }
 0x374   : > { %v6781_v43 = vadd.f32 %v6780_v58, %v6779_v51  ;;  %v6782_v50 = vpop.f32.mrb[86].mxu1  ;;  %v6677_v53 = vpop.f32.mrb[91].mxu0 }
 0x375   : > { %v6678_v17 = vadd.f32 %v6677_v53, %v6676_v31  ;;  %v6783_v22 = vpop.f32.mrb[87].mxu1 }
 0x376   : > { %v8804_v19 = vadd.f32 %v6781_v43, %v6669_v13  ;;  %v6784_v27 = vadd.f32 %v6783_v22, %v6782_v50 }
 0x378   : > { %v8806_v25 = vadd.f32 %v6784_v27, %v6672_v0  ;;  %v7941_v0 = vld [vmem:[#allocation4 + $0x38] sm:$0xff]  }
 0x379   : > { %v6679_v37 = vpop.f32.mrb[92].mxu0  ;;  %7060 = vmatpush3.bf16.msra.mxu1 %v7941_v0  ;;  %v7943_v0 = vld [vmem:[#allocation4 + $0xf0] sm:$0xff]  }
 0x37a   : > { %v6785_v38 = vpop.f32.mrb[88].mxu1  ;;  %v6680_v46 = vpop.f32.mrb[93].mxu0  ;;  %7169 = vmatprep.subr.bf16.mxu0 %v7943_v0 }
 0x37b   : > { %v6681_v49 = vadd.f32 %v6680_v46, %v6679_v37  ;;  %v6786_v59 = vpop.f32.mrb[89].mxu1  ;;  %v6682_v6 = vpop.f32.mrb[94].mxu0  ;;  %v3843_v46 = vld [vmem:[#allocation2 + $0x1] sm:$0xff] }
 0x37c   : > { %v6787_v9 = vadd.f32 %v6786_v59, %v6785_v38  ;;  %v6788_v10 = vpop.f32.mrb[90].mxu1  ;;  %v6683_v11 = vpop.f32.mrb[95].mxu0  ;;  %v3844_v59 = vld [vmem:[#allocation2 + $0x9] sm:$0xff] }
 0x37d   : > { %v6684_v14 = vadd.f32 %v6683_v11, %v6682_v6  ;;  %v6789_v26 = vpop.f32.mrb[91].mxu1  ;;  %v3875_v11 = vpack.c.bf16 %v3844_v59, %v3843_v46 }
 0x37e   : > { %v8808_v13 = vadd.f32 %v6787_v9, %v6675_v56  ;;  %v6790_v40 = vadd.f32 %v6789_v26, %v6788_v10 }
 0x37f   : > { %5107 = vmatprep.mubr.bf16.mxu1 %v3875_v11 }
 0x380   : > { %v8810_v7 = vadd.f32 %v6790_v40, %v6678_v17  ;;  %5108 = vmatmul.mubr.bf16.vlgmr.msra.gmra.mrb[160].mxu1 %v8763_v28 }
 0x381   : > { %v6813_v33 = vpop.f32.mrb[96].mxu0 }
 0x382   : > { %v6791_v23 = vpop.f32.mrb[92].mxu1  ;;  %v6814_v39 = vpop.f32.mrb[97].mxu0 }
 0x383   : > { %v6792_v42 = vpop.f32.mrb[93].mxu1  ;;  %v6815_v51 = vadd.f32 %v6814_v39, %v6813_v33  ;;  %v6816_v52 = vpop.f32.mrb[98].mxu0 }
 0x384   : > { %v6793_v58 = vadd.f32 %v6792_v42, %v6791_v23  ;;  %v6794_v56 = vpop.f32.mrb[94].mxu1  ;;  %v6817_v31 = vpop.f32.mrb[99].mxu0 }
 0x385   : > { %v3189_v43 = vadd.f32 %v6815_v51, %v8737_v3  ;;  %v6795_v50 = vpop.f32.mrb[95].mxu1  ;;  %v6818_v53 = vadd.f32 %v6817_v31, %v6816_v52 }
 0x386   : > { %v8813_v17 = vadd.f32 %v6793_v58, %v6681_v49  ;;  %v6796_v22 = vadd.f32 %v6795_v50, %v6794_v56  ;;  %v7945_v56 = vld [vmem:[#allocation4 + $0xf8] sm:$0xff]  }
 0x387   : > { %v3192_v27 = vadd.f32 %v6818_v53, %v8742_v24  ;;  %v7944_v24 = vld [vmem:[#allocation4 + $0xb0] sm:$0xff]  }
 0x388   : > { %v8816_v34 = vadd.f32 %v6796_v22, %v6684_v14  ;;  %7170 = vmatpush3.bf16.msra.mxu0 %v7944_v24  ;;  %v7949_v24 = vld [vmem:[#allocation4 + $0x1c0] sm:$0xff]  }
 0x389   : > { %v6819_v15 = vpop.f32.mrb[100].mxu0  ;;  %7171 = vmatprep.subr.bf16.mxu0 %v7945_v56 }
 0x38a   : > { %v6925_v37 = vpop.f32.mrb[96].mxu1  ;;  %v6820_v38 = vpop.f32.mrb[101].mxu0 }
 0x38b   : > { %v6821_v6 = vadd.f32 %v6820_v38, %v6819_v15  ;;  %v6926_v9 = vpop.f32.mrb[97].mxu1  ;;  %v6822_v10 = vpop.f32.mrb[102].mxu0 }
 0x38c   : > { %v6927_v26 = vadd.f32 %v6926_v9, %v6925_v37  ;;  %v6928_v3 = vpop.f32.mrb[98].mxu1  ;;  %v6823_v40 = vpop.f32.mrb[103].mxu0 }
 0x38d   : > { %v3197_v49 = vadd.f32 %v6821_v6, %v8744_v12  ;;  %v6824_v47 = vadd.f32 %v6823_v40, %v6822_v10  ;;  %v6929_v55 = vpop.f32.mrb[99].mxu1 }
 0x38e   : > { %v6930_v14 = vadd.f32 %v6929_v55, %v6928_v3  ;;  %v8819_v18 = vadd.f32 %v6927_v26, %v3189_v43  ;;  %v7947_v43 = vld [vmem:[#allocation4 + $0xb8] sm:$0xff]  }
 0x38f   : > { %v3200_v33 = vadd.f32 %v6824_v47, %v8748_v41  ;;  %v7946_v41 = vld [vmem:[#allocation4 + $0x140] sm:$0xff]   ;;  %7172 = vmatpush3.bf16.msra.mxu0 %v7947_v43 }
 0x390   : > { %v8823_v23 = vadd.f32 %v6930_v14, %v3192_v27  ;;  %v7948_v27 = vld [vmem:[#allocation4 + $0x100] sm:$0xff]   ;;  %7269 = vmatprep.subr.bf16.mxu1 %v7946_v41  ;;  %7381 = vmatprep.subr.bf16.mxu0 %v7949_v24 }
 0x391   : > { %v6825_v39 = vpop.f32.mrb[104].mxu0  ;;  %7270 = vmatpush3.bf16.msra.mxu1 %v7948_v27 }
 0x392   : > { %v6931_v42 = vpop.f32.mrb[100].mxu1  ;;  %v6826_v51 = vpop.f32.mrb[105].mxu0 }
 0x393   : > { %v6827_v12 = vadd.f32 %v6826_v51, %v6825_v39  ;;  %v6932_v52 = vpop.f32.mrb[101].mxu1  ;;  %v6828_v58 = vpop.f32.mrb[106].mxu0 }
 0x394   : > { %v6933_v31 = vadd.f32 %v6932_v52, %v6931_v42  ;;  %v6934_v50 = vpop.f32.mrb[102].mxu1  ;;  %v6829_v53 = vpop.f32.mrb[107].mxu0 }
 0x395   : > { %v3205_v22 = vadd.f32 %v6827_v12, %v8752_v32  ;;  %v6830_v28 = vadd.f32 %v6829_v53, %v6828_v58  ;;  %v6935_v15 = vpop.f32.mrb[103].mxu1 }
 0x396   : > { %v6936_v37 = vadd.f32 %v6935_v15, %v6934_v50  ;;  %v8826_v38 = vadd.f32 %v6933_v31, %v3197_v49  ;;  %v7952_v15 = vld [vmem:[#allocation4 + $0x108] sm:$0xff]  }
 0x397   : > { %v3208_v46 = vadd.f32 %v6830_v28, %v8756_v54 }
 0x398   : > { %v8829_v59 = vadd.f32 %v6936_v37, %v3200_v33 }
 0x399   : > { %v6831_v6 = vpop.f32.mrb[108].mxu0 }
 0x39a   : > { %v6937_v9 = vpop.f32.mrb[104].mxu1  ;;  %v6832_v10 = vpop.f32.mrb[109].mxu0 }
 0x39b   : > { %v6833_v11 = vadd.f32 %v6832_v10, %v6831_v6  ;;  %v6938_v32 = vpop.f32.mrb[105].mxu1  ;;  %v6834_v26 = vpop.f32.mrb[110].mxu0 }
 0x39c   : > { %v6939_v3 = vadd.f32 %v6938_v32, %v6937_v9  ;;  %v6940_v40 = vpop.f32.mrb[106].mxu1  ;;  %v6835_v47 = vpop.f32.mrb[111].mxu0 }
 0x39d   : > { %v3213_v55 = vadd.f32 %v6833_v11, %v8758_v4  ;;  %v6836_v49 = vadd.f32 %v6835_v47, %v6834_v26  ;;  %v6941_v0 = vpop.f32.mrb[107].mxu1 }
 0x39e   : > { %v6942_v14 = vadd.f32 %v6941_v0, %v6940_v40  ;;  %v8832_v54 = vadd.f32 %v6939_v3, %v3205_v22  ;;  %v7951_v22 = vld [vmem:[#allocation4 + $0x148] sm:$0xff]  }
 0x39f   : > { %v3216_v33 = vadd.f32 %v6836_v49, %v8761_v8  ;;  %7271 = vmatprep.subr.bf16.mxu1 %v7951_v22 }
 0x3a0   : > { %v8835_v39 = vadd.f32 %v6942_v14, %v3208_v46  ;;  %7272 = vmatpush3.bf16.msra.mxu1 %v7952_v15 }
 0x3a1   : > { %v6837_v42 = vpop.f32.mrb[112].mxu0 }
 0x3a2   : > { %v6943_v51 = vpop.f32.mrb[108].mxu1  ;;  %v6838_v12 = vpop.f32.mrb[113].mxu0 }
 0x3a3   : > { %v6839_v52 = vadd.f32 %v6838_v12, %v6837_v42  ;;  %v6944_v58 = vpop.f32.mrb[109].mxu1  ;;  %v6840_v56 = vpop.f32.mrb[114].mxu0 }
 0x3a4   : > { %v6945_v31 = vadd.f32 %v6944_v58, %v6943_v51  ;;  %v6946_v50 = vpop.f32.mrb[110].mxu1  ;;  %v6841_v4 = vpop.f32.mrb[115].mxu0 }
 0x3a5   : > { %v3221_v53 = vadd.f32 %v6839_v52, %v8765_v57  ;;  %v6842_v43 = vadd.f32 %v6841_v4, %v6840_v56  ;;  %v6947_v28 = vpop.f32.mrb[111].mxu1 }
 0x3a6   : > { %v6948_v41 = vadd.f32 %v6947_v28, %v6946_v50  ;;  %v8838_v8 = vadd.f32 %v6945_v31, %v3213_v55 }
 0x3a7   : > { %v3224_v27 = vadd.f32 %v6842_v43, %v8768_v62  ;;  %v7955_v43 = vld [vmem:[#allocation4 + $0x150] sm:$0xff]  }
 0x3a8   : > { %v8841_v37 = vadd.f32 %v6948_v41, %v3216_v33  ;;  %7273 = vmatprep.subr.bf16.mxu1 %v7955_v43 }
 0x3a9   : > { %v6843_v46 = vpop.f32.mrb[116].mxu0 }
 0x3aa   : > { %v6949_v6 = vpop.f32.mrb[112].mxu1  ;;  %v6844_v9 = vpop.f32.mrb[117].mxu0 }
 0x3ab   : > { %v6845_v10 = vadd.f32 %v6844_v9, %v6843_v46  ;;  %v6950_v11 = vpop.f32.mrb[113].mxu1  ;;  %v6846_v32 = vpop.f32.mrb[118].mxu0 }
 0x3ac   : > { %v6951_v57 = vadd.f32 %v6950_v11, %v6949_v6  ;;  %v6952_v26 = vpop.f32.mrb[114].mxu1  ;;  %v6847_v3 = vpop.f32.mrb[119].mxu0 }
 0x3ad   : > { %v3229_v40 = vadd.f32 %v6845_v10, %v8770_v16  ;;  %v6848_v47 = vadd.f32 %v6847_v3, %v6846_v32  ;;  %v6953_v55 = vpop.f32.mrb[115].mxu1 }
 0x3ae   : > { %v6954_v49 = vadd.f32 %v6953_v55, %v6952_v26  ;;  %v8844_v0 = vadd.f32 %v6951_v57, %v3221_v53  ;;  %v7956_v53 = vld [vmem:[#allocation4 + $0x110] sm:$0xff]  }
 0x3af   : > { %v3232_v62 = vadd.f32 %v6848_v47, %v8772_v21  ;;  %7274 = vmatpush3.bf16.msra.mxu1 %v7956_v53 }
 0x3b0   : > { %v8847_v24 = vadd.f32 %v6954_v49, %v3224_v27 }
 0x3b1   : > { %v6849_v14 = vpop.f32.mrb[120].mxu0 }
 0x3b2   : > { %v6955_v33 = vpop.f32.mrb[116].mxu1  ;;  %v6850_v42 = vpop.f32.mrb[121].mxu0 }
 0x3b3   : > { %v6851_v51 = vadd.f32 %v6850_v42, %v6849_v14  ;;  %v6956_v12 = vpop.f32.mrb[117].mxu1  ;;  %v6852_v52 = vpop.f32.mrb[122].mxu0 }
 0x3b4   : > { %v6957_v58 = vadd.f32 %v6956_v12, %v6955_v33  ;;  %v6958_v56 = vpop.f32.mrb[118].mxu1  ;;  %v6853_v31 = vpop.f32.mrb[123].mxu0 }
 0x3b5   : > { %v3237_v16 = vadd.f32 %v6851_v51, %v8774_v60  ;;  %v6854_v50 = vadd.f32 %v6853_v31, %v6852_v52  ;;  %v6959_v4 = vpop.f32.mrb[119].mxu1 }
 0x3b6   : > { %v6960_v28 = vadd.f32 %v6959_v4, %v6958_v56  ;;  %v8850_v22 = vadd.f32 %v6957_v58, %v3229_v40 }
 0x3b7   : > { %v3240_v21 = vadd.f32 %v6854_v50, %v8776_v29  ;;  %v7959_v50 = vld [vmem:[#allocation4 + $0x158] sm:$0xff]  }
 0x3b8   : > { %v8853_v15 = vadd.f32 %v6960_v28, %v3232_v62  ;;  %7275 = vmatprep.subr.bf16.mxu1 %v7959_v50 }
 0x3b9   : > { %v6855_v41 = vpop.f32.mrb[124].mxu0 }
 0x3ba   : > { %v6961_v27 = vpop.f32.mrb[120].mxu1  ;;  %v6856_v46 = vpop.f32.mrb[125].mxu0 }
 0x3bb   : > { %v6857_v6 = vadd.f32 %v6856_v46, %v6855_v41  ;;  %v6962_v9 = vpop.f32.mrb[121].mxu1  ;;  %v6858_v10 = vpop.f32.mrb[126].mxu0 }
 0x3bc   : > { %v6963_v60 = vadd.f32 %v6962_v9, %v6961_v27  ;;  %v6964_v11 = vpop.f32.mrb[122].mxu1  ;;  %v6859_v32 = vpop.f32.mrb[127].mxu0 }
 0x3bd   : > { %v3245_v57 = vadd.f32 %v6857_v6, %v8778_v2  ;;  %v6860_v26 = vadd.f32 %v6859_v32, %v6858_v10  ;;  %v6965_v3 = vpop.f32.mrb[123].mxu1 }
 0x3be   : > { %v6966_v40 = vadd.f32 %v6965_v3, %v6964_v11  ;;  %v8856_v47 = vadd.f32 %v6963_v60, %v3237_v16  ;;  %v7960_v16 = vld [vmem:[#allocation4 + $0x118] sm:$0xff]  }
 0x3bf   : > { %v3248_v29 = vadd.f32 %v6860_v26, %v8780_v35  ;;  %7276 = vmatpush3.bf16.msra.mxu1 %v7960_v16 }
 0x3c0   : > { %v8859_v55 = vadd.f32 %v6966_v40, %v3240_v21  ;;  %v7963_v21 = vld [vmem:[#allocation4 + $0x160] sm:$0xff]  }
 0x3c1   : > { %v6861_v49 = vpop.f32.mrb[128].mxu0  ;;  %7277 = vmatprep.subr.bf16.mxu1 %v7963_v21 }
 0x3c2   : > { %v6967_v62 = vpop.f32.mrb[124].mxu1  ;;  %v6862_v14 = vpop.f32.mrb[129].mxu0 }
 0x3c3   : > { %v6863_v33 = vadd.f32 %v6862_v14, %v6861_v49  ;;  %v6968_v42 = vpop.f32.mrb[125].mxu1  ;;  %v6864_v51 = vpop.f32.mrb[130].mxu0 }
 0x3c4   : > { %v6969_v12 = vadd.f32 %v6968_v42, %v6967_v62  ;;  %v6970_v52 = vpop.f32.mrb[126].mxu1  ;;  %v6865_v58 = vpop.f32.mrb[131].mxu0 }
 0x3c5   : > { %v3253_v2 = vadd.f32 %v6863_v33, %v8782_v20  ;;  %v6866_v56 = vadd.f32 %v6865_v58, %v6864_v51  ;;  %v6971_v31 = vpop.f32.mrb[127].mxu1 }
 0x3c6   : > { %v6972_v4 = vadd.f32 %v6971_v31, %v6970_v52  ;;  %v8862_v43 = vadd.f32 %v6969_v12, %v3245_v57 }
 0x3c7   : > { %v3256_v35 = vadd.f32 %v6866_v56, %v8784_v44 }
 0x3c8   : > { %v8865_v53 = vadd.f32 %v6972_v4, %v3248_v29  ;;  %v7964_v29 = vld [vmem:[#allocation4 + $0x120] sm:$0xff]  }
 0x3c9   : > { %v6867_v28 = vpop.f32.mrb[132].mxu0  ;;  %7278 = vmatpush3.bf16.msra.mxu1 %v7964_v29 }
 0x3ca   : > { %v6973_v41 = vpop.f32.mrb[128].mxu1  ;;  %v6868_v27 = vpop.f32.mrb[133].mxu0 }
 0x3cb   : > { %v6869_v46 = vadd.f32 %v6868_v27, %v6867_v28  ;;  %v6974_v6 = vpop.f32.mrb[129].mxu1  ;;  %v6870_v20 = vpop.f32.mrb[134].mxu0 }
 0x3cc   : > { %v6975_v9 = vadd.f32 %v6974_v6, %v6973_v41  ;;  %v6976_v10 = vpop.f32.mrb[130].mxu1  ;;  %v6871_v60 = vpop.f32.mrb[135].mxu0 }
 0x3cd   : > { %v3261_v11 = vadd.f32 %v6869_v46, %v8786_v1  ;;  %v6872_v32 = vadd.f32 %v6871_v60, %v6870_v20  ;;  %v6977_v57 = vpop.f32.mrb[131].mxu1 }
 0x3ce   : > { %v6978_v44 = vadd.f32 %v6977_v57, %v6976_v10  ;;  %v8868_v26 = vadd.f32 %v6975_v9, %v3253_v2 }
 0x3cf   : > { %v3264_v3 = vadd.f32 %v6872_v32, %v8788_v48 }
 0x3d0   : > { %v8871_v40 = vadd.f32 %v6978_v44, %v3256_v35  ;;  %v7967_v35 = vld [vmem:[#allocation4 + $0x168] sm:$0xff]  }
 0x3d1   : > { %v6873_v49 = vpop.f32.mrb[136].mxu0  ;;  %7279 = vmatprep.subr.bf16.mxu1 %v7967_v35  ;;  %v7968_v44 = vld [vmem:[#allocation4 + $0x128] sm:$0xff]  }
 0x3d2   : > { %v6979_v62 = vpop.f32.mrb[132].mxu1  ;;  %v6874_v14 = vpop.f32.mrb[137].mxu0  ;;  %7280 = vmatpush3.bf16.msra.mxu1 %v7968_v44 }
 0x3d3   : > { %v6875_v33 = vadd.f32 %v6874_v14, %v6873_v49  ;;  %v6980_v42 = vpop.f32.mrb[133].mxu1  ;;  %v6876_v51 = vpop.f32.mrb[138].mxu0 }
 0x3d4   : > { %v6981_v12 = vadd.f32 %v6980_v42, %v6979_v62  ;;  %v6982_v52 = vpop.f32.mrb[134].mxu1  ;;  %v6877_v1 = vpop.f32.mrb[139].mxu0 }
 0x3d5   : > { %v3269_v58 = vadd.f32 %v6875_v33, %v8790_v36  ;;  %v6878_v56 = vadd.f32 %v6877_v1, %v6876_v51  ;;  %v6983_v2 = vpop.f32.mrb[135].mxu1 }
 0x3d6   : > { %v6984_v31 = vadd.f32 %v6983_v2, %v6982_v52  ;;  %v8874_v50 = vadd.f32 %v6981_v12, %v3261_v11 }
 0x3d7   : > { %v3272_v48 = vadd.f32 %v6878_v56, %v8794_v30 }
 0x3d8   : > { %v8877_v16 = vadd.f32 %v6984_v31, %v3264_v3 }
 0x3d9   : > { %v6879_v4 = vpop.f32.mrb[140].mxu0 }
 0x3da   : > { %v6985_v28 = vpop.f32.mrb[136].mxu1  ;;  %v6880_v21 = vpop.f32.mrb[141].mxu0 }
 0x3db   : > { %v6881_v41 = vadd.f32 %v6880_v21, %v6879_v4  ;;  %v6986_v27 = vpop.f32.mrb[137].mxu1  ;;  %v6882_v46 = vpop.f32.mrb[142].mxu0 }
 0x3dc   : > { %v6987_v6 = vadd.f32 %v6986_v27, %v6985_v28  ;;  %v6988_v20 = vpop.f32.mrb[138].mxu1  ;;  %v6883_v36 = vpop.f32.mrb[143].mxu0 }
 0x3dd   : > { %v3277_v9 = vadd.f32 %v6881_v41, %v8796_v45  ;;  %v6884_v10 = vadd.f32 %v6883_v36, %v6882_v46  ;;  %v6989_v60 = vpop.f32.mrb[139].mxu1 }
 0x3de   : > { %v6990_v11 = vadd.f32 %v6989_v60, %v6988_v20  ;;  %v8880_v32 = vadd.f32 %v6987_v6, %v3269_v58 }
 0x3df   : > { %v3280_v30 = vadd.f32 %v6884_v10, %v8798_v61 }
 0x3e0   : > { %v8883_v57 = vadd.f32 %v6990_v11, %v3272_v48  ;;  %v7971_v48 = vld [vmem:[#allocation4 + $0x170] sm:$0xff]  }
 0x3e1   : > { %v6885_v3 = vpop.f32.mrb[144].mxu0  ;;  %7281 = vmatprep.subr.bf16.mxu1 %v7971_v48  ;;  %v7972_v11 = vld [vmem:[#allocation4 + $0x130] sm:$0xff]  }
 0x3e2   : > { %v6991_v29 = vpop.f32.mrb[140].mxu1  ;;  %v6886_v49 = vpop.f32.mrb[145].mxu0  ;;  %7282 = vmatpush3.bf16.msra.mxu1 %v7972_v11  ;;  %v8912_v11 = vld [vmem:[%s9515_s4] ss:$0 sm:$0xff] }
 0x3e3   : > { %v6887_v62 = vadd.f32 %v6886_v49, %v6885_v3  ;;  %v6992_v14 = vpop.f32.mrb[141].mxu1  ;;  %v6888_v33 = vpop.f32.mrb[146].mxu0 }
 0x3e4   : > { %v6993_v42 = vadd.f32 %v6992_v14, %v6991_v29  ;;  %v6994_v51 = vpop.f32.mrb[142].mxu1  ;;  %v6889_v45 = vpop.f32.mrb[147].mxu0 }
 0x3e5   : > { %v3285_v12 = vadd.f32 %v6887_v62, %v8800_v5  ;;  %v6890_v52 = vadd.f32 %v6889_v45, %v6888_v33  ;;  %v6995_v1 = vpop.f32.mrb[143].mxu1 }
 0x3e6   : > { %v6996_v58 = vadd.f32 %v6995_v1, %v6994_v51  ;;  %v8886_v56 = vadd.f32 %v6993_v42, %v3277_v9 }
 0x3e7   : > { %v3288_v61 = vadd.f32 %v6890_v52, %v8802_v63 }
 0x3e8   : > { %v8889_v2 = vadd.f32 %v6996_v58, %v3280_v30 }
 0x3e9   : > { %v6891_v31 = vpop.f32.mrb[148].mxu0 }
 0x3ea   : > { %v6997_v4 = vpop.f32.mrb[144].mxu1  ;;  %v6892_v35 = vpop.f32.mrb[149].mxu0 }
 0x3eb   : > { %v6893_v28 = vadd.f32 %v6892_v35, %v6891_v31  ;;  %v6998_v21 = vpop.f32.mrb[145].mxu1  ;;  %v6894_v41 = vpop.f32.mrb[150].mxu0 }
 0x3ec   : > { %v6999_v27 = vadd.f32 %v6998_v21, %v6997_v4  ;;  %v7000_v46 = vpop.f32.mrb[146].mxu1  ;;  %v6895_v5 = vpop.f32.mrb[151].mxu0 }
 0x3ed   : > { %v3293_v6 = vadd.f32 %v6893_v28, %v8804_v19  ;;  %v6896_v20 = vadd.f32 %v6895_v5, %v6894_v41  ;;  %v7001_v36 = vpop.f32.mrb[147].mxu1 }
 0x3ee   : > { %v7002_v9 = vadd.f32 %v7001_v36, %v7000_v46  ;;  %v8892_v10 = vadd.f32 %v6999_v27, %v3285_v12 }
 0x3ef   : > { %v3296_v63 = vadd.f32 %v6896_v20, %v8806_v25 }
 0x3f0   : > { %v8895_v60 = vadd.f32 %v7002_v9, %v3288_v61  ;;  %v7975_v61 = vld [vmem:[#allocation4 + $0x178] sm:$0xff]  }
 0x3f1   : > { %v6897_v30 = vpop.f32.mrb[152].mxu0  ;;  %7283 = vmatprep.subr.bf16.mxu1 %v7975_v61  ;;  %v7976_v9 = vld [vmem:[#allocation4 + $0x138] sm:$0xff]  }
 0x3f2   : > { %v7003_v44 = vpop.f32.mrb[148].mxu1  ;;  %v6898_v3 = vpop.f32.mrb[153].mxu0  ;;  %7284 = vmatpush3.bf16.msra.mxu1 %v7976_v9 }
 0x3f3   : > { %v6899_v29 = vadd.f32 %v6898_v3, %v6897_v30  ;;  %v7004_v49 = vpop.f32.mrb[149].mxu1  ;;  %v6900_v62 = vpop.f32.mrb[154].mxu0  ;;  %v8918_v3 = vld [vmem:[%s9516_s5] ss:$0 sm:$0xff] }
 0x3f4   : > { %v7005_v14 = vadd.f32 %v7004_v49, %v7003_v44  ;;  %v7006_v33 = vpop.f32.mrb[150].mxu1  ;;  %v6901_v19 = vpop.f32.mrb[155].mxu0 }
 0x3f5   : > { %v3301_v42 = vadd.f32 %v6899_v29, %v8808_v13  ;;  %v6902_v51 = vadd.f32 %v6901_v19, %v6900_v62  ;;  %v7007_v45 = vpop.f32.mrb[151].mxu1 }
 0x3f6   : > { %v7008_v12 = vadd.f32 %v7007_v45, %v7006_v33  ;;  %v8898_v52 = vadd.f32 %v7005_v14, %v3293_v6 }
 0x3f7   : > { %v3304_v25 = vadd.f32 %v6902_v51, %v8810_v7 }
 0x3f8   : > { %v8901_v1 = vadd.f32 %v7008_v12, %v3296_v63 }
 0x3f9   : > { %v6903_v58 = vpop.f32.mrb[156].mxu0 }
 0x3fa   : > { %v7009_v31 = vpop.f32.mrb[152].mxu1  ;;  %v6904_v48 = vpop.f32.mrb[157].mxu0 }
 0x3fb   : > { %v6905_v4 = vadd.f32 %v6904_v48, %v6903_v58  ;;  %v7010_v35 = vpop.f32.mrb[153].mxu1  ;;  %v6906_v28 = vpop.f32.mrb[158].mxu0 }
 0x3fc   : > { %v7011_v21 = vadd.f32 %v7010_v35, %v7009_v31  ;;  %v7012_v41 = vpop.f32.mrb[154].mxu1  ;;  %v6907_v13 = vpop.f32.mrb[159].mxu0 }
 0x3fd   : > { %v3309_v27 = vadd.f32 %v6905_v4, %v8813_v17  ;;  %v6908_v46 = vadd.f32 %v6907_v13, %v6906_v28  ;;  %v7013_v5 = vpop.f32.mrb[155].mxu1 }
 0x3fe   : > { %v7014_v6 = vadd.f32 %v7013_v5, %v7012_v41  ;;  %v8904_v20 = vadd.f32 %v7011_v21, %v3301_v42  ;;  %v8935_v21 = vld [vmem:[#allocation4 + $0x200] sm:$0xff]  }
 0x3ff   : > { %v3312_v7 = vadd.f32 %v6908_v46, %v8816_v34  ;;  %7753 = vmatprep.subr.bf16.mxu1 %v8935_v21 }
 0x400   : > { %v8907_v36 = vadd.f32 %v7014_v6, %v3304_v25 }
 0x401   : > { %v7675_v63 = vpop.f32.mrb[160].mxu0 }
 0x402   : > { %v7015_v30 = vpop.f32.mrb[156].mxu1  ;;  %v3519_v44 = vadd.f32 %v7675_v63, %v8826_v38  ;;  %v3510_v17 = vpop.f32.mrb[161].mxu0 }
 0x403   : > { %v7016_v34 = vpop.f32.mrb[157].mxu1  ;;  %v3511_v29 = vadd.f32 %v3510_v17, %v8819_v18  ;;  %v7676_v49 = vpop.f32.mrb[162].mxu0 }
 0x404   : > { %v3646_v62 = vmul.f32 %v8912_v11, %v3519_v44  ;;  %v7017_v14 = vadd.f32 %v7016_v34, %v7015_v30  ;;  %v7018_v33 = vpop.f32.mrb[158].mxu1  ;;  %v3522_v19 = vadd.f32 %v7676_v49, %v8829_v59  ;;  %v3513_v42 = vpop.f32.mrb[163].mxu0 }
 0x405   : > { %v3644_v38 = vmul.f32 %v8912_v11, %v3511_v29  ;;  %v7019_v51 = vpop.f32.mrb[159].mxu1  ;;  %v3514_v45 = vadd.f32 %v3513_v42, %v8823_v23  ;;  %v3907_v42 = vld [vmem:[#allocation2 + $0x2] sm:$0xff] }
 0x406   : > { %v3685_v12 = vadd.f32 %v8918_v3, %v3646_v62  ;;  %v3647_v25 = vmul.f32 %v8912_v11, %v3522_v19  ;;  %v7020_v58 = vadd.f32 %v7019_v51, %v7018_v33  ;;  %v8927_v61 = vadd.f32 %v7017_v14, %v3309_v27 }
 0x407   : > { %v3683_v18 = vadd.f32 %v8918_v3, %v3644_v38  ;;  %v3645_v31 = vmul.f32 %v8912_v11, %v3514_v45  ;;  %v3908_v38 = vld [vmem:[#allocation2 + $0xa] sm:$0xff] }
 0x408   : > { %v3717_v48 = vmax.f32 %v3685_v12, 0.0  ;;  %v3686_v59 = vadd.f32 %v8918_v3, %v3647_v25  ;;  %v8932_v4 = vadd.f32 %v7020_v58, %v3312_v7 }
 0x409   : > { %v3715_v35 = vmax.f32 %v3683_v18, 0.0  ;;  %v3684_v28 = vadd.f32 %v8918_v3, %v3645_v31  ;;  %v7679_v23 = vpop.f32.mrb[164].mxu0 }
 0x40a   : > { %3749 = vst [vmem:[#allocation2 + $0x31] sm:$0xff] %v3717_v48  ;;  %v3718_v41 = vmax.f32 %v3686_v59, 0.0  ;;  %v3535_v13 = vadd.f32 %v7679_v23, %v8838_v8  ;;  %v3526_v27 = vpop.f32.mrb[165].mxu0 }
 0x40b   : > { %3747 = vst [vmem:[#allocation2 + $0x19] sm:$0xff] %v3715_v35  ;;  %v3716_v46 = vmax.f32 %v3684_v28, 0.0  ;;  %v3527_v5 = vadd.f32 %v3526_v27, %v8832_v54  ;;  %v7680_v6 = vpop.f32.mrb[166].mxu0  ;;  %v3939_v28 = vpack.c.bf16 %v3908_v38, %v3907_v42  ;;  %v7950_v27 = vld [vmem:[#allocation4 + $0x180] sm:$0xff]  }
 0x40c   : > { %3750 = vst [vmem:[#allocation2 + $0x39] sm:$0xff] %v3718_v41  ;;  %v3650_v7 = vmul.f32 %v8912_v11, %v3535_v13  ;;  %v3538_v9 = vadd.f32 %v7680_v6, %v8841_v37  ;;  %v3529_v63 = vpop.f32.mrb[167].mxu0  ;;  %v3877_v30 = vpack.c.bf16 %v3718_v41, %v3717_v48 }
 0x40d   : > { %3748 = vst [vmem:[#allocation2 + $0x21] sm:$0xff] %v3716_v46  ;;  %v3648_v44 = vmul.f32 %v8912_v11, %v3527_v5  ;;  %v3530_v8 = vadd.f32 %v3529_v63, %v8835_v39  ;;  %v3876_v17 = vpack.c.bf16 %v3716_v46, %v3715_v35 }
 0x40e   : > { %v3689_v34 = vadd.f32 %v8918_v3, %v3650_v7  ;;  %v3651_v54 = vmul.f32 %v8912_v11, %v3538_v9  ;;  %v7953_v7 = vld [vmem:[#allocation4 + $0x1c8] sm:$0xff]  }
 0x40f   : > { %v3687_v29 = vadd.f32 %v8918_v3, %v3648_v44  ;;  %v3649_v49 = vmul.f32 %v8912_v11, %v3530_v8  ;;  %5115 = vmatprep.mubr.bf16.mxu1 %v3876_v17 }
 0x410   : > { %v3721_v62 = vmax.f32 %v3689_v34, 0.0  ;;  %v3690_v37 = vadd.f32 %v8918_v3, %v3651_v54 }
 0x411   : > { %v3719_v14 = vmax.f32 %v3687_v29, 0.0  ;;  %v3688_v33 = vadd.f32 %v8918_v3, %v3649_v49  ;;  %v7683_v19 = vpop.f32.mrb[168].mxu0  ;;  %v3973_v5 = vld [vmem:[#allocation2 + $0x30] sm:$0xff]  ;;  %v7954_v29 = vld [vmem:[#allocation4 + $0x188] sm:$0xff]  }
 0x412   : > { %3753 = vst [vmem:[#allocation2 + $0x61] sm:$0xff] %v3721_v62  ;;  %v3722_v39 = vmax.f32 %v3690_v37, 0.0  ;;  %v3551_v51 = vadd.f32 %v7683_v19, %v8850_v22  ;;  %v3542_v45 = vpop.f32.mrb[169].mxu0  ;;  %v3971_v59 = vld [vmem:[#allocation2 + $0x18] sm:$0xff]  ;;  %v7957_v19 = vld [vmem:[#allocation4 + $0x1d0] sm:$0xff]  }
 0x413   : > { %3751 = vst [vmem:[#allocation2 + $0x49] sm:$0xff] %v3719_v14  ;;  %v3720_v12 = vmax.f32 %v3688_v33, 0.0  ;;  %v3543_v25 = vadd.f32 %v3542_v45, %v8844_v0  ;;  %v7684_v58 = vpop.f32.mrb[170].mxu0  ;;  %v3974_v23 = vld [vmem:[#allocation2 + $0x38] sm:$0xff] }
 0x414   : > { %3754 = vst [vmem:[#allocation2 + $0x69] sm:$0xff] %v3722_v39  ;;  %v3654_v18 = vmul.f32 %v8912_v11, %v3551_v51  ;;  %v3554_v31 = vadd.f32 %v7684_v58, %v8853_v15  ;;  %v3545_v48 = vpop.f32.mrb[171].mxu0  ;;  %v3972_v35 = vld [vmem:[#allocation2 + $0x20] sm:$0xff]  ;;  %v8958_v15 = vpack.c.bf16 %v3722_v39, %v3721_v62  ;;  %v8962_v44 = vpack.c.bf16 %v3974_v23, %v3973_v5 }
 0x415   : > { %3752 = vst [vmem:[#allocation2 + $0x51] sm:$0xff] %v3720_v12  ;;  %v3652_v41 = vmul.f32 %v8912_v11, %v3543_v25  ;;  %v3546_v22 = vadd.f32 %v3545_v48, %v8847_v24  ;;  %v4003_v13 = vpack.c.bf16 %v3972_v35, %v3971_v59  ;;  %v3878_v6 = vpack.c.bf16 %v3720_v12, %v3719_v14  ;;  %v3909_v14 = vld [vmem:[#allocation2 + $0x1a] sm:$0xff]  ;;  %v3910_v33 = vld [vmem:[#allocation2 + $0x22] sm:$0xff] }
 0x416   : > { %v3693_v0 = vadd.f32 %v8918_v3, %v3654_v18  ;;  %v3655_v46 = vmul.f32 %v8912_v11, %v3554_v31  ;;  %v8973_v58 = vpack.c.bf16 %v3910_v33, %v3909_v14  ;;  %v7958_v18 = vld [vmem:[#allocation4 + $0x190] sm:$0xff]   ;;  %v7961_v35 = vld [vmem:[#allocation4 + $0x1d8] sm:$0xff]   ;;  %v7966_v33 = vld [vmem:[#allocation4 + $0x1a0] sm:$0xff]  }
 0x417   : > { %v3691_v9 = vadd.f32 %v8918_v3, %v3652_v41  ;;  %v3653_v63 = vmul.f32 %v8912_v11, %v3546_v22  ;;  %5268 = vmatprep.mubr.bf16.mxu0 %v4003_v13  ;;  %5116 = vmatmul.mubr.bf16.gmra.mrb[164].mxu1 %v4003_v13 }
 0x418   : > { %v3725_v24 = vmax.f32 %v3693_v0, 0.0  ;;  %v3694_v8 = vadd.f32 %v8918_v3, %v3655_v46  ;;  %5269 = vmatmul.mubr.bf16.vlgmr.msra.gmra.mrb[192].mxu0 %v3939_v28  ;;  %5123 = vmatprep.mubr.bf16.mxu1 %v3877_v30  ;;  %v7962_v46 = vld [vmem:[#allocation4 + $0x198] sm:$0xff]  }
 0x419   : > { %v3723_v17 = vmax.f32 %v3691_v9, 0.0  ;;  %v3692_v34 = vadd.f32 %v8918_v3, %v3653_v63  ;;  %7382 = vmatpush3.bf16.msra.mxu0 %v7950_v27  ;;  %v7687_v54 = vpop.f32.mrb[172].mxu0  ;;  %5276 = vmatprep.mubr.bf16.mxu0 %v8962_v44  ;;  %v3911_v63 = vld [vmem:[#allocation2 + $0x32] sm:$0xff] }
 0x41a   : > { %3757 = vst [vmem:[#allocation2 + $0x91] sm:$0xff] %v3725_v24  ;;  %v3726_v49 = vmax.f32 %v3694_v8, 0.0  ;;  %v3567_v62 = vadd.f32 %v7687_v54, %v8862_v43  ;;  %v3558_v37 = vpop.f32.mrb[173].mxu0  ;;  %7383 = vmatprep.subr.bf16.mxu0 %v7953_v7  ;;  %v3975_v48 = vld [vmem:[#allocation2 + $0x48] sm:$0xff]  ;;  %v7965_v8 = vld [vmem:[#allocation4 + $0x1e0] sm:$0xff]  }
 0x41b   : > { %3755 = vst [vmem:[#allocation2 + $0x79] sm:$0xff] %v3723_v17  ;;  %v3724_v42 = vmax.f32 %v3692_v34, 0.0  ;;  %v3559_v30 = vadd.f32 %v3558_v37, %v8856_v47  ;;  %v7688_v38 = vpop.f32.mrb[174].mxu0 }
 0x41c   : > { %3758 = vst [vmem:[#allocation2 + $0x99] sm:$0xff] %v3726_v49  ;;  %v3658_v39 = vmul.f32 %v8912_v11, %v3567_v62  ;;  %v3570_v51 = vadd.f32 %v7688_v38, %v8865_v53  ;;  %v3561_v45 = vpop.f32.mrb[175].mxu0  ;;  %v3976_v12 = vld [vmem:[#allocation2 + $0x50] sm:$0xff]  ;;  %v8979_v53 = vpack.c.bf16 %v3726_v49, %v3725_v24  ;;  %v3912_v24 = vld [vmem:[#allocation2 + $0x3a] sm:$0xff]  ;;  %v3978_v62 = vld [vmem:[#allocation2 + $0x68] sm:$0xff] }
 0x41d   : > { %3756 = vst [vmem:[#allocation2 + $0x81] sm:$0xff] %v3724_v42  ;;  %v3656_v43 = vmul.f32 %v8912_v11, %v3559_v30  ;;  %v3562_v25 = vadd.f32 %v3561_v45, %v8859_v55  ;;  %7384 = vmatpush3.bf16.msra.mxu0 %v7954_v29  ;;  %v8977_v59 = vpack.c.bf16 %v3724_v42, %v3723_v17  ;;  %v3977_v42 = vld [vmem:[#allocation2 + $0x60] sm:$0xff] }
 0x41e   : > { %v3697_v31 = vadd.f32 %v8918_v3, %v3658_v39  ;;  %v3659_v47 = vmul.f32 %v8912_v11, %v3570_v51  ;;  %7385 = vmatprep.subr.bf16.mxu0 %v7957_v19  ;;  %v8984_v55 = vpack.c.bf16 %v3976_v12, %v3975_v48  ;;  %v8996_v14 = vpack.c.bf16 %v3912_v24, %v3911_v63  ;;  %v7974_v63 = vld [vmem:[#allocation4 + $0x1b0] sm:$0xff]  }
 0x41f   : > { %v3695_v28 = vadd.f32 %v8918_v3, %v3656_v43  ;;  %v3657_v23 = vmul.f32 %v8912_v11, %v3562_v25  ;;  %5124 = vmatmul.mubr.bf16.gmra.mrb[168].mxu1 %v8962_v44 }
 0x420   : > { %v3729_v41 = vmax.f32 %v3697_v31, 0.0  ;;  %v3698_v22 = vadd.f32 %v8918_v3, %v3659_v47  ;;  %5277 = vmatmul.mubr.bf16.gmra.mrb[196].mxu0 %v8973_v58  ;;  %5131 = vmatprep.mubr.bf16.mxu1 %v3878_v6  ;;  %v7970_v31 = vld [vmem:[#allocation4 + $0x1a8] sm:$0xff]  }
 0x421   : > { %v3727_v13 = vmax.f32 %v3695_v28, 0.0  ;;  %v3696_v27 = vadd.f32 %v8918_v3, %v3657_v23  ;;  %v7691_v0 = vpop.f32.mrb[176].mxu0  ;;  %5284 = vmatprep.mubr.bf16.mxu0 %v8984_v55  ;;  %7386 = vmatpush3.bf16.msra.mxu0 %v7958_v18  ;;  %v3913_v28 = vld [vmem:[#allocation2 + $0x4a] sm:$0xff]  ;;  %v3914_v23 = vld [vmem:[#allocation2 + $0x52] sm:$0xff] }
 0x422   : > { %3761 = vst [vmem:[#allocation2 + $0xc1] sm:$0xff] %v3729_v41  ;;  %v3730_v5 = vmax.f32 %v3698_v22, 0.0  ;;  %v3583_v7 = vadd.f32 %v7691_v0, %v8874_v50  ;;  %v3574_v9 = vpop.f32.mrb[177].mxu0  ;;  %7387 = vmatprep.subr.bf16.mxu0 %v7961_v35 }
 0x423   : > { %3759 = vst [vmem:[#allocation2 + $0xa9] sm:$0xff] %v3727_v13  ;;  %v3728_v17 = vmax.f32 %v3696_v27, 0.0  ;;  %v3575_v6 = vadd.f32 %v3574_v9, %v8868_v26  ;;  %v7692_v34 = vpop.f32.mrb[178].mxu0  ;;  %v9020_v9 = vpack.c.bf16 %v3914_v23, %v3913_v28 }
 0x424   : > { %3762 = vst [vmem:[#allocation2 + $0xc9] sm:$0xff] %v3730_v5  ;;  %v3662_v54 = vmul.f32 %v8912_v11, %v3583_v7  ;;  %v3586_v29 = vadd.f32 %v7692_v34, %v8877_v16  ;;  %v3577_v49 = vpop.f32.mrb[179].mxu0  ;;  %v9002_v38 = vpack.c.bf16 %v3730_v5, %v3729_v41  ;;  %v7969_v16 = vld [vmem:[#allocation4 + $0x1e8] sm:$0xff]   ;;  %v7973_v41 = vld [vmem:[#allocation4 + $0x1f0] sm:$0xff]  }
 0x425   : > { %3760 = vst [vmem:[#allocation2 + $0xb1] sm:$0xff] %v3728_v17  ;;  %v3660_v50 = vmul.f32 %v8912_v11, %v3575_v6  ;;  %v3578_v37 = vadd.f32 %v3577_v49, %v8871_v40  ;;  %7388 = vmatpush3.bf16.msra.mxu0 %v7962_v46  ;;  %v9000_v30 = vpack.c.bf16 %v3728_v17, %v3727_v13  ;;  %v3980_v5 = vld [vmem:[#allocation2 + $0x80] sm:$0xff] }
 0x426   : > { %v3701_v19 = vadd.f32 %v8918_v3, %v3662_v54  ;;  %v3663_v26 = vmul.f32 %v8912_v11, %v3586_v29  ;;  %7389 = vmatprep.subr.bf16.mxu0 %v7965_v8  ;;  %v9007_v40 = vpack.c.bf16 %v3978_v62, %v3977_v42  ;;  %v3979_v8 = vld [vmem:[#allocation2 + $0x78] sm:$0xff] }
 0x427   : > { %v3699_v39 = vadd.f32 %v8918_v3, %v3660_v50  ;;  %v3661_v51 = vmul.f32 %v8912_v11, %v3578_v37  ;;  %5132 = vmatmul.mubr.bf16.gmra.mrb[172].mxu1 %v8984_v55 }
 0x428   : > { %v3733_v45 = vmax.f32 %v3701_v19, 0.0  ;;  %v3702_v12 = vadd.f32 %v8918_v3, %v3663_v26  ;;  %5285 = vmatmul.mubr.bf16.gmra.mrb[200].mxu0 %v8996_v14  ;;  %5139 = vmatprep.mubr.bf16.mxu1 %v8958_v15 }
 0x429   : > { %v3731_v43 = vmax.f32 %v3699_v39, 0.0  ;;  %v3700_v25 = vadd.f32 %v8918_v3, %v3661_v51  ;;  %v7695_v18 = vpop.f32.mrb[180].mxu0  ;;  %5292 = vmatprep.mubr.bf16.mxu0 %v9007_v40  ;;  %7390 = vmatpush3.bf16.msra.mxu0 %v7966_v33  ;;  %v7978_v33 = vld [vmem:[#allocation4 + $0x1b8] sm:$0xff]  }
 0x42a   : > { %3765 = vst [vmem:[#allocation2 + $0xf1] sm:$0xff] %v3733_v45  ;;  %v3734_v47 = vmax.f32 %v3702_v12, 0.0  ;;  %v3599_v48 = vadd.f32 %v7695_v18, %v8886_v56  ;;  %v3590_v35 = vpop.f32.mrb[181].mxu0  ;;  %7391 = vmatprep.subr.bf16.mxu0 %v7969_v16  ;;  %v3915_v16 = vld [vmem:[#allocation2 + $0x62] sm:$0xff]  ;;  %v3916_v39 = vld [vmem:[#allocation2 + $0x6a] sm:$0xff]  ;;  %v3982_v18 = vld [vmem:[#allocation2 + $0x98] sm:$0xff] }
 0x42b   : > { %3763 = vst [vmem:[#allocation2 + $0xd9] sm:$0xff] %v3731_v43  ;;  %v3732_v22 = vmax.f32 %v3700_v25, 0.0  ;;  %v3591_v15 = vadd.f32 %v3590_v35, %v8880_v32  ;;  %v7696_v13 = vpop.f32.mrb[182].mxu0  ;;  %v3981_v35 = vld [vmem:[#allocation2 + $0x90] sm:$0xff] }
 0x42c   : > { %3766 = vst [vmem:[#allocation2 + $0xf9] sm:$0xff] %v3734_v47  ;;  %v3666_v27 = vmul.f32 %v8912_v11, %v3599_v48  ;;  %v3602_v0 = vadd.f32 %v7696_v13, %v8889_v2  ;;  %v3593_v46 = vpop.f32.mrb[183].mxu0  ;;  %v9026_v6 = vpack.c.bf16 %v3734_v47, %v3733_v45  ;;  %v7977_v2 = vld [vmem:[#allocation4 + $0x1f8] sm:$0xff]   ;;  %v9044_v47 = vpack.c.bf16 %v3916_v39, %v3915_v16 }
 0x42d   : > { %3764 = vst [vmem:[#allocation2 + $0xe1] sm:$0xff] %v3732_v22  ;;  %v3664_v56 = vmul.f32 %v8912_v11, %v3591_v15  ;;  %v3594_v7 = vadd.f32 %v3593_v46, %v8883_v57  ;;  %7392 = vmatpush3.bf16.msra.mxu0 %v7970_v31  ;;  %v9024_v17 = vpack.c.bf16 %v3732_v22, %v3731_v43 }
 0x42e   : > { %v3705_v24 = vadd.f32 %v8918_v3, %v3666_v27  ;;  %v3667_v32 = vmul.f32 %v8912_v11, %v3602_v0  ;;  %7393 = vmatprep.subr.bf16.mxu0 %v7973_v41  ;;  %v9031_v57 = vpack.c.bf16 %v3980_v5, %v3979_v8 }
 0x42f   : > { %v3703_v34 = vadd.f32 %v8918_v3, %v3664_v56  ;;  %v3665_v54 = vmul.f32 %v8912_v11, %v3594_v7  ;;  %5140 = vmatmul.mubr.bf16.gmra.mrb[176].mxu1 %v9007_v40  ;;  %v3917_v7 = vld [vmem:[#allocation2 + $0x7a] sm:$0xff] }
 0x430   : > { %v3737_v29 = vmax.f32 %v3705_v24, 0.0  ;;  %v3706_v49 = vadd.f32 %v8918_v3, %v3667_v32  ;;  %5293 = vmatmul.mubr.bf16.gmra.mrb[204].mxu0 %v9020_v9  ;;  %5147 = vmatprep.mubr.bf16.mxu1 %v8977_v59 }
 0x431   : > { %v3735_v62 = vmax.f32 %v3703_v34, 0.0  ;;  %v3704_v50 = vadd.f32 %v8918_v3, %v3665_v54  ;;  %v7699_v37 = vpop.f32.mrb[184].mxu0  ;;  %5300 = vmatprep.mubr.bf16.mxu0 %v9031_v57  ;;  %7394 = vmatpush3.bf16.msra.mxu0 %v7974_v63  ;;  %v3918_v63 = vld [vmem:[#allocation2 + $0x82] sm:$0xff]  ;;  %v3984_v54 = vld [vmem:[#allocation2 + $0xb0] sm:$0xff] }
 0x432   : > { %3769 = vst [vmem:[#allocation2 + $0x121] sm:$0xff] %v3737_v29  ;;  %v3738_v19 = vmax.f32 %v3706_v49, 0.0  ;;  %v3615_v26 = vadd.f32 %v7699_v37, %v8898_v52  ;;  %v3606_v42 = vpop.f32.mrb[185].mxu0  ;;  %7395 = vmatprep.subr.bf16.mxu0 %v7977_v2  ;;  %v9069_v49 = vpack.c.bf16 %v3918_v63, %v3917_v7 }
 0x433   : > { %3767 = vst [vmem:[#allocation2 + $0x109] sm:$0xff] %v3735_v62  ;;  %v3736_v51 = vmax.f32 %v3704_v50, 0.0  ;;  %v3607_v59 = vadd.f32 %v3606_v42, %v8892_v10  ;;  %v7700_v45 = vpop.f32.mrb[186].mxu0  ;;  %v3927_v63 = vld [vmem:[#allocation2 + $0xf2] sm:$0xff] }
 0x434   : > { %3770 = vst [vmem:[#allocation2 + $0x129] sm:$0xff] %v3738_v19  ;;  %v3670_v12 = vmul.f32 %v8912_v11, %v3615_v26  ;;  %v3618_v43 = vadd.f32 %v7700_v45, %v8901_v1  ;;  %v3609_v25 = vpop.f32.mrb[187].mxu0  ;;  %v9050_v23 = vpack.c.bf16 %v3738_v19, %v3737_v29  ;;  %v3920_v45 = vld [vmem:[#allocation2 + $0x9a] sm:$0xff] }
 0x435   : > { %3768 = vst [vmem:[#allocation2 + $0x111] sm:$0xff] %v3736_v51  ;;  %v3668_v31 = vmul.f32 %v8912_v11, %v3607_v59  ;;  %v3610_v52 = vadd.f32 %v3609_v25, %v8895_v60  ;;  %7396 = vmatpush3.bf16.msra.mxu0 %v7978_v33  ;;  %v9048_v28 = vpack.c.bf16 %v3736_v51, %v3735_v62  ;;  %v3919_v59 = vld [vmem:[#allocation2 + $0x92] sm:$0xff] }
 0x436   : > { %v3709_v48 = vadd.f32 %v8918_v3, %v3670_v12  ;;  %v3671_v10 = vmul.f32 %v8912_v11, %v3618_v43  ;;  %7705 = vmatprep.subr.bf16.mxu0 %v8935_v21  ;;  %v9056_v60 = vpack.c.bf16 %v3982_v18, %v3981_v35  ;;  %v3986_v12 = vld [vmem:[#allocation2 + $0xc8] sm:$0xff]  ;;  %v9089_v25 = vpack.c.bf16 %v3920_v45, %v3919_v59  ;;  %v3985_v18 = vld [vmem:[#allocation2 + $0xc0] sm:$0xff] }
 0x437   : > { %v3707_v1 = vadd.f32 %v8918_v3, %v3668_v31  ;;  %v3669_v41 = vmul.f32 %v8912_v11, %v3610_v52  ;;  %5148 = vmatmul.mubr.bf16.gmra.mrb[180].mxu1 %v9031_v57  ;;  %v3922_v31 = vld [vmem:[#allocation2 + $0xb2] sm:$0xff]  ;;  %v3988_v52 = vld [vmem:[#allocation2 + $0xe0] sm:$0xff] }
 0x438   : > { %v3741_v22 = vmax.f32 %v3709_v48, 0.0  ;;  %v3710_v15 = vadd.f32 %v8918_v3, %v3671_v10  ;;  %5301 = vmatmul.mubr.bf16.gmra.mrb[208].mxu0 %v9044_v47  ;;  %5155 = vmatprep.mubr.bf16.mxu1 %v8979_v53  ;;  %v3987_v10 = vld [vmem:[#allocation2 + $0xd8] sm:$0xff] }
 0x439   : > { %v3739_v13 = vmax.f32 %v3707_v1, 0.0  ;;  %v3708_v27 = vadd.f32 %v8918_v3, %v3669_v41  ;;  %v7703_v0 = vpop.f32.mrb[188].mxu0  ;;  %5308 = vmatprep.mubr.bf16.mxu0 %v9056_v60  ;;  %v9100_v35 = vpack.c.bf16 %v3988_v52, %v3987_v10  ;;  %v3923_v1 = vld [vmem:[#allocation2 + $0xc2] sm:$0xff]  ;;  %v3990_v41 = vld [vmem:[#allocation2 + $0xf8] sm:$0xff] }
 0x43a   : > { %3773 = vst [vmem:[#allocation2 + $0x151] sm:$0xff] %v3741_v22  ;;  %v3742_v46 = vmax.f32 %v3710_v15, 0.0  ;;  %v3631_v5 = vadd.f32 %v7703_v0, %v8927_v61  ;;  %v3622_v56 = vpop.f32.mrb[189].mxu0  ;;  %v3989_v15 = vld [vmem:[#allocation2 + $0xf0] sm:$0xff] }
 0x43b   : > { %3771 = vst [vmem:[#allocation2 + $0x139] sm:$0xff] %v3739_v13  ;;  %v3740_v24 = vmax.f32 %v3708_v27, 0.0  ;;  %v3623_v32 = vadd.f32 %v3622_v56, %v8904_v20  ;;  %v7704_v8 = vpop.f32.mrb[190].mxu0  ;;  %v3983_v20 = vld [vmem:[#allocation2 + $0xa8] sm:$0xff]  ;;  %v3925_v27 = vld [vmem:[#allocation2 + $0xda] sm:$0xff] }
 0x43c   : > { %3774 = vst [vmem:[#allocation2 + $0x159] sm:$0xff] %v3742_v46  ;;  %v3674_v53 = vmul.f32 %v8912_v11, %v3631_v5  ;;  %v3634_v2 = vadd.f32 %v7704_v8, %v8932_v4  ;;  %v3625_v34 = vpop.f32.mrb[191].mxu0  ;;  %v9075_v33 = vpack.c.bf16 %v3742_v46, %v3741_v22  ;;  %v9080_v26 = vpack.c.bf16 %v3984_v54, %v3983_v20  ;;  %v3992_v0 = vld [vmem:[#allocation2 + $0x110] sm:$0xff]  ;;  %v3991_v5 = vld [vmem:[#allocation2 + $0x108] sm:$0xff] }
 0x43d   : > { %3772 = vst [vmem:[#allocation2 + $0x141] sm:$0xff] %v3740_v24  ;;  %v3672_v29 = vmul.f32 %v8912_v11, %v3623_v32  ;;  %v3626_v61 = vadd.f32 %v3625_v34, %v8907_v36  ;;  %v9073_v37 = vpack.c.bf16 %v3740_v24, %v3739_v13  ;;  %v9108_v13 = vpack.c.bf16 %v3990_v41, %v3989_v15  ;;  %v3928_v24 = vld [vmem:[#allocation2 + $0xfa] sm:$0xff] }
 0x43e   : > { %v3713_v62 = vadd.f32 %v8918_v3, %v3674_v53  ;;  %v3675_v50 = vmul.f32 %v8912_v11, %v3634_v2  ;;  %v9116_v56 = vpack.c.bf16 %v3992_v0, %v3991_v5  ;;  %v3994_v53 = vld [vmem:[#allocation2 + $0x128] sm:$0xff]  ;;  %v9125_v54 = vpack.c.bf16 %v3928_v24, %v3927_v63  ;;  %v4035_v15 = vld [vmem:[#allocation2 + $0x19] sm:$0xff]  ;;  %v4227_v5 = vld [vmem:[#allocation2 + $0x31] sm:$0xff] }
 0x43f   : > { %v3711_v4 = vadd.f32 %v8918_v3, %v3672_v29  ;;  %v3673_v19 = vmul.f32 %v8912_v11, %v3626_v61  ;;  %5156 = vmatmul.mubr.bf16.gmra.mrb[184].mxu1 %v9056_v60  ;;  %v3993_v29 = vld [vmem:[#allocation2 + $0x120] sm:$0xff]  ;;  %v4230_v63 = vld [vmem:[#allocation2 + $0x51] sm:$0xff]  ;;  %v4229_v24 = vld [vmem:[#allocation2 + $0x49] sm:$0xff] }
 0x440   : > { %v3745_v36 = vmax.f32 %v3713_v62, 0.0  ;;  %v3714_v42 = vadd.f32 %v8918_v3, %v3675_v50  ;;  %5309 = vmatmul.mubr.bf16.gmra.mrb[212].mxu0 %v9069_v49  ;;  %5163 = vmatprep.mubr.bf16.mxu1 %v9000_v30  ;;  %v9092_v30 = vpack.c.bf16 %v3986_v12, %v3985_v18  ;;  %v9128_v61 = vpack.c.bf16 %v3994_v53, %v3993_v29  ;;  %v3930_v62 = vld [vmem:[#allocation2 + $0x112] sm:$0xff]  ;;  %v7982_v53 = vld [vmem:[#allocation4 + $0x218] sm:$0xff]  }
 0x441   : > { %v3743_v16 = vmax.f32 %v3711_v4, 0.0  ;;  %v3712_v39 = vadd.f32 %v8918_v3, %v3673_v19  ;;  %5316 = vmatprep.mubr.bf16.mxu0 %v9080_v26  ;;  %v3921_v3 = vld [vmem:[#allocation2 + $0xaa] sm:$0xff]  ;;  %v4231_v29 = vld [vmem:[#allocation2 + $0x61] sm:$0xff] }
 0x442   : > { %3777 = vst [vmem:[#allocation2 + $0x181] sm:$0xff] %v3745_v36  ;;  %v3746_v51 = vmax.f32 %v3714_v42, 0.0  ;;  %v9097_v48 = vpack.c.bf16 %v3922_v31, %v3921_v3  ;;  %v3995_v4 = vld [vmem:[#allocation2 + $0x138] sm:$0xff]  ;;  %v3931_v36 = vld [vmem:[#allocation2 + $0x122] sm:$0xff] }
 0x443   : > { %3775 = vst [vmem:[#allocation2 + $0x169] sm:$0xff] %v3743_v16  ;;  %v3744_v11 = vmax.f32 %v3712_v39, 0.0  ;;  %v3998_v42 = vld [vmem:[#allocation2 + $0x158] sm:$0xff]  ;;  %v3997_v39 = vld [vmem:[#allocation2 + $0x150] sm:$0xff] }
 0x444   : > { %3778 = vst [vmem:[#allocation2 + $0x189] sm:$0xff] %v3746_v51  ;;  %v3996_v50 = vld [vmem:[#allocation2 + $0x140] sm:$0xff]  ;;  %v9144_v51 = vpack.c.bf16 %v3998_v42, %v3997_v39  ;;  %v3935_v3 = vld [vmem:[#allocation2 + $0x152] sm:$0xff]  ;;  %v4240_v42 = vld [vmem:[#allocation2 + $0xc9] sm:$0xff] }
 0x445   : > { %3776 = vst [vmem:[#allocation2 + $0x171] sm:$0xff] %v3744_v11  ;;  %v9087_v43 = vpack.c.bf16 %v3744_v11, %v3743_v16  ;;  %v9136_v19 = vpack.c.bf16 %v3996_v50, %v3995_v4  ;;  %v3933_v11 = vld [vmem:[#allocation2 + $0x13a] sm:$0xff]  ;;  %v7986_v4 = vld [vmem:[#allocation4 + $0x238] sm:$0xff]  }
 0x446   : > { %v4239_v39 = vld [vmem:[#allocation2 + $0xc1] sm:$0xff] }
 0x447   : > { %5164 = vmatmul.mubr.bf16.gmra.mrb[188].mxu1 %v9080_v26 }
 0x448   : > { %5317 = vmatmul.mubr.bf16.gmra.mrb[216].mxu0 %v9089_v25  ;;  %5171 = vmatprep.mubr.bf16.mxu1 %v9002_v38  ;;  %v3924_v38 = vld [vmem:[#allocation2 + $0xca] sm:$0xff] }
 0x449   : > { %5324 = vmatprep.mubr.bf16.mxu0 %v9092_v30  ;;  %v9105_v22 = vpack.c.bf16 %v3924_v38, %v3923_v1  ;;  %v4001_v10 = vld [vmem:[#allocation2 + $0x180] sm:$0xff] }
 0x44a   : > { %v3999_v12 = vld [vmem:[#allocation2 + $0x168] sm:$0xff] }
 0x44b   : > { %v4002_v31 = vld [vmem:[#allocation2 + $0x188] sm:$0xff] }
 0x44c   : > { %v4000_v59 = vld [vmem:[#allocation2 + $0x170] sm:$0xff]  ;;  %v9160_v1 = vpack.c.bf16 %v4002_v31, %v4001_v10  ;;  %v4036_v38 = vld [vmem:[#allocation2 + $0x21] sm:$0xff] }
 0x44d   : > { %v9152_v18 = vpack.c.bf16 %v4000_v59, %v3999_v12  ;;  %v3938_v41 = vld [vmem:[#allocation2 + $0x172] sm:$0xff] }
 0x44f   : > { %5172 = vmatmul.mubr.bf16.gmra.mrb[192].mxu1 %v9092_v30 }
 0x450   : > { %5325 = vmatmul.mubr.bf16.gmra.mrb[220].mxu0 %v9097_v48  ;;  %5179 = vmatprep.mubr.bf16.mxu1 %v9024_v17  ;;  %v3926_v17 = vld [vmem:[#allocation2 + $0xe2] sm:$0xff] }
 0x451   : > { %5332 = vmatprep.mubr.bf16.mxu0 %v9100_v35  ;;  %v9113_v46 = vpack.c.bf16 %v3926_v17, %v3925_v27  ;;  %v4228_v27 = vld [vmem:[#allocation2 + $0x39] sm:$0xff]  ;;  %v4067_v17 = vpack.c.bf16 %v4036_v38, %v4035_v15 }
 0x453   : > { %v7061_v7 = vpop.f32.mrb[160].mxu1 }
 0x457   : > { %5180 = vmatmul.mubr.bf16.gmra.mrb[196].mxu1 %v9100_v35 }
 0x458   : > { %5333 = vmatmul.mubr.bf16.gmra.mrb[224].mxu0 %v9105_v22  ;;  %5187 = vmatprep.mubr.bf16.mxu1 %v9026_v6  ;;  %v7062_v6 = vpop.f32.mrb[161].mxu1 }
 0x459   : > { %5340 = vmatprep.mubr.bf16.mxu0 %v9108_v13  ;;  %v9121_v32 = vadd.f32 %v7062_v6, %v7061_v7  ;;  %v7064_v8 = vpop.f32.mrb[162].mxu1  ;;  %v7980_v7 = vld [vmem:[#allocation4 + $0x208] sm:$0xff]   ;;  %v4259_v6 = vpack.c.bf16 %v4228_v27, %v4227_v5 }
 0x45a   : > { %v7065_v2 = vpop.f32.mrb[163].mxu1  ;;  %v4252_v27 = vld [vmem:[#allocation2 + $0x159] sm:$0xff] }
 0x45b   : > { %v9123_v34 = vadd.f32 %v7065_v2, %v7064_v8  ;;  %v4260_v8 = vpack.c.bf16 %v4230_v63, %v4229_v24  ;;  %v4232_v2 = vld [vmem:[#allocation2 + $0x69] sm:$0xff] }
 0x45f   : > { %5188 = vmatmul.mubr.bf16.gmra.mrb[200].mxu1 %v9108_v13 }
 0x460   : > { %5341 = vmatmul.mubr.bf16.gmra.mrb[228].mxu0 %v9113_v46  ;;  %5195 = vmatprep.mubr.bf16.mxu1 %v9048_v28  ;;  %v3929_v28 = vld [vmem:[#allocation2 + $0x10a] sm:$0xff] }
 0x461   : > { %5348 = vmatprep.mubr.bf16.mxu0 %v9116_v56  ;;  %v9133_v20 = vpack.c.bf16 %v3930_v62, %v3929_v28  ;;  %v4261_v28 = vpack.c.bf16 %v4232_v2, %v4231_v29  ;;  %v7984_v62 = vld [vmem:[#allocation4 + $0x228] sm:$0xff]  }
 0x467   : > { %5196 = vmatmul.mubr.bf16.gmra.mrb[204].mxu1 %v9116_v56 }
 0x468   : > { %5349 = vmatmul.mubr.bf16.gmra.mrb[232].mxu0 %v9125_v54  ;;  %5203 = vmatprep.mubr.bf16.mxu1 %v9050_v23  ;;  %v3932_v23 = vld [vmem:[#allocation2 + $0x12a] sm:$0xff] }
 0x469   : > { %5356 = vmatprep.mubr.bf16.mxu0 %v9128_v61  ;;  %v9141_v16 = vpack.c.bf16 %v3932_v23, %v3931_v36 }
 0x46f   : > { %5204 = vmatmul.mubr.bf16.gmra.mrb[208].mxu1 %v9128_v61 }
 0x470   : > { %5357 = vmatmul.mubr.bf16.gmra.mrb[236].mxu0 %v9133_v20  ;;  %5211 = vmatprep.mubr.bf16.mxu1 %v9073_v37  ;;  %v3934_v37 = vld [vmem:[#allocation2 + $0x142] sm:$0xff] }
 0x471   : > { %5364 = vmatprep.mubr.bf16.mxu0 %v9136_v19  ;;  %v9149_v45 = vpack.c.bf16 %v3934_v37, %v3933_v11  ;;  %v4265_v11 = vpack.c.bf16 %v4240_v42, %v4239_v39  ;;  %v4129_v42 = vld [vmem:[#allocation2 + $0x182] sm:$0xff]  ;;  %v4130_v39 = vld [vmem:[#allocation2 + $0x18a] sm:$0xff] }
 0x477   : > { %5212 = vmatmul.mubr.bf16.gmra.mrb[212].mxu1 %v9136_v19 }
 0x478   : > { %5365 = vmatmul.mubr.bf16.gmra.mrb[240].mxu0 %v9141_v16  ;;  %5219 = vmatprep.mubr.bf16.mxu1 %v9075_v33  ;;  %v3936_v33 = vld [vmem:[#allocation2 + $0x15a] sm:$0xff] }
 0x479   : > { %5372 = vmatprep.mubr.bf16.mxu0 %v9144_v51  ;;  %v9157_v52 = vpack.c.bf16 %v3936_v33, %v3935_v3  ;;  %v4249_v33 = vld [vmem:[#allocation2 + $0x139] sm:$0xff] }
 0x47f   : > { %5220 = vmatmul.mubr.bf16.gmra.mrb[216].mxu1 %v9144_v51 }
 0x480   : > { %5373 = vmatmul.mubr.bf16.gmra.mrb[244].mxu0 %v9149_v45  ;;  %5227 = vmatprep.mubr.bf16.mxu1 %v9087_v43  ;;  %v3937_v43 = vld [vmem:[#allocation2 + $0x16a] sm:$0xff] }
 0x481   : > { %5380 = vmatprep.mubr.bf16.mxu0 %v9152_v18  ;;  %v9165_v0 = vpack.c.bf16 %v3938_v41, %v3937_v43 }
 0x487   : > { %5228 = vmatmul.mubr.bf16.gmra.mrb[220].mxu1 %v9152_v18 }
 0x488   : > { %5381 = vmatmul.mubr.bf16.gmra.mrb[248].mxu0 %v9157_v52  ;;  %5429 = vmatprep.mubr.bf16.mxu1 %v8973_v58  ;;  %v7981_v58 = vld [vmem:[#allocation4 + $0x210] sm:$0xff]  }
 0x489   : > { %5388 = vmatprep.mubr.bf16.mxu0 %v9160_v1 }
 0x48f   : > { %5430 = vmatmul.mubr.bf16.vlgmr.msra.gmra.mrb[224].mxu1 %v4067_v17 }
 0x490   : > { %5389 = vmatmul.mubr.bf16.gmra.mrb[252].mxu0 %v9165_v0  ;;  %7761 = vmatpush3.bf16.msra.mxu1 %v8935_v21 }
 0x491   : > { %5437 = vmatprep.mubr.bf16.mxu1 %v8996_v14  ;;  %5590 = vmatprep.mubr.bf16.mxu0 %v4259_v6  ;;  %v7983_v14 = vld [vmem:[#allocation4 + $0x220] sm:$0xff]  }
 0x492   : > { %7754 = vmatprep.subr.bf16.mxu1 %v7980_v7 }
 0x494   : > { %7762 = vmatpush3.bf16.msra.mxu1 %v7980_v7 }
 0x495   : > { %7755 = vmatprep.subr.bf16.mxu1 %v7981_v58 }
 0x497   : > { %5438 = vmatmul.mubr.bf16.gmra.mrb[228].mxu1 %v4259_v6 }
 0x498   : > { %5591 = vmatmul.mubr.bf16.vlgmr.msra.gmra.mrb[0].mxu0 %v8962_v44  ;;  %5445 = vmatprep.mubr.bf16.mxu1 %v9020_v9  ;;  %v4234_v44 = vld [vmem:[#allocation2 + $0x81] sm:$0xff]  ;;  %v4233_v9 = vld [vmem:[#allocation2 + $0x79] sm:$0xff] }
 0x499   : > { %7706 = vmatpush3.bf16.msra.mxu0 %v8935_v21  ;;  %5598 = vmatprep.mubr.bf16.mxu0 %v4260_v8  ;;  %v7985_v21 = vld [vmem:[#allocation4 + $0x230] sm:$0xff]   ;;  %v4262_v50 = vpack.c.bf16 %v4234_v44, %v4233_v9 }
 0x49a   : > { %7707 = vmatprep.subr.bf16.mxu0 %v7980_v7  ;;  %7763 = vmatpush3.bf16.msra.mxu1 %v7981_v58 }
 0x49b   : > { %7756 = vmatprep.subr.bf16.mxu1 %v7982_v53 }
 0x49d   : > { %7708 = vmatpush3.bf16.msra.mxu0 %v7980_v7 }
 0x49e   : > { %7709 = vmatprep.subr.bf16.mxu0 %v7981_v58  ;;  %7764 = vmatpush3.bf16.msra.mxu1 %v7982_v53 }
 0x49f   : > { %5446 = vmatmul.mubr.bf16.gmra.mrb[232].mxu1 %v4260_v8  ;;  %7757 = vmatprep.subr.bf16.mxu1 %v7983_v14 }
 0x4a0   : > { %5599 = vmatmul.mubr.bf16.gmra.mrb[4].mxu0 %v8984_v55  ;;  %5453 = vmatprep.mubr.bf16.mxu1 %v9044_v47  ;;  %v4236_v55 = vld [vmem:[#allocation2 + $0x99] sm:$0xff]  ;;  %v4235_v47 = vld [vmem:[#allocation2 + $0x91] sm:$0xff] }
 0x4a1   : > { %5606 = vmatprep.mubr.bf16.mxu0 %v4261_v28  ;;  %7710 = vmatpush3.bf16.msra.mxu0 %v7981_v58  ;;  %v4263_v36 = vpack.c.bf16 %v4236_v55, %v4235_v47  ;;  %v4251_v58 = vld [vmem:[#allocation2 + $0x151] sm:$0xff]  ;;  %v4253_v55 = vld [vmem:[#allocation2 + $0x169] sm:$0xff] }
 0x4a2   : > { %7711 = vmatprep.subr.bf16.mxu0 %v7982_v53  ;;  %7765 = vmatpush3.bf16.msra.mxu1 %v7983_v14  ;;  %v4271_v24 = vpack.c.bf16 %v4252_v27, %v4251_v58 }
 0x4a3   : > { %7758 = vmatprep.subr.bf16.mxu1 %v7984_v62 }
 0x4a5   : > { %7712 = vmatpush3.bf16.msra.mxu0 %v7982_v53 }
 0x4a6   : > { %7713 = vmatprep.subr.bf16.mxu0 %v7983_v14  ;;  %7766 = vmatpush3.bf16.msra.mxu1 %v7984_v62 }
 0x4a7   : > { %5454 = vmatmul.mubr.bf16.gmra.mrb[236].mxu1 %v4261_v28  ;;  %7759 = vmatprep.subr.bf16.mxu1 %v7985_v21 }
 0x4a8   : > { %5607 = vmatmul.mubr.bf16.gmra.mrb[8].mxu0 %v9007_v40  ;;  %5461 = vmatprep.mubr.bf16.mxu1 %v9069_v49  ;;  %v4238_v40 = vld [vmem:[#allocation2 + $0xb1] sm:$0xff]  ;;  %v4237_v49 = vld [vmem:[#allocation2 + $0xa9] sm:$0xff] }
 0x4a9   : > { %5614 = vmatprep.mubr.bf16.mxu0 %v4262_v50  ;;  %7714 = vmatpush3.bf16.msra.mxu0 %v7983_v14  ;;  %v4264_v23 = vpack.c.bf16 %v4238_v40, %v4237_v49 }
 0x4aa   : > { %7715 = vmatprep.subr.bf16.mxu0 %v7984_v62  ;;  %7767 = vmatpush3.bf16.msra.mxu1 %v7985_v21 }
 0x4ab   : > { %7760 = vmatprep.subr.bf16.mxu1 %v7986_v4 }
 0x4ad   : > { %7716 = vmatpush3.bf16.msra.mxu0 %v7984_v62 }
 0x4ae   : > { %7717 = vmatprep.subr.bf16.mxu0 %v7985_v21  ;;  %7768 = vmatpush3.bf16.msra.mxu1 %v7986_v4 }
 0x4af   : > { %5462 = vmatmul.mubr.bf16.gmra.mrb[240].mxu1 %v4262_v50 }
 0x4b0   : > { %5615 = vmatmul.mubr.bf16.gmra.mrb[12].mxu0 %v9031_v57  ;;  %5469 = vmatprep.mubr.bf16.mxu1 %v9089_v25  ;;  %v4242_v57 = vld [vmem:[#allocation2 + $0xe1] sm:$0xff]  ;;  %v4241_v25 = vld [vmem:[#allocation2 + $0xd9] sm:$0xff] }
 0x4b1   : > { %5622 = vmatprep.mubr.bf16.mxu0 %v4263_v36  ;;  %7718 = vmatpush3.bf16.msra.mxu0 %v7985_v21  ;;  %v4266_v37 = vpack.c.bf16 %v4242_v57, %v4241_v25  ;;  %v4254_v21 = vld [vmem:[#allocation2 + $0x171] sm:$0xff] }
 0x4b2   : > { %7719 = vmatprep.subr.bf16.mxu0 %v7986_v4 }
 0x4b5   : > { %7720 = vmatpush3.bf16.msra.mxu0 %v7986_v4 }
 0x4b7   : > { %5470 = vmatmul.mubr.bf16.gmra.mrb[244].mxu1 %v4263_v36 }
 0x4b8   : > { %5623 = vmatmul.mubr.bf16.gmra.mrb[16].mxu0 %v9056_v60  ;;  %5477 = vmatprep.mubr.bf16.mxu1 %v9097_v48  ;;  %v4244_v60 = vld [vmem:[#allocation2 + $0xf9] sm:$0xff]  ;;  %v4243_v48 = vld [vmem:[#allocation2 + $0xf1] sm:$0xff] }
 0x4b9   : > { %5630 = vmatprep.mubr.bf16.mxu0 %v4264_v23  ;;  %v4267_v59 = vpack.c.bf16 %v4244_v60, %v4243_v48 }
 0x4bf   : > { %5478 = vmatmul.mubr.bf16.gmra.mrb[248].mxu1 %v4264_v23 }
 0x4c0   : > { %5631 = vmatmul.mubr.bf16.gmra.mrb[20].mxu0 %v9080_v26  ;;  %5485 = vmatprep.mubr.bf16.mxu1 %v9105_v22  ;;  %v4246_v26 = vld [vmem:[#allocation2 + $0x111] sm:$0xff]  ;;  %v4245_v22 = vld [vmem:[#allocation2 + $0x109] sm:$0xff] }
 0x4c1   : > { %5638 = vmatprep.mubr.bf16.mxu0 %v4265_v11  ;;  %v4268_v12 = vpack.c.bf16 %v4246_v26, %v4245_v22 }
 0x4c7   : > { %5486 = vmatmul.mubr.bf16.gmra.mrb[252].mxu1 %v4265_v11 }
 0x4c8   : > { %5639 = vmatmul.mubr.bf16.gmra.mrb[24].mxu0 %v9092_v30  ;;  %5493 = vmatprep.mubr.bf16.mxu1 %v9113_v46  ;;  %v4248_v30 = vld [vmem:[#allocation2 + $0x129] sm:$0xff]  ;;  %v4247_v46 = vld [vmem:[#allocation2 + $0x121] sm:$0xff] }
 0x4c9   : > { %5646 = vmatprep.mubr.bf16.mxu0 %v4266_v37  ;;  %v4269_v3 = vpack.c.bf16 %v4248_v30, %v4247_v46 }
 0x4cf   : > { %5494 = vmatmul.mubr.bf16.gmra.mrb[0].mxu1 %v4266_v37  ;;  %v4256_v37 = vld [vmem:[#allocation2 + $0x189] sm:$0xff] }
 0x4d0   : > { %5647 = vmatmul.mubr.bf16.gmra.mrb[28].mxu0 %v9100_v35  ;;  %5501 = vmatprep.mubr.bf16.mxu1 %v9125_v54  ;;  %v4250_v35 = vld [vmem:[#allocation2 + $0x141] sm:$0xff] }
 0x4d1   : > { %5654 = vmatprep.mubr.bf16.mxu0 %v4267_v59  ;;  %v4270_v31 = vpack.c.bf16 %v4250_v35, %v4249_v33 }
 0x4d7   : > { %5502 = vmatmul.mubr.bf16.gmra.mrb[4].mxu1 %v4267_v59 }
 0x4d8   : > { %5655 = vmatmul.mubr.bf16.gmra.mrb[32].mxu0 %v9108_v13  ;;  %5509 = vmatprep.mubr.bf16.mxu1 %v9133_v20 }
 0x4d9   : > { %5662 = vmatprep.mubr.bf16.mxu0 %v4268_v12 }
 0x4df   : > { %5510 = vmatmul.mubr.bf16.gmra.mrb[8].mxu1 %v4268_v12  ;;  %v4255_v12 = vld [vmem:[#allocation2 + $0x181] sm:$0xff] }
 0x4e0   : > { %5663 = vmatmul.mubr.bf16.gmra.mrb[36].mxu0 %v9116_v56  ;;  %5517 = vmatprep.mubr.bf16.mxu1 %v9141_v16 }
 0x4e1   : > { %5670 = vmatprep.mubr.bf16.mxu0 %v4269_v3 }
 0x4e7   : > { %5518 = vmatmul.mubr.bf16.gmra.mrb[12].mxu1 %v4269_v3  ;;  %v4273_v3 = vpack.c.bf16 %v4256_v37, %v4255_v12 }
 0x4e8   : > { %5671 = vmatmul.mubr.bf16.gmra.mrb[40].mxu0 %v9128_v61  ;;  %5525 = vmatprep.mubr.bf16.mxu1 %v9149_v45 }
 0x4e9   : > { %5678 = vmatprep.mubr.bf16.mxu0 %v4270_v31 }
 0x4ea   : > { %v7067_v13 = vpop.f32.mrb[164].mxu1 }
 0x4eb   : > { %v7173_v10 = vpop.f32.mrb[192].mxu0  ;;  %v7068_v38 = vpop.f32.mrb[165].mxu1 }
 0x4ec   : > { %v7069_v43 = vadd.f32 %v7068_v38, %v7067_v13  ;;  %v7174_v41 = vpop.f32.mrb[193].mxu0  ;;  %v7070_v15 = vpop.f32.mrb[166].mxu1  ;;  %v4258_v13 = vld [vmem:[#allocation2 + $0x1a1] sm:$0xff] }
 0x4ed   : > { %v7175_v56 = vadd.f32 %v7174_v41, %v7173_v10  ;;  %v7176_v17 = vpop.f32.mrb[194].mxu0  ;;  %v7071_v5 = vpop.f32.mrb[167].mxu1  ;;  %v4304_v41 = vld [vmem:[#allocation2 + $0xca] sm:$0xff] }
 0x4ee   : > { %v7072_v7 = vadd.f32 %v7071_v5, %v7070_v15  ;;  %v7177_v6 = vpop.f32.mrb[195].mxu0 }
 0x4ef   : > { %v9194_v63 = vadd.f32 %v7175_v56, %v9121_v32  ;;  %v7178_v61 = vadd.f32 %v7177_v6, %v7176_v17  ;;  %5526 = vmatmul.mubr.bf16.gmra.mrb[16].mxu1 %v4270_v31  ;;  %v4257_v31 = vld [vmem:[#allocation2 + $0x199] sm:$0xff] }
 0x4f0   : > { %5679 = vmatmul.mubr.bf16.gmra.mrb[44].mxu0 %v9136_v19  ;;  %5533 = vmatprep.mubr.bf16.mxu1 %v9157_v52  ;;  %v4274_v6 = vpack.c.bf16 %v4258_v13, %v4257_v31 }
 0x4f1   : > { %v9199_v8 = vadd.f32 %v7178_v61, %v9123_v34  ;;  %5686 = vmatprep.mubr.bf16.mxu0 %v4271_v24  ;;  %v4272_v34 = vpack.c.bf16 %v4254_v21, %v4253_v55  ;;  %v4291_v55 = vld [vmem:[#allocation2 + $0x32] sm:$0xff] }
 0x4f2   : > { %v7073_v53 = vpop.f32.mrb[168].mxu1 }
 0x4f3   : > { %v7179_v14 = vpop.f32.mrb[196].mxu0  ;;  %v7074_v2 = vpop.f32.mrb[169].mxu1 }
 0x4f4   : > { %v7075_v29 = vadd.f32 %v7074_v2, %v7073_v53  ;;  %v7180_v28 = vpop.f32.mrb[197].mxu0  ;;  %v7076_v62 = vpop.f32.mrb[170].mxu1 }
 0x4f5   : > { %v7181_v32 = vadd.f32 %v7180_v28, %v7179_v14  ;;  %v7182_v44 = vpop.f32.mrb[198].mxu0  ;;  %v7077_v9 = vpop.f32.mrb[171].mxu1  ;;  %v4306_v28 = vld [vmem:[#allocation2 + $0xe2] sm:$0xff] }
 0x4f6   : > { %v7078_v50 = vadd.f32 %v7077_v9, %v7076_v62  ;;  %v7183_v4 = vpop.f32.mrb[199].mxu0 }
 0x4f7   : > { %v9201_v19 = vadd.f32 %v7181_v32, %v7069_v43  ;;  %v7184_v47 = vadd.f32 %v7183_v4, %v7182_v44  ;;  %5534 = vmatmul.mubr.bf16.gmra.mrb[20].mxu1 %v4271_v24  ;;  %v4303_v43 = vld [vmem:[#allocation2 + $0xc2] sm:$0xff] }
 0x4f8   : > { %5687 = vmatmul.mubr.bf16.gmra.mrb[48].mxu0 %v9144_v51  ;;  %5541 = vmatprep.mubr.bf16.mxu1 %v9165_v0  ;;  %v9207_v51 = vpack.c.bf16 %v4130_v39, %v4129_v42  ;;  %v4329_v61 = vpack.c.bf16 %v4304_v41, %v4303_v43 }
 0x4f9   : > { %v9205_v36 = vadd.f32 %v7184_v47, %v7072_v7  ;;  %5694 = vmatprep.mubr.bf16.mxu0 %v4272_v34  ;;  %v4292_v47 = vld [vmem:[#allocation2 + $0x3a] sm:$0xff] }
 0x4fa   : > { %v7079_v40 = vpop.f32.mrb[172].mxu1 }
 0x4fb   : > { %v7185_v49 = vpop.f32.mrb[200].mxu0  ;;  %v7080_v23 = vpop.f32.mrb[173].mxu1 }
 0x4fc   : > { %v7081_v11 = vadd.f32 %v7080_v23, %v7079_v40  ;;  %v7186_v57 = vpop.f32.mrb[201].mxu0  ;;  %v7082_v25 = vpop.f32.mrb[174].mxu1 }
 0x4fd   : > { %v7187_v60 = vadd.f32 %v7186_v57, %v7185_v49  ;;  %v7188_v48 = vpop.f32.mrb[202].mxu0  ;;  %v7083_v59 = vpop.f32.mrb[175].mxu1  ;;  %v4323_v57 = vpack.c.bf16 %v4292_v47, %v4291_v55 }
 0x4fe   : > { %v7084_v26 = vadd.f32 %v7083_v59, %v7082_v25  ;;  %v7189_v22 = vpop.f32.mrb[203].mxu0  ;;  %v4293_v59 = vld [vmem:[#allocation2 + $0x4a] sm:$0xff] }
 0x4ff   : > { %v9209_v30 = vadd.f32 %v7187_v60, %v7075_v29  ;;  %v7190_v46 = vadd.f32 %v7189_v22, %v7188_v48  ;;  %5542 = vmatmul.mubr.bf16.gmra.mrb[24].mxu1 %v4272_v34  ;;  %v4305_v29 = vld [vmem:[#allocation2 + $0xda] sm:$0xff] }
 0x500   : > { %5695 = vmatmul.mubr.bf16.gmra.mrb[52].mxu0 %v9152_v18  ;;  %5549 = vmatprep.mubr.bf16.mxu1 %v9207_v51 }
 0x501   : > { %v9213_v35 = vadd.f32 %v7190_v46, %v7078_v50  ;;  %5702 = vmatprep.mubr.bf16.mxu0 %v4273_v3  ;;  %v7988_v50 = vld [vmem:[#allocation2] sm:$0xff] }
 0x502   : > { %v7085_v33 = vpop.f32.mrb[176].mxu1  ;;  %v4210_v4 = vpack.c.bf16 %v7988_v50, %v7988_v50 }
 0x503   : > { %v7191_v10 = vpop.f32.mrb[204].mxu0  ;;  %v7086_v38 = vpop.f32.mrb[177].mxu1 }
 0x504   : > { %v7087_v15 = vadd.f32 %v7086_v38, %v7085_v33  ;;  %v7192_v27 = vpop.f32.mrb[205].mxu0  ;;  %v7088_v56 = vpop.f32.mrb[178].mxu1  ;;  %v4296_v33 = vld [vmem:[#allocation2 + $0x6a] sm:$0xff] }
 0x505   : > { %v7193_v17 = vadd.f32 %v7192_v27, %v7191_v10  ;;  %v7194_v5 = vpop.f32.mrb[206].mxu0  ;;  %v7089_v7 = vpop.f32.mrb[179].mxu1 }
 0x506   : > { %v7090_v18 = vadd.f32 %v7089_v7, %v7088_v56  ;;  %v7195_v58 = vpop.f32.mrb[207].mxu0 }
 0x507   : > { %v9215_v24 = vadd.f32 %v7193_v17, %v7081_v11  ;;  %v7196_v53 = vadd.f32 %v7195_v58, %v7194_v5  ;;  %5550 = vmatmul.mubr.bf16.gmra.mrb[28].mxu1 %v4273_v3  ;;  %v4295_v3 = vld [vmem:[#allocation2 + $0x62] sm:$0xff] }
 0x508   : > { %5703 = vmatmul.mubr.bf16.gmra.mrb[56].mxu0 %v9160_v1  ;;  %7733 = vmatprep.mubr.bf16.mxu1 %v4329_v61  ;;  %v4330_v1 = vpack.c.bf16 %v4306_v28, %v4305_v29  ;;  %v4325_v27 = vpack.c.bf16 %v4296_v33, %v4295_v3  ;;  %v4300_v29 = vld [vmem:[#allocation2 + $0x9a] sm:$0xff] }
 0x509   : > { %v9218_v14 = vadd.f32 %v7196_v53, %v7084_v26  ;;  %5710 = vmatprep.mubr.bf16.mxu0 %v4274_v6  ;;  %v4294_v26 = vld [vmem:[#allocation2 + $0x52] sm:$0xff]  ;;  %v4297_v6 = vld [vmem:[#allocation2 + $0x7a] sm:$0xff] }
 0x50a   : > { %v7091_v2 = vpop.f32.mrb[180].mxu1  ;;  %v4324_v41 = vpack.c.bf16 %v4294_v26, %v4293_v59  ;;  %v4321_v26 = vld [vmem:[#allocation2 + $0x19a] sm:$0xff] }
 0x50b   : > { %v7197_v62 = vpop.f32.mrb[208].mxu0  ;;  %v7092_v21 = vpop.f32.mrb[181].mxu1 }
 0x50c   : > { %v7093_v32 = vadd.f32 %v7092_v21, %v7091_v2  ;;  %v7198_v44 = vpop.f32.mrb[209].mxu0  ;;  %v7094_v9 = vpop.f32.mrb[182].mxu1  ;;  %v4299_v2 = vld [vmem:[#allocation2 + $0x92] sm:$0xff] }
 0x50d   : > { %v7199_v34 = vadd.f32 %v7198_v44, %v7197_v62  ;;  %v7200_v40 = vpop.f32.mrb[210].mxu0  ;;  %v7095_v49 = vpop.f32.mrb[183].mxu1  ;;  %v4327_v50 = vpack.c.bf16 %v4300_v29, %v4299_v2 }
 0x50e   : > { %v7096_v23 = vadd.f32 %v7095_v49, %v7094_v9  ;;  %v7201_v42 = vpop.f32.mrb[211].mxu0  ;;  %v4302_v49 = vld [vmem:[#allocation2 + $0xb2] sm:$0xff] }
 0x50f   : > { %v9220_v39 = vadd.f32 %v7199_v34, %v7087_v15  ;;  %v7202_v11 = vadd.f32 %v7201_v42, %v7200_v40  ;;  %7734 = vmatmul.mubr.bf16.vlgmr.msra.gmra.mrb[32].mxu1 %v4330_v1  ;;  %v4301_v40 = vld [vmem:[#allocation2 + $0xaa] sm:$0xff] }
 0x510   : > { %5711 = vmatmul.mubr.bf16.gmra.mrb[60].mxu0 %v4210_v4  ;;  %7737 = vmatprep.mubr.bf16.mxu1 %v9125_v54 }
 0x511   : > { %v9223_v25 = vadd.f32 %v7202_v11, %v7090_v18  ;;  %7721 = vmatprep.mubr.bf16.mxu0 %v4323_v57  ;;  %v4298_v18 = vld [vmem:[#allocation2 + $0x82] sm:$0xff] }
 0x512   : > { %v7097_v37 = vpop.f32.mrb[184].mxu1  ;;  %v4326_v44 = vpack.c.bf16 %v4298_v18, %v4297_v6 }
 0x513   : > { %v7203_v60 = vpop.f32.mrb[212].mxu0  ;;  %v7098_v48 = vpop.f32.mrb[185].mxu1 }
 0x514   : > { %v7099_v22 = vadd.f32 %v7098_v48, %v7097_v37  ;;  %v7204_v12 = vpop.f32.mrb[213].mxu0  ;;  %v7100_v46 = vpop.f32.mrb[186].mxu1  ;;  %v4328_v48 = vpack.c.bf16 %v4302_v49, %v4301_v40 }
 0x515   : > { %v7205_v31 = vadd.f32 %v7204_v12, %v7203_v60  ;;  %v7206_v13 = vpop.f32.mrb[214].mxu0  ;;  %v7101_v10 = vpop.f32.mrb[187].mxu1 }
 0x516   : > { %v7102_v38 = vadd.f32 %v7101_v10, %v7100_v46  ;;  %v7207_v43 = vpop.f32.mrb[215].mxu0 }
 0x517   : > { %v9225_v54 = vadd.f32 %v7205_v31, %v7093_v32  ;;  %v7208_v15 = vadd.f32 %v7207_v43, %v7206_v13  ;;  %7738 = vmatmul.mubr.bf16.gmra.mrb[36].mxu1 %v9133_v20 }
 0x518   : > { %7722 = vmatmul.mubr.bf16.vlgmr.msra.gmra.mrb[64].mxu0 %v4324_v41  ;;  %7741 = vmatprep.mubr.bf16.mxu1 %v9141_v16 }
 0x519   : > { %v9229_v56 = vadd.f32 %v7208_v15, %v7096_v23  ;;  %7725 = vmatprep.mubr.bf16.mxu0 %v4325_v27 }
 0x51a   : > { %v7103_v17 = vpop.f32.mrb[188].mxu1 }
 0x51b   : > { %v7209_v5 = vpop.f32.mrb[216].mxu0  ;;  %v7104_v7 = vpop.f32.mrb[189].mxu1 }
 0x51c   : > { %v7105_v58 = vadd.f32 %v7104_v7, %v7103_v17  ;;  %v7210_v61 = vpop.f32.mrb[217].mxu0  ;;  %v7106_v53 = vpop.f32.mrb[190].mxu1 }
 0x51d   : > { %v7211_v28 = vadd.f32 %v7210_v61, %v7209_v5  ;;  %v7212_v62 = vpop.f32.mrb[218].mxu0  ;;  %v7107_v20 = vpop.f32.mrb[191].mxu1 }
 0x51e   : > { %v7108_v21 = vadd.f32 %v7107_v20, %v7106_v53  ;;  %v7213_v32 = vpop.f32.mrb[219].mxu0 }
 0x51f   : > { %v9231_v16 = vadd.f32 %v7211_v28, %v7099_v22  ;;  %v7214_v9 = vadd.f32 %v7213_v32, %v7212_v62  ;;  %7742 = vmatmul.mubr.bf16.gmra.mrb[40].mxu1 %v9149_v45  ;;  %v4322_v22 = vld [vmem:[#allocation2 + $0x1a2] sm:$0xff] }
 0x520   : > { %7726 = vmatmul.mubr.bf16.gmra.mrb[68].mxu0 %v4326_v44  ;;  %7745 = vmatprep.mubr.bf16.mxu1 %v9157_v52  ;;  %v4338_v31 = vpack.c.bf16 %v4322_v22, %v4321_v26 }
 0x521   : > { %v9235_v4 = vadd.f32 %v7214_v9, %v7102_v38  ;;  %7729 = vmatprep.mubr.bf16.mxu0 %v4327_v50 }
 0x522   : > { %v7109_v55 = vpop.f32.mrb[192].mxu1 }
 0x523   : > { %v7215_v47 = vpop.f32.mrb[220].mxu0  ;;  %v7110_v34 = vpop.f32.mrb[193].mxu1 }
 0x524   : > { %v7111_v1 = vadd.f32 %v7110_v34, %v7109_v55  ;;  %v7216_v23 = vpop.f32.mrb[221].mxu0  ;;  %v7112_v42 = vpop.f32.mrb[194].mxu1 }
 0x525   : > { %v7217_v11 = vadd.f32 %v7216_v23, %v7215_v47  ;;  %v7218_v57 = vpop.f32.mrb[222].mxu0  ;;  %v7113_v37 = vpop.f32.mrb[195].mxu1 }
 0x526   : > { %v7114_v60 = vadd.f32 %v7113_v37, %v7112_v42  ;;  %v7219_v45 = vpop.f32.mrb[223].mxu0 }
 0x527   : > { %v9237_v59 = vadd.f32 %v7217_v11, %v7105_v58  ;;  %v7220_v52 = vadd.f32 %v7219_v45, %v7218_v57  ;;  %7746 = vmatmul.mubr.bf16.gmra.mrb[44].mxu1 %v9165_v0 }
 0x528   : > { %7730 = vmatmul.mubr.bf16.gmra.mrb[72].mxu0 %v4328_v48  ;;  %7749 = vmatprep.mubr.bf16.mxu1 %v9207_v51 }
 0x529   : > { %v9241_v12 = vadd.f32 %v7220_v52, %v7108_v21 }
 0x52a   : > { %v7115_v46 = vpop.f32.mrb[196].mxu1 }
 0x52b   : > { %v7221_v3 = vpop.f32.mrb[224].mxu0  ;;  %v7116_v33 = vpop.f32.mrb[197].mxu1 }
 0x52c   : > { %v7117_v13 = vadd.f32 %v7116_v33, %v7115_v46  ;;  %v7222_v10 = vpop.f32.mrb[225].mxu0  ;;  %v7118_v38 = vpop.f32.mrb[198].mxu1 }
 0x52d   : > { %v7223_v43 = vadd.f32 %v7222_v10, %v7221_v3  ;;  %v7224_v41 = vpop.f32.mrb[226].mxu0  ;;  %v7119_v15 = vpop.f32.mrb[199].mxu1 }
 0x52e   : > { %v7120_v27 = vadd.f32 %v7119_v15, %v7118_v38  ;;  %v7225_v17 = vpop.f32.mrb[227].mxu0 }
 0x52f   : > { %v9243_v0 = vadd.f32 %v7223_v43, %v7111_v1  ;;  %v7226_v5 = vadd.f32 %v7225_v17, %v7224_v41  ;;  %7750 = vmatmul.mubr.bf16.gmra.mrb[48].mxu1 %v4338_v31 }
 0x531   : > { %v9245_v51 = vadd.f32 %v7226_v5, %v7114_v60 }
 0x532   : > { %v7121_v7 = vpop.f32.mrb[200].mxu1 }
 0x533   : > { %v7227_v6 = vpop.f32.mrb[228].mxu0  ;;  %v7122_v18 = vpop.f32.mrb[201].mxu1 }
 0x534   : > { %v7123_v58 = vadd.f32 %v7122_v18, %v7121_v7  ;;  %v7228_v61 = vpop.f32.mrb[229].mxu0  ;;  %v7124_v53 = vpop.f32.mrb[202].mxu1 }
 0x535   : > { %v7229_v2 = vadd.f32 %v7228_v61, %v7227_v6  ;;  %v7230_v29 = vpop.f32.mrb[230].mxu0  ;;  %v7125_v28 = vpop.f32.mrb[203].mxu1 }
 0x536   : > { %v7126_v62 = vadd.f32 %v7125_v28, %v7124_v53  ;;  %v7231_v20 = vpop.f32.mrb[231].mxu0 }
 0x537   : > { %v9247_v21 = vadd.f32 %v7229_v2, %v7117_v13  ;;  %v7232_v32 = vadd.f32 %v7231_v20, %v7230_v29 }
 0x539   : > { %v9249_v44 = vadd.f32 %v7232_v32, %v7120_v27 }
 0x53a   : > { %v7127_v9 = vpop.f32.mrb[204].mxu1 }
 0x53b   : > { %v7233_v50 = vpop.f32.mrb[232].mxu0  ;;  %v7128_v55 = vpop.f32.mrb[205].mxu1 }
 0x53c   : > { %v7129_v47 = vadd.f32 %v7128_v55, %v7127_v9  ;;  %v7234_v34 = vpop.f32.mrb[233].mxu0  ;;  %v7130_v40 = vpop.f32.mrb[206].mxu1 }
 0x53d   : > { %v7235_v49 = vadd.f32 %v7234_v34, %v7233_v50  ;;  %v7236_v1 = vpop.f32.mrb[234].mxu0  ;;  %v7131_v23 = vpop.f32.mrb[207].mxu1 }
 0x53e   : > { %v7132_v42 = vadd.f32 %v7131_v23, %v7130_v40  ;;  %v7237_v11 = vpop.f32.mrb[235].mxu0 }
 0x53f   : > { %v9251_v57 = vadd.f32 %v7235_v49, %v7123_v58  ;;  %v7238_v37 = vadd.f32 %v7237_v11, %v7236_v1 }
 0x541   : > { %v9253_v60 = vadd.f32 %v7238_v37, %v7126_v62 }
 0x542   : > { %v7133_v45 = vpop.f32.mrb[208].mxu1 }
 0x543   : > { %v7239_v48 = vpop.f32.mrb[236].mxu0  ;;  %v7134_v52 = vpop.f32.mrb[209].mxu1 }
 0x544   : > { %v7135_v26 = vadd.f32 %v7134_v52, %v7133_v45  ;;  %v7240_v22 = vpop.f32.mrb[237].mxu0  ;;  %v7136_v46 = vpop.f32.mrb[210].mxu1 }
 0x545   : > { %v7241_v3 = vadd.f32 %v7240_v22, %v7239_v48  ;;  %v7242_v33 = vpop.f32.mrb[238].mxu0  ;;  %v7137_v31 = vpop.f32.mrb[211].mxu1 }
 0x546   : > { %v7138_v13 = vadd.f32 %v7137_v31, %v7136_v46  ;;  %v7243_v10 = vpop.f32.mrb[239].mxu0 }
 0x547   : > { %v9255_v38 = vadd.f32 %v7241_v3, %v7129_v47  ;;  %v7244_v43 = vadd.f32 %v7243_v10, %v7242_v33 }
 0x549   : > { %v9257_v41 = vadd.f32 %v7244_v43, %v7132_v42 }
 0x54a   : > { %v7139_v15 = vpop.f32.mrb[212].mxu1 }
 0x54b   : > { %v7245_v27 = vpop.f32.mrb[240].mxu0  ;;  %v7140_v17 = vpop.f32.mrb[213].mxu1 }
 0x54c   : > { %v7141_v5 = vadd.f32 %v7140_v17, %v7139_v15  ;;  %v7246_v7 = vpop.f32.mrb[241].mxu0  ;;  %v7142_v6 = vpop.f32.mrb[214].mxu1 }
 0x54d   : > { %v7247_v18 = vadd.f32 %v7246_v7, %v7245_v27  ;;  %v7248_v58 = vpop.f32.mrb[242].mxu0  ;;  %v7143_v61 = vpop.f32.mrb[215].mxu1 }
 0x54e   : > { %v7144_v53 = vadd.f32 %v7143_v61, %v7142_v6  ;;  %v7249_v2 = vpop.f32.mrb[243].mxu0 }
 0x54f   : > { %v9259_v29 = vadd.f32 %v7247_v18, %v7135_v26  ;;  %v7250_v28 = vadd.f32 %v7249_v2, %v7248_v58 }
 0x551   : > { %v9261_v62 = vadd.f32 %v7250_v28, %v7138_v13 }
 0x552   : > { %v7145_v20 = vpop.f32.mrb[216].mxu1 }
 0x553   : > { %v7251_v32 = vpop.f32.mrb[244].mxu0  ;;  %v7146_v9 = vpop.f32.mrb[217].mxu1 }
 0x554   : > { %v7147_v50 = vadd.f32 %v7146_v9, %v7145_v20  ;;  %v7252_v55 = vpop.f32.mrb[245].mxu0  ;;  %v7148_v47 = vpop.f32.mrb[218].mxu1 }
 0x555   : > { %v7253_v34 = vadd.f32 %v7252_v55, %v7251_v32  ;;  %v7254_v40 = vpop.f32.mrb[246].mxu0  ;;  %v7149_v49 = vpop.f32.mrb[219].mxu1 }
 0x556   : > { %v7150_v1 = vadd.f32 %v7149_v49, %v7148_v47  ;;  %v7255_v23 = vpop.f32.mrb[247].mxu0 }
 0x557   : > { %v9263_v42 = vadd.f32 %v7253_v34, %v7141_v5  ;;  %v7256_v11 = vadd.f32 %v7255_v23, %v7254_v40 }
 0x559   : > { %v9265_v37 = vadd.f32 %v7256_v11, %v7144_v53 }
 0x55a   : > { %v7151_v45 = vpop.f32.mrb[220].mxu1 }
 0x55b   : > { %v7257_v48 = vpop.f32.mrb[248].mxu0  ;;  %v7152_v52 = vpop.f32.mrb[221].mxu1 }
 0x55c   : > { %v7153_v26 = vadd.f32 %v7152_v52, %v7151_v45  ;;  %v7258_v22 = vpop.f32.mrb[249].mxu0  ;;  %v7154_v46 = vpop.f32.mrb[222].mxu1 }
 0x55d   : > { %v7259_v3 = vadd.f32 %v7258_v22, %v7257_v48  ;;  %v7260_v33 = vpop.f32.mrb[250].mxu0  ;;  %v7155_v31 = vpop.f32.mrb[223].mxu1 }
 0x55e   : > { %v7156_v13 = vadd.f32 %v7155_v31, %v7154_v46  ;;  %v7261_v10 = vpop.f32.mrb[251].mxu0 }
 0x55f   : > { %v9267_v43 = vadd.f32 %v7259_v3, %v7147_v50  ;;  %v7262_v15 = vadd.f32 %v7261_v10, %v7260_v33 }
 0x561   : > { %v9269_v27 = vadd.f32 %v7262_v15, %v7150_v1 }
 0x562   : > { %v7285_v17 = vpop.f32.mrb[224].mxu1 }
 0x563   : > { %v7263_v5 = vpop.f32.mrb[252].mxu0  ;;  %v7286_v7 = vpop.f32.mrb[225].mxu1 }
 0x564   : > { %v7264_v6 = vpop.f32.mrb[253].mxu0  ;;  %v7287_v18 = vadd.f32 %v7286_v7, %v7285_v17  ;;  %v7288_v58 = vpop.f32.mrb[226].mxu1 }
 0x565   : > { %v7265_v61 = vadd.f32 %v7264_v6, %v7263_v5  ;;  %v7266_v53 = vpop.f32.mrb[254].mxu0  ;;  %v7289_v2 = vpop.f32.mrb[227].mxu1 }
 0x566   : > { %v5432_v28 = vadd.f32 %v7287_v18, %v9194_v63  ;;  %v7267_v20 = vpop.f32.mrb[255].mxu0  ;;  %v7290_v32 = vadd.f32 %v7289_v2, %v7288_v58 }
 0x567   : > { %v9272_v9 = vadd.f32 %v7265_v61, %v7153_v26  ;;  %v7268_v50 = vadd.f32 %v7267_v20, %v7266_v53 }
 0x568   : > { %v5435_v55 = vadd.f32 %v7290_v32, %v9199_v8 }
 0x569   : > { %v9275_v47 = vadd.f32 %v7268_v50, %v7156_v13 }
 0x56a   : > { %v7291_v34 = vpop.f32.mrb[228].mxu1 }
 0x56b   : > { %v7397_v40 = vpop.f32.mrb[0].mxu0  ;;  %v7292_v49 = vpop.f32.mrb[229].mxu1 }
 0x56c   : > { %v7293_v1 = vadd.f32 %v7292_v49, %v7291_v34  ;;  %v7398_v23 = vpop.f32.mrb[1].mxu0  ;;  %v7294_v11 = vpop.f32.mrb[230].mxu1 }
 0x56d   : > { %v7399_v45 = vadd.f32 %v7398_v23, %v7397_v40  ;;  %v7400_v48 = vpop.f32.mrb[2].mxu0  ;;  %v7295_v52 = vpop.f32.mrb[231].mxu1 }
 0x56e   : > { %v5440_v63 = vadd.f32 %v7293_v1, %v9201_v19  ;;  %v7296_v22 = vadd.f32 %v7295_v52, %v7294_v11  ;;  %v7401_v46 = vpop.f32.mrb[3].mxu0 }
 0x56f   : > { %v7402_v26 = vadd.f32 %v7401_v46, %v7400_v48  ;;  %v9278_v3 = vadd.f32 %v7399_v45, %v5432_v28 }
 0x570   : > { %v5443_v8 = vadd.f32 %v7296_v22, %v9205_v36 }
 0x571   : > { %v9281_v33 = vadd.f32 %v7402_v26, %v5435_v55 }
 0x572   : > { %v7297_v31 = vpop.f32.mrb[232].mxu1 }
 0x573   : > { %v7403_v13 = vpop.f32.mrb[4].mxu0  ;;  %v7298_v10 = vpop.f32.mrb[233].mxu1 }
 0x574   : > { %v7299_v15 = vadd.f32 %v7298_v10, %v7297_v31  ;;  %v7404_v17 = vpop.f32.mrb[5].mxu0  ;;  %v7300_v5 = vpop.f32.mrb[234].mxu1 }
 0x575   : > { %v7405_v7 = vadd.f32 %v7404_v17, %v7403_v13  ;;  %v7406_v6 = vpop.f32.mrb[6].mxu0  ;;  %v7301_v18 = vpop.f32.mrb[235].mxu1 }
 0x576   : > { %v5448_v19 = vadd.f32 %v7299_v15, %v9209_v30  ;;  %v7302_v58 = vadd.f32 %v7301_v18, %v7300_v5  ;;  %v7407_v61 = vpop.f32.mrb[7].mxu0 }
 0x577   : > { %v7408_v53 = vadd.f32 %v7407_v61, %v7406_v6  ;;  %v9284_v2 = vadd.f32 %v7405_v7, %v5440_v63 }
 0x578   : > { %v5451_v36 = vadd.f32 %v7302_v58, %v9213_v35 }
 0x579   : > { %v9287_v28 = vadd.f32 %v7408_v53, %v5443_v8 }
 0x57a   : > { %v7303_v20 = vpop.f32.mrb[236].mxu1 }
 0x57b   : > { %v7409_v32 = vpop.f32.mrb[8].mxu0  ;;  %v7304_v50 = vpop.f32.mrb[237].mxu1 }
 0x57c   : > { %v7305_v55 = vadd.f32 %v7304_v50, %v7303_v20  ;;  %v7410_v34 = vpop.f32.mrb[9].mxu0  ;;  %v7306_v40 = vpop.f32.mrb[238].mxu1 }
 0x57d   : > { %v7411_v49 = vadd.f32 %v7410_v34, %v7409_v32  ;;  %v7412_v1 = vpop.f32.mrb[10].mxu0  ;;  %v7307_v23 = vpop.f32.mrb[239].mxu1 }
 0x57e   : > { %v5456_v30 = vadd.f32 %v7305_v55, %v9215_v24  ;;  %v7308_v11 = vadd.f32 %v7307_v23, %v7306_v40  ;;  %v7413_v45 = vpop.f32.mrb[11].mxu0 }
 0x57f   : > { %v7414_v48 = vadd.f32 %v7413_v45, %v7412_v1  ;;  %v9290_v52 = vadd.f32 %v7411_v49, %v5448_v19 }
 0x580   : > { %v5459_v35 = vadd.f32 %v7308_v11, %v9218_v14 }
 0x581   : > { %v9293_v63 = vadd.f32 %v7414_v48, %v5451_v36 }
 0x582   : > { %v7309_v22 = vpop.f32.mrb[240].mxu1 }
 0x583   : > { %v7415_v46 = vpop.f32.mrb[12].mxu0  ;;  %v7310_v26 = vpop.f32.mrb[241].mxu1 }
 0x584   : > { %v7311_v8 = vadd.f32 %v7310_v26, %v7309_v22  ;;  %v7416_v31 = vpop.f32.mrb[13].mxu0  ;;  %v7312_v13 = vpop.f32.mrb[242].mxu1 }
 0x585   : > { %v7417_v10 = vadd.f32 %v7416_v31, %v7415_v46  ;;  %v7418_v15 = vpop.f32.mrb[14].mxu0  ;;  %v7313_v17 = vpop.f32.mrb[243].mxu1 }
 0x586   : > { %v5464_v24 = vadd.f32 %v7311_v8, %v9220_v39  ;;  %v7314_v5 = vadd.f32 %v7313_v17, %v7312_v13  ;;  %v7419_v7 = vpop.f32.mrb[15].mxu0 }
 0x587   : > { %v7420_v6 = vadd.f32 %v7419_v7, %v7418_v15  ;;  %v9296_v18 = vadd.f32 %v7417_v10, %v5456_v30 }
 0x588   : > { %v5467_v14 = vadd.f32 %v7314_v5, %v9223_v25 }
 0x589   : > { %v9299_v19 = vadd.f32 %v7420_v6, %v5459_v35 }
 0x58a   : > { %v7315_v58 = vpop.f32.mrb[244].mxu1 }
 0x58b   : > { %v7421_v61 = vpop.f32.mrb[16].mxu0  ;;  %v7316_v53 = vpop.f32.mrb[245].mxu1 }
 0x58c   : > { %v7317_v36 = vadd.f32 %v7316_v53, %v7315_v58  ;;  %v7422_v20 = vpop.f32.mrb[17].mxu0  ;;  %v7318_v32 = vpop.f32.mrb[246].mxu1 }
 0x58d   : > { %v7423_v50 = vadd.f32 %v7422_v20, %v7421_v61  ;;  %v7424_v55 = vpop.f32.mrb[18].mxu0  ;;  %v7319_v34 = vpop.f32.mrb[247].mxu1 }
 0x58e   : > { %v5472_v39 = vadd.f32 %v7317_v36, %v9225_v54  ;;  %v7320_v40 = vadd.f32 %v7319_v34, %v7318_v32  ;;  %v7425_v49 = vpop.f32.mrb[19].mxu0 }
 0x58f   : > { %v7426_v1 = vadd.f32 %v7425_v49, %v7424_v55  ;;  %v9302_v23 = vadd.f32 %v7423_v50, %v5464_v24 }
 0x590   : > { %v5475_v25 = vadd.f32 %v7320_v40, %v9229_v56 }
 0x591   : > { %v9305_v30 = vadd.f32 %v7426_v1, %v5467_v14 }
 0x592   : > { %v7321_v11 = vpop.f32.mrb[248].mxu1 }
 0x593   : > { %v7427_v45 = vpop.f32.mrb[20].mxu0  ;;  %v7322_v48 = vpop.f32.mrb[249].mxu1 }
 0x594   : > { %v7323_v35 = vadd.f32 %v7322_v48, %v7321_v11  ;;  %v7428_v22 = vpop.f32.mrb[21].mxu0  ;;  %v7324_v46 = vpop.f32.mrb[250].mxu1 }
 0x595   : > { %v7429_v26 = vadd.f32 %v7428_v22, %v7427_v45  ;;  %v7430_v8 = vpop.f32.mrb[22].mxu0  ;;  %v7325_v31 = vpop.f32.mrb[251].mxu1 }
 0x596   : > { %v5480_v54 = vadd.f32 %v7323_v35, %v9231_v16  ;;  %v7326_v13 = vadd.f32 %v7325_v31, %v7324_v46  ;;  %v7431_v10 = vpop.f32.mrb[23].mxu0 }
 0x597   : > { %v7432_v15 = vadd.f32 %v7431_v10, %v7430_v8  ;;  %v9308_v17 = vadd.f32 %v7429_v26, %v5472_v39 }
 0x598   : > { %v5483_v56 = vadd.f32 %v7326_v13, %v9235_v4 }
 0x599   : > { %v9311_v24 = vadd.f32 %v7432_v15, %v5475_v25 }
 0x59a   : > { %v7327_v5 = vpop.f32.mrb[252].mxu1 }
 0x59b   : > { %v7433_v7 = vpop.f32.mrb[24].mxu0  ;;  %v7328_v6 = vpop.f32.mrb[253].mxu1 }
 0x59c   : > { %v7329_v14 = vadd.f32 %v7328_v6, %v7327_v5  ;;  %v7434_v58 = vpop.f32.mrb[25].mxu0  ;;  %v7330_v61 = vpop.f32.mrb[254].mxu1 }
 0x59d   : > { %v7435_v53 = vadd.f32 %v7434_v58, %v7433_v7  ;;  %v7436_v36 = vpop.f32.mrb[26].mxu0  ;;  %v7331_v20 = vpop.f32.mrb[255].mxu1 }
 0x59e   : > { %v5488_v16 = vadd.f32 %v7329_v14, %v9237_v59  ;;  %v7332_v32 = vadd.f32 %v7331_v20, %v7330_v61  ;;  %v7437_v50 = vpop.f32.mrb[27].mxu0 }
 0x59f   : > { %v7438_v55 = vadd.f32 %v7437_v50, %v7436_v36  ;;  %v9314_v34 = vadd.f32 %v7435_v53, %v5480_v54 }
 0x5a0   : > { %v5491_v4 = vadd.f32 %v7332_v32, %v9241_v12 }
 0x5a1   : > { %v9317_v39 = vadd.f32 %v7438_v55, %v5483_v56 }
 0x5a2   : > { %v7333_v40 = vpop.f32.mrb[0].mxu1 }
 0x5a3   : > { %v7439_v49 = vpop.f32.mrb[28].mxu0  ;;  %v7334_v1 = vpop.f32.mrb[1].mxu1 }
 0x5a4   : > { %v7335_v25 = vadd.f32 %v7334_v1, %v7333_v40  ;;  %v7440_v11 = vpop.f32.mrb[29].mxu0  ;;  %v7336_v45 = vpop.f32.mrb[2].mxu1 }
 0x5a5   : > { %v7441_v48 = vadd.f32 %v7440_v11, %v7439_v49  ;;  %v7442_v35 = vpop.f32.mrb[30].mxu0  ;;  %v7337_v22 = vpop.f32.mrb[3].mxu1 }
 0x5a6   : > { %v5496_v59 = vadd.f32 %v7335_v25, %v9243_v0  ;;  %v7338_v46 = vadd.f32 %v7337_v22, %v7336_v45  ;;  %v7443_v26 = vpop.f32.mrb[31].mxu0 }
 0x5a7   : > { %v7444_v8 = vadd.f32 %v7443_v26, %v7442_v35  ;;  %v9320_v31 = vadd.f32 %v7441_v48, %v5488_v16 }
 0x5a8   : > { %v5499_v12 = vadd.f32 %v7338_v46, %v9245_v51 }
 0x5a9   : > { %v9323_v54 = vadd.f32 %v7444_v8, %v5491_v4 }
 0x5aa   : > { %v7339_v13 = vpop.f32.mrb[4].mxu1 }
 0x5ab   : > { %v7445_v10 = vpop.f32.mrb[32].mxu0  ;;  %v7340_v15 = vpop.f32.mrb[5].mxu1 }
 0x5ac   : > { %v7341_v56 = vadd.f32 %v7340_v15, %v7339_v13  ;;  %v7446_v5 = vpop.f32.mrb[33].mxu0  ;;  %v7342_v7 = vpop.f32.mrb[6].mxu1 }
 0x5ad   : > { %v7447_v6 = vadd.f32 %v7446_v5, %v7445_v10  ;;  %v7448_v14 = vpop.f32.mrb[34].mxu0  ;;  %v7343_v58 = vpop.f32.mrb[7].mxu1 }
 0x5ae   : > { %v5504_v0 = vadd.f32 %v7341_v56, %v9247_v21  ;;  %v7344_v61 = vadd.f32 %v7343_v58, %v7342_v7  ;;  %v7449_v53 = vpop.f32.mrb[35].mxu0 }
 0x5af   : > { %v7450_v36 = vadd.f32 %v7449_v53, %v7448_v14  ;;  %v9326_v20 = vadd.f32 %v7447_v6, %v5496_v59 }
 0x5b0   : > { %v5507_v51 = vadd.f32 %v7344_v61, %v9249_v44 }
 0x5b1   : > { %v9329_v16 = vadd.f32 %v7450_v36, %v5499_v12 }
 0x5b2   : > { %v7345_v32 = vpop.f32.mrb[8].mxu1 }
 0x5b3   : > { %v7451_v50 = vpop.f32.mrb[36].mxu0  ;;  %v7346_v55 = vpop.f32.mrb[9].mxu1 }
 0x5b4   : > { %v7347_v4 = vadd.f32 %v7346_v55, %v7345_v32  ;;  %v7452_v40 = vpop.f32.mrb[37].mxu0  ;;  %v7348_v49 = vpop.f32.mrb[10].mxu1 }
 0x5b5   : > { %v7453_v1 = vadd.f32 %v7452_v40, %v7451_v50  ;;  %v7454_v25 = vpop.f32.mrb[38].mxu0  ;;  %v7349_v11 = vpop.f32.mrb[11].mxu1 }
 0x5b6   : > { %v5512_v21 = vadd.f32 %v7347_v4, %v9251_v57  ;;  %v7350_v45 = vadd.f32 %v7349_v11, %v7348_v49  ;;  %v7455_v48 = vpop.f32.mrb[39].mxu0 }
 0x5b7   : > { %v7456_v35 = vadd.f32 %v7455_v48, %v7454_v25  ;;  %v9332_v22 = vadd.f32 %v7453_v1, %v5504_v0 }
 0x5b8   : > { %v5515_v44 = vadd.f32 %v7350_v45, %v9253_v60 }
 0x5b9   : > { %v9335_v59 = vadd.f32 %v7456_v35, %v5507_v51 }
 0x5ba   : > { %v7351_v46 = vpop.f32.mrb[12].mxu1 }
 0x5bb   : > { %v7457_v26 = vpop.f32.mrb[40].mxu0  ;;  %v7352_v8 = vpop.f32.mrb[13].mxu1 }
 0x5bc   : > { %v7353_v12 = vadd.f32 %v7352_v8, %v7351_v46  ;;  %v7458_v13 = vpop.f32.mrb[41].mxu0  ;;  %v7354_v10 = vpop.f32.mrb[14].mxu1 }
 0x5bd   : > { %v7459_v15 = vadd.f32 %v7458_v13, %v7457_v26  ;;  %v7460_v56 = vpop.f32.mrb[42].mxu0  ;;  %v7355_v5 = vpop.f32.mrb[15].mxu1 }
 0x5be   : > { %v5520_v57 = vadd.f32 %v7353_v12, %v9255_v38  ;;  %v7356_v7 = vadd.f32 %v7355_v5, %v7354_v10  ;;  %v7461_v6 = vpop.f32.mrb[43].mxu0 }
 0x5bf   : > { %v7462_v14 = vadd.f32 %v7461_v6, %v7460_v56  ;;  %v9338_v58 = vadd.f32 %v7459_v15, %v5512_v21 }
 0x5c0   : > { %v5523_v60 = vadd.f32 %v7356_v7, %v9257_v41 }
 0x5c1   : > { %v9341_v0 = vadd.f32 %v7462_v14, %v5515_v44 }
 0x5c2   : > { %v7357_v61 = vpop.f32.mrb[16].mxu1 }
 0x5c3   : > { %v7463_v53 = vpop.f32.mrb[44].mxu0  ;;  %v7358_v36 = vpop.f32.mrb[17].mxu1 }
 0x5c4   : > { %v7359_v51 = vadd.f32 %v7358_v36, %v7357_v61  ;;  %v7464_v32 = vpop.f32.mrb[45].mxu0  ;;  %v7360_v50 = vpop.f32.mrb[18].mxu1 }
 0x5c5   : > { %v7465_v55 = vadd.f32 %v7464_v32, %v7463_v53  ;;  %v7466_v4 = vpop.f32.mrb[46].mxu0  ;;  %v7361_v40 = vpop.f32.mrb[19].mxu1 }
 0x5c6   : > { %v5528_v38 = vadd.f32 %v7359_v51, %v9259_v29  ;;  %v7362_v49 = vadd.f32 %v7361_v40, %v7360_v50  ;;  %v7467_v1 = vpop.f32.mrb[47].mxu0 }
 0x5c7   : > { %v7468_v25 = vadd.f32 %v7467_v1, %v7466_v4  ;;  %v9344_v11 = vadd.f32 %v7465_v55, %v5520_v57 }
 0x5c8   : > { %v5531_v41 = vadd.f32 %v7362_v49, %v9261_v62 }
 0x5c9   : > { %v9347_v21 = vadd.f32 %v7468_v25, %v5523_v60 }
 0x5ca   : > { %v7363_v45 = vpop.f32.mrb[20].mxu1 }
 0x5cb   : > { %v7469_v48 = vpop.f32.mrb[48].mxu0  ;;  %v7364_v35 = vpop.f32.mrb[21].mxu1 }
 0x5cc   : > { %v7365_v44 = vadd.f32 %v7364_v35, %v7363_v45  ;;  %v7470_v46 = vpop.f32.mrb[49].mxu0  ;;  %v7366_v26 = vpop.f32.mrb[22].mxu1 }
 0x5cd   : > { %v7471_v8 = vadd.f32 %v7470_v46, %v7469_v48  ;;  %v7472_v12 = vpop.f32.mrb[50].mxu0  ;;  %v7367_v13 = vpop.f32.mrb[23].mxu1 }
 0x5ce   : > { %v5536_v29 = vadd.f32 %v7365_v44, %v9263_v42  ;;  %v7368_v10 = vadd.f32 %v7367_v13, %v7366_v26  ;;  %v7473_v15 = vpop.f32.mrb[51].mxu0 }
 0x5cf   : > { %v7474_v56 = vadd.f32 %v7473_v15, %v7472_v12  ;;  %v9350_v5 = vadd.f32 %v7471_v8, %v5528_v38 }
 0x5d0   : > { %v5539_v62 = vadd.f32 %v7368_v10, %v9265_v37 }
 0x5d1   : > { %v9353_v57 = vadd.f32 %v7474_v56, %v5531_v41 }
 0x5d2   : > { %v7369_v7 = vpop.f32.mrb[24].mxu1 }
 0x5d3   : > { %v7475_v6 = vpop.f32.mrb[52].mxu0  ;;  %v7370_v14 = vpop.f32.mrb[25].mxu1 }
 0x5d4   : > { %v7371_v60 = vadd.f32 %v7370_v14, %v7369_v7  ;;  %v7476_v61 = vpop.f32.mrb[53].mxu0  ;;  %v7372_v53 = vpop.f32.mrb[26].mxu1 }
 0x5d5   : > { %v7477_v36 = vadd.f32 %v7476_v61, %v7475_v6  ;;  %v7478_v51 = vpop.f32.mrb[54].mxu0  ;;  %v7373_v32 = vpop.f32.mrb[27].mxu1 }
 0x5d6   : > { %v5544_v42 = vadd.f32 %v7371_v60, %v9267_v43  ;;  %v7374_v50 = vadd.f32 %v7373_v32, %v7372_v53  ;;  %v7479_v55 = vpop.f32.mrb[55].mxu0 }
 0x5d7   : > { %v7480_v4 = vadd.f32 %v7479_v55, %v7478_v51  ;;  %v9356_v40 = vadd.f32 %v7477_v36, %v5536_v29 }
 0x5d8   : > { %v5547_v37 = vadd.f32 %v7374_v50, %v9269_v27 }
 0x5d9   : > { %v9359_v38 = vadd.f32 %v7480_v4, %v5539_v62 }
 0x5da   : > { %v7375_v49 = vpop.f32.mrb[28].mxu1 }
 0x5db   : > { %v7481_v1 = vpop.f32.mrb[56].mxu0  ;;  %v7376_v25 = vpop.f32.mrb[29].mxu1 }
 0x5dc   : > { %v7377_v41 = vadd.f32 %v7376_v25, %v7375_v49  ;;  %v7482_v45 = vpop.f32.mrb[57].mxu0  ;;  %v7378_v48 = vpop.f32.mrb[30].mxu1 }
 0x5dd   : > { %v7483_v35 = vadd.f32 %v7482_v45, %v7481_v1  ;;  %v7484_v44 = vpop.f32.mrb[58].mxu0  ;;  %v7379_v46 = vpop.f32.mrb[31].mxu1 }
 0x5de   : > { %v5552_v43 = vadd.f32 %v7377_v41, %v9272_v9  ;;  %v7380_v26 = vadd.f32 %v7379_v46, %v7378_v48  ;;  %v7485_v8 = vpop.f32.mrb[59].mxu0  ;;  %v9401_v46 = vld [vmem:[%s9519_s8] ss:$0 sm:$0xff] }
 0x5df   : > { %v7486_v12 = vadd.f32 %v7485_v8, %v7484_v44  ;;  %v9362_v13 = vadd.f32 %v7483_v35, %v5544_v42 }
 0x5e0   : > { %v5555_v27 = vadd.f32 %v7380_v26, %v9275_v47 }
 0x5e1   : > { %v9365_v29 = vadd.f32 %v7486_v12, %v5547_v37 }
 0x5e2   : > { %v7735_v10 = vpop.f32.mrb[32].mxu1 }
 0x5e3   : > { %v7487_v15 = vpop.f32.mrb[60].mxu0  ;;  %v9368_v56 = vadd.f32 %v7735_v10, %v9320_v31  ;;  %v5801_v62 = vpop.f32.mrb[33].mxu1 }
 0x5e4   : > { %v7488_v7 = vpop.f32.mrb[61].mxu0  ;;  %v9371_v6 = vadd.f32 %v5801_v62, %v9314_v34  ;;  %v7736_v9 = vpop.f32.mrb[34].mxu1 }
 0x5e5   : > { %v7489_v14 = vadd.f32 %v7488_v7, %v7487_v15  ;;  %v7490_v60 = vpop.f32.mrb[62].mxu0  ;;  %v9374_v61 = vadd.f32 %v7736_v9, %v9323_v54  ;;  %v5804_v53 = vpop.f32.mrb[35].mxu1 }
 0x5e6   : > { %v7491_v47 = vpop.f32.mrb[63].mxu0  ;;  %v9377_v36 = vadd.f32 %v5804_v53, %v9317_v39  ;;  %v9389_v39 = vld [vmem:[%s9518_s7] ss:$0 sm:$0xff] }
 0x5e7   : > { %v7492_v51 = vadd.f32 %v7491_v47, %v7490_v60  ;;  %v9379_v32 = vadd.f32 %v7489_v14, %v5552_v43 }
 0x5e9   : > { %v9381_v31 = vadd.f32 %v7492_v51, %v5555_v27 }
 0x5ea   : > { %v7739_v42 = vpop.f32.mrb[36].mxu1 }
 0x5eb   : > { %v7723_v50 = vpop.f32.mrb[64].mxu0  ;;  %v5826_v34 = vadd.f32 %v7739_v42, %v9332_v22  ;;  %v5817_v55 = vpop.f32.mrb[37].mxu1 }
 0x5ec   : > { %v5762_v4 = vadd.f32 %v7723_v50, %v9284_v2  ;;  %v5753_v37 = vpop.f32.mrb[65].mxu0  ;;  %v5818_v54 = vadd.f32 %v5817_v55, %v9326_v20  ;;  %v7740_v49 = vpop.f32.mrb[38].mxu1 }
 0x5ed   : > { %v5754_v1 = vadd.f32 %v5753_v37, %v9278_v3  ;;  %v7724_v25 = vpop.f32.mrb[66].mxu0  ;;  %v5829_v41 = vadd.f32 %v7740_v49, %v9335_v59  ;;  %v5820_v45 = vpop.f32.mrb[39].mxu1 }
 0x5ee   : > { %v5765_v22 = vadd.f32 %v7724_v25, %v9287_v28  ;;  %v5756_v48 = vpop.f32.mrb[67].mxu0  ;;  %v5821_v2 = vadd.f32 %v5820_v45, %v9329_v16  ;;  %v5903_v35 = vmul.f32 %v9389_v39, %v5818_v54  ;;  %v5905_v16 = vmul.f32 %v9389_v39, %v5826_v34 }
 0x5ef   : > { %v5757_v20 = vadd.f32 %v5756_v48, %v9281_v33  ;;  %v5887_v44 = vmul.f32 %v9389_v39, %v5754_v1  ;;  %v5889_v12 = vmul.f32 %v9389_v39, %v5762_v4  ;;  %v5906_v47 = vmul.f32 %v9389_v39, %v5829_v41 }
 0x5f0   : > { %v5904_v3 = vmul.f32 %v9389_v39, %v5821_v2  ;;  %v5942_v59 = vadd.f32 %v9401_v46, %v5903_v35  ;;  %v5944_v37 = vadd.f32 %v9401_v46, %v5905_v16 }
 0x5f1   : > { %v5888_v28 = vmul.f32 %v9389_v39, %v5757_v20  ;;  %v5926_v43 = vadd.f32 %v9401_v46, %v5887_v44 }
 0x5f2   : > { %v7743_v26 = vpop.f32.mrb[40].mxu1  ;;  %v5974_v8 = vmax.f32 %v5942_v59, 0.0  ;;  %v5943_v33 = vadd.f32 %v9401_v46, %v5904_v3  ;;  %v5976_v25 = vmax.f32 %v5944_v37, 0.0 }
 0x5f3   : > { %v7727_v27 = vpop.f32.mrb[68].mxu0  ;;  %v5842_v10 = vadd.f32 %v7743_v26, %v9344_v11  ;;  %v5833_v15 = vpop.f32.mrb[41].mxu1  ;;  %v5958_v62 = vmax.f32 %v5926_v43, 0.0  ;;  %v5927_v7 = vadd.f32 %v9401_v46, %v5888_v28 }
 0x5f4   : > { %v5778_v9 = vadd.f32 %v7727_v27, %v9296_v18  ;;  %v5769_v14 = vpop.f32.mrb[69].mxu0  ;;  %v5834_v60 = vadd.f32 %v5833_v15, %v9338_v58  ;;  %v7744_v53 = vpop.f32.mrb[42].mxu1  ;;  %6022 = vxpose.xlu1.b32.start [1/16] (narrow) %v5974_v8, 8  ;;  %v5975_v18 = vmax.f32 %v5943_v33, 0.0  ;;  %v5890_v58 = vmul.f32 %v9389_v39, %v5765_v22 }
 0x5f5   : > { %v5770_v51 = vadd.f32 %v5769_v14, %v9290_v52  ;;  %v7728_v42 = vpop.f32.mrb[70].mxu0  ;;  %v5845_v50 = vadd.f32 %v7744_v53, %v9347_v21  ;;  %5990 = vxpose.xlu0.b32.start [1/16] (narrow) %v5958_v62, 8  ;;  %v5836_v11 = vpop.f32.mrb[43].mxu1  ;;  %v5959_v49 = vmax.f32 %v5927_v7, 0.0  ;;  %v5928_v52 = vadd.f32 %v9401_v46, %v5889_v12 }
 0x5f6   : > { %v5781_v34 = vadd.f32 %v7728_v42, %v9299_v19  ;;  %v5772_v55 = vpop.f32.mrb[71].mxu0  ;;  %v5837_v4 = vadd.f32 %v5836_v11, %v9341_v0  ;;  %v5945_v21 = vadd.f32 %v9401_v46, %v5906_v47  ;;  %v5907_v1 = vmul.f32 %v9389_v39, %v5834_v60 }
 0x5f7   : > { %v5773_v54 = vadd.f32 %v5772_v55, %v9293_v63  ;;  %v5891_v0 = vmul.f32 %v9389_v39, %v5770_v51  ;;  %v5960_v48 = vmax.f32 %v5928_v52, 0.0  ;;  %v5929_v63 = vadd.f32 %v9401_v46, %v5890_v58 }
 0x5f8   : > { %6023 = vxpose.xlu1.b32.cont [2/16] (narrow) %v5975_v18, 8  ;;  %v5977_v43 = vmax.f32 %v5945_v21, 0.0  ;;  %v5908_v16 = vmul.f32 %v9389_v39, %v5837_v4  ;;  %v5909_v27 = vmul.f32 %v9389_v39, %v5842_v10  ;;  %v5893_v7 = vmul.f32 %v9389_v39, %v5778_v9 }
 0x5f9   : > { %5991 = vxpose.xlu0.b32.cont [2/16] (narrow) %v5959_v49, 8  ;;  %v5892_v33 = vmul.f32 %v9389_v39, %v5773_v54  ;;  %v5961_v12 = vmax.f32 %v5929_v63, 0.0  ;;  %v5910_v42 = vmul.f32 %v9389_v39, %v5845_v50  ;;  %v5894_v55 = vmul.f32 %v9389_v39, %v5781_v34 }
 0x5fa   : > { %v7747_v19 = vpop.f32.mrb[44].mxu1  ;;  %v5932_v18 = vadd.f32 %v9401_v46, %v5893_v7 }
 0x5fb   : > { %v7731_v41 = vpop.f32.mrb[72].mxu0  ;;  %v9427_v45 = vadd.f32 %v7747_v19, %v9356_v40  ;;  %v5849_v22 = vpop.f32.mrb[45].mxu1  ;;  %v5949_v37 = vadd.f32 %v9401_v46, %v5910_v42 }
 0x5fc   : > { %v9431_v2 = vadd.f32 %v7731_v41, %v9308_v17  ;;  %v5785_v35 = vpop.f32.mrb[73].mxu0  ;;  %v5850_v20 = vadd.f32 %v5849_v22, %v9350_v5  ;;  %v7748_v44 = vpop.f32.mrb[46].mxu1  ;;  %6024 = vxpose.xlu1.b32.cont [3/16] (narrow) %v5976_v25, 8  ;;  %v5946_v5 = vadd.f32 %v9401_v46, %v5907_v1  ;;  %v5964_v50 = vmax.f32 %v5932_v18, 0.0 }
 0x5fd   : > { %v5786_v3 = vadd.f32 %v5785_v35, %v9302_v23  ;;  %v7732_v59 = vpop.f32.mrb[74].mxu0  ;;  %v9436_v28 = vadd.f32 %v7748_v44, %v9359_v38  ;;  %5992 = vxpose.xlu0.b32.cont [3/16] (narrow) %v5960_v48, 8  ;;  %v5852_v40 = vpop.f32.mrb[47].mxu1  ;;  %v5930_v38 = vadd.f32 %v9401_v46, %v5891_v0  ;;  %v5981_v34 = vmax.f32 %v5949_v37, 0.0 }
 0x5fe   : > { %v5797_v26 = vadd.f32 %v7732_v59, %v9311_v24  ;;  %v5788_v17 = vpop.f32.mrb[75].mxu0  ;;  %v5853_v8 = vadd.f32 %v5852_v40, %v9353_v57  ;;  %v5978_v62 = vmax.f32 %v5946_v5, 0.0  ;;  %v5947_v24 = vadd.f32 %v9401_v46, %v5908_v16 }
 0x5ff   : > { %v5789_v23 = vadd.f32 %v5788_v17, %v9305_v30  ;;  %v5962_v60 = vmax.f32 %v5930_v38, 0.0  ;;  %v5931_v30 = vadd.f32 %v9401_v46, %v5892_v33  ;;  %v5895_v58 = vmul.f32 %v9389_v39, %v5786_v3 }
 0x600   : > { %6025 = vxpose.xlu1.b32.cont [4/16] (narrow) %v5977_v43, 8  ;;  %v5979_v11 = vmax.f32 %v5947_v24, 0.0  ;;  %v5912_v54 = vmul.f32 %v9389_v39, %v5853_v8  ;;  %v5913_v19 = vmul.f32 %v9389_v39, %v9427_v45  ;;  %v5897_v41 = vmul.f32 %v9389_v39, %v9431_v2 }
 0x601   : > { %5993 = vxpose.xlu0.b32.cont [4/16] (narrow) %v5961_v12, 8  ;;  %v5963_v4 = vmax.f32 %v5931_v30, 0.0  ;;  %v5896_v52 = vmul.f32 %v9389_v39, %v5789_v23  ;;  %v5934_v1 = vadd.f32 %v9401_v46, %v5895_v58  ;;  %v5914_v63 = vmul.f32 %v9389_v39, %v9436_v28 }
 0x602   : > { %v7751_v15 = vpop.f32.mrb[48].mxu1  ;;  %v5951_v0 = vadd.f32 %v9401_v46, %v5912_v54  ;;  %v5898_v44 = vmul.f32 %v9389_v39, %v5797_v26  ;;  %v5936_v3 = vadd.f32 %v9401_v46, %v5897_v41  ;;  %v5899_v43 = vmul.f32 %v9389_v39, %v9371_v6 }
 0x603   : > { %v9449_v57 = vadd.f32 %v7751_v15, %v9379_v32  ;;  %v5865_v14 = vpop.f32.mrb[49].mxu1  ;;  %v5948_v32 = vadd.f32 %v9401_v46, %v5909_v27  ;;  %v5966_v22 = vmax.f32 %v5934_v1, 0.0  ;;  %v5935_v48 = vadd.f32 %v9401_v46, %v5896_v52 }
 0x604   : > { %v5866_v53 = vadd.f32 %v5865_v14, %v9362_v13  ;;  %v7752_v47 = vpop.f32.mrb[50].mxu1  ;;  %6026 = vxpose.xlu1.b32.cont [5/16] (narrow) %v5978_v62, 8  ;;  %v5911_v13 = vmul.f32 %v9389_v39, %v5850_v20  ;;  %v5983_v35 = vmax.f32 %v5951_v0, 0.0  ;;  %v5952_v20 = vadd.f32 %v9401_v46, %v5913_v19 }
 0x605   : > { %v9454_v51 = vadd.f32 %v7752_v47, %v9381_v31  ;;  %5994 = vxpose.xlu0.b32.cont [5/16] (narrow) %v5962_v60, 8  ;;  %v5868_v10 = vpop.f32.mrb[51].mxu1  ;;  %v5980_v31 = vmax.f32 %v5948_v32, 0.0  ;;  %v5967_v45 = vmax.f32 %v5935_v48, 0.0  ;;  %v5953_v40 = vadd.f32 %v9401_v46, %v5914_v63 }
 0x606   : > { %v5869_v9 = vadd.f32 %v5868_v10, %v9365_v29  ;;  %v5933_v29 = vadd.f32 %v9401_v46, %v5894_v55  ;;  %v5950_v49 = vadd.f32 %v9401_v46, %v5911_v13  ;;  %v5915_v2 = vmul.f32 %v9389_v39, %v5866_v53 }
 0x607   : > { %v5984_v59 = vmax.f32 %v5952_v20, 0.0  ;;  %v5968_v16 = vmax.f32 %v5936_v3, 0.0  ;;  %v5937_v28 = vadd.f32 %v9401_v46, %v5898_v44  ;;  %v5985_v17 = vmax.f32 %v5953_v40, 0.0 }
 0x608   : > { %6027 = vxpose.xlu1.b32.cont [6/16] (narrow) %v5979_v11, 8  ;;  %v5965_v21 = vmax.f32 %v5933_v29, 0.0  ;;  %v5982_v25 = vmax.f32 %v5950_v49, 0.0  ;;  %v5916_v26 = vmul.f32 %v9389_v39, %v5869_v9  ;;  %v5954_v8 = vadd.f32 %v9401_v46, %v5915_v2 }
 0x609   : > { %5995 = vxpose.xlu0.b32.cont [6/16] (narrow) %v5963_v4, 8  ;;  %v5900_v5 = vmul.f32 %v9389_v39, %v9377_v36  ;;  %v5969_v33 = vmax.f32 %v5937_v28, 0.0  ;;  %v5938_v23 = vadd.f32 %v9401_v46, %v5899_v43  ;;  %v5917_v6 = vmul.f32 %v9389_v39, %v9449_v57 }
 0x60a   : > { %v5986_v12 = vmax.f32 %v5954_v8, 0.0  ;;  %v5955_v38 = vadd.f32 %v9401_v46, %v5916_v26  ;;  %v5901_v27 = vmul.f32 %v9389_v39, %v9368_v56  ;;  %v5918_v36 = vmul.f32 %v9389_v39, %v9454_v51 }
 0x60b   : > { %v5970_v15 = vmax.f32 %v5938_v23, 0.0  ;;  %v5939_v62 = vadd.f32 %v9401_v46, %v5900_v5  ;;  %v5956_v7 = vadd.f32 %v9401_v46, %v5917_v6  ;;  %v5902_v57 = vmul.f32 %v9389_v39, %v9374_v61 }
 0x60c   : > { %6028 = vxpose.xlu1.b32.cont [7/16] (narrow) %v5980_v31, 8  ;;  %v5987_v24 = vmax.f32 %v5955_v38, 0.0  ;;  %v5940_v60 = vadd.f32 %v9401_v46, %v5901_v27  ;;  %v5957_v30 = vadd.f32 %v9401_v46, %v5918_v36 }
 0x60d   : > { %5996 = vxpose.xlu0.b32.cont [7/16] (narrow) %v5964_v50, 8  ;;  %v5971_v14 = vmax.f32 %v5939_v62, 0.0  ;;  %v5988_v56 = vmax.f32 %v5956_v7, 0.0  ;;  %v5941_v47 = vadd.f32 %v9401_v46, %v5902_v57 }
 0x60e   : > { %v5972_v53 = vmax.f32 %v5940_v60, 0.0  ;;  %v5989_v51 = vmax.f32 %v5957_v30, 0.0 }
 0x60f   : > { %v5973_v10 = vmax.f32 %v5941_v47, 0.0 }
 0x610   : > { %6029 = vxpose.xlu1.b32.cont [8/16] (narrow) %v5981_v34, 8 }
 0x611   : > { %5997 = vxpose.xlu0.b32.cont [8/16] (narrow) %v5965_v21, 8 }
 0x614   : > { %6030 = vxpose.xlu1.b32.cont [9/16] (narrow) %v5982_v25, 8 }
 0x615   : > { %5998 = vxpose.xlu0.b32.cont [9/16] (narrow) %v5966_v22, 8 }
 0x618   : > { %6031 = vxpose.xlu1.b32.cont [10/16] (narrow) %v5983_v35, 8 }
 0x619   : > { %5999 = vxpose.xlu0.b32.cont [10/16] (narrow) %v5967_v45, 8 }
 0x61c   : > { %6032 = vxpose.xlu1.b32.cont [11/16] (narrow) %v5984_v59, 8 }
 0x61d   : > { %6000 = vxpose.xlu0.b32.cont [11/16] (narrow) %v5968_v16, 8 }
 0x620   : > { %6033 = vxpose.xlu1.b32.cont [12/16] (narrow) %v5985_v17, 8 }
 0x621   : > { %6001 = vxpose.xlu0.b32.cont [12/16] (narrow) %v5969_v33, 8 }
 0x624   : > { %6034 = vxpose.xlu1.b32.cont [13/16] (narrow) %v5986_v12, 8 }
 0x625   : > { %6002 = vxpose.xlu0.b32.cont [13/16] (narrow) %v5970_v15, 8 }
 0x628   : > { %6035 = vxpose.xlu1.b32.cont [14/16] (narrow) %v5987_v24, 8 }
 0x629   : > { %6003 = vxpose.xlu0.b32.cont [14/16] (narrow) %v5971_v14, 8 }
 0x62c   : > { %6036 = vxpose.xlu1.b32.cont [15/16] (narrow) %v5988_v56, 8 }
 0x62d   : > { %6004 = vxpose.xlu0.b32.cont [15/16] (narrow) %v5972_v53, 8 }
 0x630   : > { %6037 = vxpose.xlu1.b32.end [16/16] (narrow) %v5989_v51, 8 }
 0x631   : > { %6005 = vxpose.xlu0.b32.end [16/16] (narrow) %v5973_v10, 8 }
 0x674   : > { %v6038_v42 = vpop.trf.xlu1 }
 0x675   : > { %v6006_v61 = vpop.trf.xlu0 }
 0x676   : > { %v6056_v39 = vcombine.low %v6006_v61, %v6038_v42 }
 0x678   : > { %6058 = vst [vmem:[%s367_s13] sm:$0xff] %v6056_v39 }
 0x679 PF: > { %s20_s30 = sadd.s32 1, %s8027_s30  }
 0x67a   : > { %p17_p3 = scmp.ge.s32.totalorder %s20_s30, 4  }
 0x67c   :  { %19 = sbr.rel (!%p17_p3) target bundleno = 1 (0x1), region = 96 }
 0x683   :  { %6080 = vsyncpa [#allocation5], 1 }
 0x684   :  { %6082 = vsyncpa [#allocation5 + $0x1], 1 }

</bundles_post_ra>
